<compile_context>
chip_gen: v7x
topology: tpu7x:2x2x1
jax: 0.10.0
libtpu: 0.0.40
codegen_flags: <defaults>
</compile_context>

<pallas_src>
import functools
import math

import jax
import jax.numpy as jnp
from jax.experimental import pallas as pl
from jax.experimental.pallas import tpu as pltpu

NEG_INF = -1e30                     # additive mask value ("not allowed to attend")
VMEM_LIMIT = 48 * 1024 * 1024       # <= 48 MiB: safe on v7x (64 MiB physical)
LANE = 128
SUB = 8


def _round_up(x, m):
    return (x + m - 1) // m * m


def _row_tile(m_rows, pref=256):
    """Pick a row tile (multiple of 8) aiming for >= 2 blocks (v7x megacore)."""
    mp = _round_up(max(m_rows, SUB), SUB)
    if mp >= 2 * SUB:
        tm = min(pref, _round_up(mp // 2, SUB))
    else:
        tm = mp
    mp = _round_up(mp, tm)
    return mp, tm


def _pick_div(total, pref, step=LANE):
    """Largest tile <= pref (multiple of `step`) dividing `total` (a multiple of step)."""
    t = max((min(pref, total) // step) * step, step)
    while total % t:
        t -= step
    return t


def _additive(mask_bool):
    return jnp.where(mask_bool, NEG_INF, 0.0).astype(jnp.float32)


# ----------------------------------------------------------------------------
# Masked LayerNorm helper (statistics over the first e_valid lanes only;
# padded lanes carry zeros and gamma/beta are zero there, so outputs stay 0).
# ----------------------------------------------------------------------------
def _masked_ln(x, g, b, e_valid):
    ep = x.shape[-1]
    if e_valid == ep:
        mean = jnp.mean(x, axis=-1, keepdims=True)
        cent = x - mean
        var = jnp.mean(cent * cent, axis=-1, keepdims=True)
    else:
        lane = jax.lax.broadcasted_iota(jnp.int32, x.shape, x.ndim - 1)
        lmask = (lane < e_valid).astype(jnp.float32)
        inv_n = 1.0 / float(e_valid)
        mean = jnp.sum(x * lmask, axis=-1, keepdims=True) * inv_n
        cent = (x - mean) * lmask
        var = jnp.sum(cent * cent, axis=-1, keepdims=True) * inv_n
    y = (x - mean) * jax.lax.rsqrt(var + 1e-5)
    return y * g + b


# ----------------------------------------------------------------------------
# Standalone LayerNorm (final encoder / decoder norms), tiled over rows
# ----------------------------------------------------------------------------
def _ln_kernel(x_ref, g_ref, b_ref, o_ref, *, e_valid):
    x = x_ref[...].astype(jnp.float32)
    o_ref[...] = _masked_ln(x, g_ref[...], b_ref[...], e_valid).astype(o_ref.dtype)


def layer_norm(x, g, b, *, e_valid, pref_tm=512):
    M, Ep = x.shape
    Mp, tm = _row_tile(M, pref_tm)
    if Mp != M:
        x = jnp.pad(x, ((0, Mp - M), (0, 0)))
    out = pl.pallas_call(
        functools.partial(_ln_kernel, e_valid=e_valid),
        out_shape=jax.ShapeDtypeStruct((Mp, Ep), jnp.float32),
        grid=(Mp // tm,),
        in_specs=[pl.BlockSpec((tm, Ep), lambda i: (i, 0)),
                  pl.BlockSpec((1, Ep), lambda i: (0, 0)),
                  pl.BlockSpec((1, Ep), lambda i: (0, 0))],
        out_specs=pl.BlockSpec((tm, Ep), lambda i: (i, 0)),
        compiler_params=pltpu.CompilerParams(
            dimension_semantics=("parallel",), vmem_limit_bytes=VMEM_LIMIT),
    )(x, g, b)
    return out[:M]


# ----------------------------------------------------------------------------
# Fused FFN sublayer: LayerNorm(x + W2 relu(W1 x + b1) + b2), tiled over rows
# ----------------------------------------------------------------------------
def _ffn_kernel(x_ref, w1_ref, b1_ref, w2_ref, b2_ref, g_ref, bb_ref, o_ref, *,
                e_valid):
    x = x_ref[...].astype(jnp.float32)
    h = jnp.dot(x.astype(jnp.bfloat16), w1_ref[...],
                preferred_element_type=jnp.float32) + b1_ref[...]
    h = jnp.maximum(h, 0.0)
    y = jnp.dot(h.astype(jnp.bfloat16), w2_ref[...],
                preferred_element_type=jnp.float32) + b2_ref[...]
    o_ref[...] = _masked_ln(x + y, g_ref[...], bb_ref[...], e_valid).astype(o_ref.dtype)


def ffn_block(x, p, *, e_valid, pref_tm=256):
    M, Ep = x.shape
    Fp = p["w1"].shape[1]
    Mp, tm = _row_tile(M, pref_tm)
    if Mp != M:
        x = jnp.pad(x, ((0, Mp - M), (0, 0)))
    out = pl.pallas_call(
        functools.partial(_ffn_kernel, e_valid=e_valid),
        out_shape=jax.ShapeDtypeStruct((Mp, Ep), jnp.float32),
        grid=(Mp // tm,),
        in_specs=[
            pl.BlockSpec((tm, Ep), lambda i: (i, 0)),
            pl.BlockSpec((Ep, Fp), lambda i: (0, 0)),
            pl.BlockSpec((1, Fp), lambda i: (0, 0)),
            pl.BlockSpec((Fp, Ep), lambda i: (0, 0)),
            pl.BlockSpec((1, Ep), lambda i: (0, 0)),
            pl.BlockSpec((1, Ep), lambda i: (0, 0)),
            pl.BlockSpec((1, Ep), lambda i: (0, 0)),
        ],
        out_specs=pl.BlockSpec((tm, Ep), lambda i: (i, 0)),
        compiler_params=pltpu.CompilerParams(
            dimension_semantics=("parallel",), vmem_limit_bytes=VMEM_LIMIT),
    )(x, p["w1"], p["b1"], p["w2"], p["b2"], p["ln_g"], p["ln_b"])
    return out[:M]


# ----------------------------------------------------------------------------
# Fused multi-head attention sublayer (grid over batch):
#   Q/KV projections -> per-head scaled-dot-product attention (in-kernel
#   additive masks) -> per-head folded output projection -> +residual -> LN
# ----------------------------------------------------------------------------
def _mha_kernel(*refs, n_heads, e_valid, dh, is_self, has_attn_mask):
    it = iter(refs)
    xq_ref = next(it)
    xkv_ref = xq_ref if is_self else next(it)
    wq_ref = next(it); bq_ref = next(it)
    wkv_ref = next(it); bkv_ref = next(it)
    wo_ref = next(it); bo_ref = next(it)
    am_ref = next(it) if has_attn_mask else None
    kpm_ref = next(it)
    g_ref = next(it); bb_ref = next(it)
    o_ref = next(it)

    xq = xq_ref[0].astype(jnp.float32)            # (Lq, Ep)
    xkv = xkv_ref[0].astype(jnp.float32)          # (Lk, Ep)
    ep = xq.shape[-1]

    q = jnp.dot(xq.astype(jnp.bfloat16), wq_ref[...],
                preferred_element_type=jnp.float32) + bq_ref[...]
    kv = jnp.dot(xkv.astype(jnp.bfloat16), wkv_ref[...],
                 preferred_element_type=jnp.float32) + bkv_ref[...]
    k = kv[:, :ep]
    v = kv[:, ep:]

    mask = kpm_ref[0]                             # (1, Lk) additive, f32
    if has_attn_mask:
        mask = mask + am_ref[...]                 # (Lq, Lk)

    wo = wo_ref[...]                              # (Ep, Ep) bf16
    scale = 1.0 / math.sqrt(dh)
    dn = (((1,), (1,)), ((), ()))                 # q @ k^T without materializing k.T
    acc = jnp.zeros(xq.shape, jnp.float32)        # (Lq, Ep)
    for h in range(n_heads):                      # static unroll over heads
        sl = slice(h * dh, (h + 1) * dh)
        s = jax.lax.dot_general(q[:, sl].astype(jnp.bfloat16),
                                k[:, sl].astype(jnp.bfloat16), dn,
                                preferred_element_type=jnp.float32)
        s = s * scale + mask
        s = s - jnp.max(s, axis=-1, keepdims=True)
        p = jnp.exp(s)
        p = p * pl.reciprocal(jnp.sum(p, axis=-1, keepdims=True), approx=True)
        oh = jnp.dot(p.astype(jnp.bfloat16), v[:, sl].astype(jnp.bfloat16),
                     preferred_element_type=jnp.float32)
        # fold this head's slice of the output projection directly into acc
        acc = acc + jnp.dot(oh.astype(jnp.bfloat16), wo[sl, :],
                            preferred_element_type=jnp.float32)
    attn = acc + bo_ref[...]
    o_ref[0] = _masked_ln(xq + attn, g_ref[...], bb_ref[...], e_valid).astype(o_ref.dtype)


def mha_block(xq, xkv, p, attn_add, kpm_add, n_heads, *, e_valid, is_self):
    """xq: (B, Lq, Ep) query source (also the residual); xkv: (B, Lk, Ep).
    attn_add: (Lq, Lk) f32 additive mask or None; kpm_add: (B, Lk) f32 additive.
    Returns LayerNorm(xq + MHA(xq, xkv)) with shape (B, Lq, Ep)."""
    B, Lq, Ep = xq.shape
    Lk = xkv.shape[1]
    Lqp = _round_up(Lq, SUB)
    Lkp = _round_up(Lk, SUB)
    if Lqp != Lq:
        xq = jnp.pad(xq, ((0, 0), (0, Lqp - Lq), (0, 0)))
        if attn_add is not None:
            attn_add = jnp.pad(attn_add, ((0, Lqp - Lq), (0, 0)))
    if Lkp != Lk:
        xkv = jnp.pad(xkv, ((0, 0), (0, Lkp - Lk), (0, 0)))
        if attn_add is not None:
            attn_add = jnp.pad(attn_add, ((0, 0), (0, Lkp - Lk)),
                               constant_values=NEG_INF)
        kpm_add = jnp.pad(kpm_add, ((0, 0), (0, Lkp - Lk)),
                          constant_values=NEG_INF)
    kpm3 = kpm_add.reshape(B, 1, Lkp)

    has_attn_mask = attn_add is not None
    ep2 = p["wkv"].shape[1]

    operands = [xq]
    in_specs = [pl.BlockSpec((1, Lqp, Ep), lambda b: (b, 0, 0))]
    if not is_self:
        operands.append(xkv)
        in_specs.append(pl.BlockSpec((1, Lkp, Ep), lambda b: (b, 0, 0)))
    operands += [p["wq"], p["bq"], p["wkv"], p["bkv"], p["wo"], p["bo"]]
    in_specs += [
        pl.BlockSpec((Ep, Ep), lambda b: (0, 0)),
        pl.BlockSpec((1, Ep), lambda b: (0, 0)),
        pl.BlockSpec((Ep, ep2), lambda b: (0, 0)),
        pl.BlockSpec((1, ep2), lambda b: (0, 0)),
        pl.BlockSpec((Ep, Ep), lambda b: (0, 0)),
        pl.BlockSpec((1, Ep), lambda b: (0, 0)),
    ]
    if has_attn_mask:
        operands.append(attn_add)
        in_specs.append(pl.BlockSpec((Lqp, Lkp), lambda b: (0, 0)))
    operands += [kpm3, p["ln_g"], p["ln_b"]]
    in_specs += [
        pl.BlockSpec((1, 1, Lkp), lambda b: (b, 0, 0)),
        pl.BlockSpec((1, Ep), lambda b: (0, 0)),
        pl.BlockSpec((1, Ep), lambda b: (0, 0)),
    ]

    out = pl.pallas_call(
        functools.partial(_mha_kernel, n_heads=n_heads, e_valid=e_valid,
                          dh=e_valid // n_heads, is_self=is_self,
                          has_attn_mask=has_attn_mask),
        out_shape=jax.ShapeDtypeStruct((B, Lqp, Ep), jnp.float32),
        grid=(B,),
        in_specs=in_specs,
        out_specs=pl.BlockSpec((1, Lqp, Ep), lambda b: (b, 0, 0)),
        compiler_params=pltpu.CompilerParams(
            dimension_semantics=("parallel",), vmem_limit_bytes=VMEM_LIMIT),
    )(*operands)
    return out[:, :Lq, :]


# ----------------------------------------------------------------------------
# Generic tiled linear (used by the generator): bf16 MXU, f32 accumulation,
# single-K-tile fast path without a scratch accumulator.
# ----------------------------------------------------------------------------
def _linear_simple_kernel(x_ref, w_ref, b_ref, o_ref):
    o_ref[...] = (jnp.dot(x_ref[...].astype(jnp.bfloat16), w_ref[...],
                          preferred_element_type=jnp.float32)
                  + b_ref[...]).astype(o_ref.dtype)


def _linear_acc_kernel(x_ref, w_ref, b_ref, o_ref, acc_ref):
    @pl.when(pl.program_id(2) == 0)
    def _():
        acc_ref[...] = jnp.zeros_like(acc_ref)

    acc_ref[...] += jnp.dot(x_ref[...].astype(jnp.bfloat16), w_ref[...],
                            preferred_element_type=jnp.float32)

    @pl.when(pl.program_id(2) == pl.num_programs(2) - 1)
    def _():
        o_ref[...] = (acc_ref[...] + b_ref[...]).astype(o_ref.dtype)


def linear(x, w, b, *, pref_tm=256, pref_tn=256, pref_tk=512):
    """x: (M, Kp) f32; w: (Kp, Np) bf16 pre-padded; b: (1, Np) f32 -> (M, Np)."""
    M, K = x.shape
    N = w.shape[1]
    Mp, tm = _row_tile(M, pref_tm)
    tn = _pick_div(N, pref_tn)
    tk = _pick_div(K, pref_tk)
    if Mp != M:
        x = jnp.pad(x, ((0, Mp - M), (0, 0)))
    if K // tk == 1:
        out = pl.pallas_call(
            _linear_simple_kernel,
            out_shape=jax.ShapeDtypeStruct((Mp, N), jnp.float32),
            grid=(Mp // tm, N // tn),
            in_specs=[pl.BlockSpec((tm, K), lambda i, j: (i, 0)),
                      pl.BlockSpec((K, tn), lambda i, j: (0, j)),
                      pl.BlockSpec((1, tn), lambda i, j: (0, j))],
            out_specs=pl.BlockSpec((tm, tn), lambda i, j: (i, j)),
            compiler_params=pltpu.CompilerParams(
                dimension_semantics=("parallel", "parallel"),
                vmem_limit_bytes=VMEM_LIMIT),
        )(x, w, b)
    else:
        out = pl.pallas_call(
            _linear_acc_kernel,
            out_shape=jax.ShapeDtypeStruct((Mp, N), jnp.float32),
            grid=(Mp // tm, N // tn, K // tk),
            in_specs=[pl.BlockSpec((tm, tk), lambda i, j, k: (i, k)),
                      pl.BlockSpec((tk, tn), lambda i, j, k: (k, j)),
                      pl.BlockSpec((1, tn), lambda i, j, k: (0, j))],
            out_specs=pl.BlockSpec((tm, tn), lambda i, j, k: (i, j)),
            scratch_shapes=[pltpu.VMEM((tm, tn), jnp.float32)],
            compiler_params=pltpu.CompilerParams(
                dimension_semantics=("parallel", "parallel", "arbitrary"),
                vmem_limit_bytes=VMEM_LIMIT),
        )(x, w, b)
    return out[:M]


# ----------------------------------------------------------------------------
# Model glue (batch-first (B, L, Ep) lane-dense layout end-to-end)
# ----------------------------------------------------------------------------
def positional_encoding_table(maxlen, emb_size):
    den = jnp.exp(-jnp.arange(0, emb_size, 2, dtype=jnp.float32)
                  * (math.log(10000.0) / emb_size))
    pos = jnp.arange(0, maxlen, dtype=jnp.float32).reshape(maxlen, 1)
    pe = jnp.zeros((maxlen, emb_size), jnp.float32)
    pe = pe.at[:, 0::2].set(jnp.sin(pos * den))
    pe = pe.at[:, 1::2].set(jnp.cos(pos * den))
    return pe


def seq2seq_transformer_forward(pp, cfg, x, y, src_mask, tgt_mask,
                                src_kpm, tgt_kpm, mem_kpm):
    E, H = cfg["emb"], cfg["heads"]
    S, B = x.shape
    T, _ = y.shape
    Ep = pp["src_emb"].shape[1]

    # tokens arrive (L, B) like PyTorch; work batch-first internally
    xb = x.T  # (B, S)
    yb = y.T  # (B, T)

    # TODO(synk): embedding gather + dropout left to XLA (eval-mode identity dropout).
    pe = pp["pos_embedding"]
    hx = jnp.take(pp["src_emb"], xb, axis=0) * math.sqrt(E) + pe[None, :S, :]
    hy = jnp.take(pp["tgt_emb"], yb, axis=0) * math.sqrt(E) + pe[None, :T, :]

    src_attn_add = _additive(src_mask)     # (S, S)
    tgt_attn_add = _additive(tgt_mask)     # (T, T)
    src_kpm_add = _additive(src_kpm)       # (B, S)
    tgt_kpm_add = _additive(tgt_kpm)       # (B, T)
    mem_kpm_add = _additive(mem_kpm)       # (B, S)

    # ---- encoder ----
    h = hx
    for lp in pp["enc_layers"]:
        h = mha_block(h, h, lp["self_attn"], src_attn_add, src_kpm_add, H,
                      e_valid=E, is_self=True)
        h = ffn_block(h.reshape(B * S, Ep), lp["ffn"],
                      e_valid=E).reshape(B, S, Ep)
    memory = layer_norm(h.reshape(B * S, Ep), pp["enc_norm_g"],
                        pp["enc_norm_b"], e_valid=E).reshape(B, S, Ep)

    # ---- decoder (memory_mask=None -> no attn-mask operand for cross-attn) ----
    d = hy
    for lp in pp["dec_layers"]:
        d = mha_block(d, d, lp["self_attn"], tgt_attn_add, tgt_kpm_add, H,
                      e_valid=E, is_self=True)
        d = mha_block(d, memory, lp["cross_attn"], None, mem_kpm_add, H,
                      e_valid=E, is_self=False)
        d = ffn_block(d.reshape(B * T, Ep), lp["ffn"],
                      e_valid=E).reshape(B, T, Ep)
    d = layer_norm(d.reshape(B * T, Ep), pp["dec_norm_g"], pp["dec_norm_b"],
                   e_valid=E).reshape(B, T, Ep)

    # ---- generator ----
    d_tb = jnp.transpose(d, (1, 0, 2)).reshape(T * B, Ep)
    logits = linear(d_tb, pp["gen_w"], pp["gen_b"])
    return logits.reshape(T, B, -1)[:, :, :cfg["tgt_vocab"]]


# ----------------------------------------------------------------------------
# Parameter init (plain shapes) and one-time padded/bf16 preparation
# ----------------------------------------------------------------------------
def init_params(key, cfg):
    E, F, L = cfg["emb"], cfg["ff"], cfg["layers"]
    assert E % cfg["heads"] == 0
    keys = iter(jax.random.split(key, 1024))

    def dense(kin, kout):
        return jax.random.normal(next(keys), (kin, kout), jnp.float32) * 0.05

    def zeros(n):
        return jnp.zeros((n,), jnp.float32)

    def ones(n):
        return jnp.ones((n,), jnp.float32)

    def attn():
        return dict(wq=dense(E, E), bq=zeros(E), wk=dense(E, E), bk=zeros(E),
                    wv=dense(E, E), bv=zeros(E), wo=dense(E, E), bo=zeros(E))

    def enc_layer():
        return dict(self_attn=attn(),
                    w1=dense(E, F), b1=zeros(F), w2=dense(F, E), b2=zeros(E),
                    norm1_g=ones(E), norm1_b=zeros(E),
                    norm2_g=ones(E), norm2_b=zeros(E))

    def dec_layer():
        d = enc_layer()
        d["cross_attn"] = attn()
        d["norm3_g"] = ones(E)
        d["norm3_b"] = zeros(E)
        return d

    return dict(
        src_emb=jax.random.normal(next(keys), (cfg["src_vocab"], E), jnp.float32) * 0.05,
        tgt_emb=jax.random.normal(next(keys), (cfg["tgt_vocab"], E), jnp.float32) * 0.05,
        pos_embedding=positional_encoding_table(cfg["maxlen"], E),
        enc_layers=[enc_layer() for _ in range(L)],
        dec_layers=[dec_layer() for _ in range(L)],
        enc_norm_g=ones(E), enc_norm_b=zeros(E),
        dec_norm_g=ones(E), dec_norm_b=zeros(E),
        gen_w=dense(E, cfg["tgt_vocab"]), gen_b=zeros(cfg["tgt_vocab"]),
    )


def prepare_params(raw, cfg):
    """Pad all weights to 128-lane multiples ONCE and cast matmul weights to bf16."""
    E = cfg["emb"]
    Ep = _round_up(E, LANE)
    Fp = _round_up(cfg["ff"], LANE)
    Vp = _round_up(cfg["tgt_vocab"], LANE)

    def pw(w, kp, npad):     # weight (K, N) -> (kp, npad), bf16
        k, n = w.shape
        return jnp.pad(w, ((0, kp - k), (0, npad - n))).astype(jnp.bfloat16)

    def pb(v, npad):         # bias / LN param (N,) -> (1, npad), f32 (zero pad)
        return jnp.pad(v, (0, npad - v.shape[0])).reshape(1, npad).astype(jnp.float32)

    def prep_attn(a, g, b):
        return dict(
            wq=pw(a["wq"], Ep, Ep), bq=pb(a["bq"], Ep),
            wkv=jnp.concatenate([pw(a["wk"], Ep, Ep), pw(a["wv"], Ep, Ep)], axis=1),
            bkv=jnp.concatenate([pb(a["bk"], Ep), pb(a["bv"], Ep)], axis=1),
            wo=pw(a["wo"], Ep, Ep), bo=pb(a["bo"], Ep),
            ln_g=pb(g, Ep), ln_b=pb(b, Ep),
        )

    def prep_ffn(lp, g, b):
        return dict(w1=pw(lp["w1"], Ep, Fp), b1=pb(lp["b1"], Fp),
                    w2=pw(lp["w2"], Fp, Ep), b2=pb(lp["b2"], Ep),
                    ln_g=pb(g, Ep), ln_b=pb(b, Ep))

    enc_layers = [dict(self_attn=prep_attn(lp["self_attn"], lp["norm1_g"], lp["norm1_b"]),
                       ffn=prep_ffn(lp, lp["norm2_g"], lp["norm2_b"]))
                  for lp in raw["enc_layers"]]
    dec_layers = [dict(self_attn=prep_attn(lp["self_attn"], lp["norm1_g"], lp["norm1_b"]),
                       cross_attn=prep_attn(lp["cross_attn"], lp["norm2_g"], lp["norm2_b"]),
                       ffn=prep_ffn(lp, lp["norm3_g"], lp["norm3_b"]))
                  for lp in raw["dec_layers"]]

    return dict(
        src_emb=jnp.pad(raw["src_emb"], ((0, 0), (0, Ep - E))),
        tgt_emb=jnp.pad(raw["tgt_emb"], ((0, 0), (0, Ep - E))),
        pos_embedding=jnp.pad(raw["pos_embedding"], ((0, 0), (0, Ep - E))),
        enc_layers=enc_layers, dec_layers=dec_layers,
        enc_norm_g=pb(raw["enc_norm_g"], Ep), enc_norm_b=pb(raw["enc_norm_b"], Ep),
        dec_norm_g=pb(raw["dec_norm_g"], Ep), dec_norm_b=pb(raw["dec_norm_b"], Ep),
        gen_w=pw(raw["gen_w"], Ep, Vp), gen_b=pb(raw["gen_b"], Vp),
    )


# ----------------------------------------------------------------------------
if __name__ == "__main__":
    cfg = dict(src_vocab=37, tgt_vocab=41, emb=32, heads=4, ff=64,
               layers=2, maxlen=64)

    key = jax.random.PRNGKey(0)
    kp, kx, ky = jax.random.split(key, 3)
    raw_params = init_params(kp, cfg)
    params = prepare_params(raw_params, cfg)

    S, T, B = 8, 8, 2
    x = jax.random.randint(kx, (S, B), 0, cfg["src_vocab"], dtype=jnp.int32)
    y = jax.random.randint(ky, (T, B), 0, cfg["tgt_vocab"], dtype=jnp.int32)

    # attention masks (bool, True => not allowed to attend), PyTorch convention
    src_mask = jnp.zeros((S, S), dtype=bool)
    tgt_mask = jnp.triu(jnp.ones((T, T), dtype=bool), k=1)   # causal
    src_kpm = jnp.zeros((B, S), dtype=bool).at[1, S - 2:].set(True)
    tgt_kpm = jnp.zeros((B, T), dtype=bool).at[1, T - 1:].set(True)
    mem_kpm = src_kpm

    fwd = jax.jit(functools.partial(seq2seq_transformer_forward, params, cfg))
    logits = fwd(x, y, src_mask, tgt_mask, src_kpm, tgt_kpm, mem_kpm)
    jax.block_until_ready(logits)

    assert logits.shape == (T, B, cfg["tgt_vocab"])
    assert bool(jnp.all(jnp.isfinite(logits)))
    print("KERNEL_OK")
</pallas_src>

<mosaic_0001>
module attributes {stable_mosaic.version = 11 : i64} {
  func.func @_mha_kernel(%arg0: i32, %arg1: memref<1x8x128xf32, #tpu.memory_space<vmem>>, %arg2: memref<128x128xbf16, #tpu.memory_space<vmem>>, %arg3: memref<1x128xf32, #tpu.memory_space<vmem>>, %arg4: memref<128x256xbf16, #tpu.memory_space<vmem>>, %arg5: memref<1x256xf32, #tpu.memory_space<vmem>>, %arg6: memref<128x128xbf16, #tpu.memory_space<vmem>>, %arg7: memref<1x128xf32, #tpu.memory_space<vmem>>, %arg8: memref<8x8xf32, #tpu.memory_space<vmem>>, %arg9: memref<1x1x8xf32, #tpu.memory_space<vmem>>, %arg10: memref<1x128xf32, #tpu.memory_space<vmem>>, %arg11: memref<1x128xf32, #tpu.memory_space<vmem>>, %arg12: memref<1x8x128xf32, #tpu.memory_space<vmem>>) attributes {dimension_semantics = [#tpu.dimension_semantics<parallel>], iteration_bounds = array<i64: 2>, scalar_prefetch = 0 : i64, scratch_operands = 0 : i64, tpu.core_type = #tpu.core_type<tc>, window_params = [{transform_indices = @transform_0, window_bounds = array<i64: 1, 8, 128>}, {pipeline_mode = #tpu.pipeline_mode<synchronous>, transform_indices = @transform_1, window_bounds = array<i64: 128, 128>}, {pipeline_mode = #tpu.pipeline_mode<synchronous>, transform_indices = @transform_2, window_bounds = array<i64: 1, 128>}, {pipeline_mode = #tpu.pipeline_mode<synchronous>, transform_indices = @transform_3, window_bounds = array<i64: 128, 256>}, {pipeline_mode = #tpu.pipeline_mode<synchronous>, transform_indices = @transform_4, window_bounds = array<i64: 1, 256>}, {pipeline_mode = #tpu.pipeline_mode<synchronous>, transform_indices = @transform_5, window_bounds = array<i64: 128, 128>}, {pipeline_mode = #tpu.pipeline_mode<synchronous>, transform_indices = @transform_6, window_bounds = array<i64: 1, 128>}, {pipeline_mode = #tpu.pipeline_mode<synchronous>, transform_indices = @transform_7, window_bounds = array<i64: 8, 8>}, {transform_indices = @transform_8, window_bounds = array<i64: 1, 1, 8>}, {pipeline_mode = #tpu.pipeline_mode<synchronous>, transform_indices = @transform_9, window_bounds = array<i64: 1, 128>}, {pipeline_mode = #tpu.pipeline_mode<synchronous>, transform_indices = @transform_10, window_bounds = array<i64: 1, 128>}, {transform_indices = @transform_11, window_bounds = array<i64: 1, 8, 128>}]} {
    %c0 = arith.constant 0 : index
    %c0_0 = arith.constant 0 : index
    %c0_1 = arith.constant 0 : index
    %0 = vector.load %arg1[%c0, %c0_0, %c0_1] : memref<1x8x128xf32, #tpu.memory_space<vmem>>, vector<1x8x128xf32>
    %1 = vector.shape_cast %0 : vector<1x8x128xf32> to vector<8x128xf32>
    %c0_2 = arith.constant 0 : index
    %c0_3 = arith.constant 0 : index
    %c0_4 = arith.constant 0 : index
    %2 = vector.load %arg1[%c0_2, %c0_3, %c0_4] : memref<1x8x128xf32, #tpu.memory_space<vmem>>, vector<1x8x128xf32>
    %3 = vector.shape_cast %2 : vector<1x8x128xf32> to vector<8x128xf32>
    %4 = arith.truncf %1 : vector<8x128xf32> to vector<8x128xbf16>
    %c0_5 = arith.constant 0 : index
    %c0_6 = arith.constant 0 : index
    %5 = vector.load %arg2[%c0_5, %c0_6] : memref<128x128xbf16, #tpu.memory_space<vmem>>, vector<128x128xbf16>
    %cst = arith.constant dense<0.000000e+00> : vector<8x128xf32>
    %6 = tpu.matmul %4, %5, %cst {dimension_numbers = #tpu.dot_dimension_numbers<[1], [0], [0], [1], [0, 0, 1, 1], [], []>} : vector<8x128xbf16>, vector<128x128xbf16>, vector<8x128xf32> -> vector<8x128xf32>
    %c0_7 = arith.constant 0 : index
    %c0_8 = arith.constant 0 : index
    %7 = vector.load %arg3[%c0_7, %c0_8] : memref<1x128xf32, #tpu.memory_space<vmem>>, vector<1x128xf32>
    %8 = vector.broadcast %7 : vector<1x128xf32> to vector<8x128xf32>
    %9 = arith.addf %6, %8 : vector<8x128xf32>
    %10 = arith.truncf %3 : vector<8x128xf32> to vector<8x128xbf16>
    %c0_9 = arith.constant 0 : index
    %c0_10 = arith.constant 0 : index
    %11 = vector.load %arg4[%c0_9, %c0_10] : memref<128x256xbf16, #tpu.memory_space<vmem>>, vector<128x256xbf16>
    %cst_11 = arith.constant dense<0.000000e+00> : vector<8x256xf32>
    %12 = tpu.matmul %10, %11, %cst_11 {dimension_numbers = #tpu.dot_dimension_numbers<[1], [0], [0], [1], [0, 0, 1, 1], [], []>} : vector<8x128xbf16>, vector<128x256xbf16>, vector<8x256xf32> -> vector<8x256xf32>
    %c0_12 = arith.constant 0 : index
    %c0_13 = arith.constant 0 : index
    %13 = vector.load %arg5[%c0_12, %c0_13] : memref<1x256xf32, #tpu.memory_space<vmem>>, vector<1x256xf32>
    %14 = vector.broadcast %13 : vector<1x256xf32> to vector<8x256xf32>
    %15 = arith.addf %12, %14 : vector<8x256xf32>
    %16 = vector.extract_strided_slice %15 {offsets = [0, 0], sizes = [8, 128], strides = [1, 1]} : vector<8x256xf32> to vector<8x128xf32>
    %17 = vector.extract_strided_slice %15 {offsets = [0, 128], sizes = [8, 128], strides = [1, 1]} : vector<8x256xf32> to vector<8x128xf32>
    %c0_14 = arith.constant 0 : index
    %c0_15 = arith.constant 0 : index
    %c0_16 = arith.constant 0 : index
    %18 = vector.load %arg9[%c0_14, %c0_15, %c0_16] : memref<1x1x8xf32, #tpu.memory_space<vmem>>, vector<1x1x8xf32>
    %19 = vector.shape_cast %18 : vector<1x1x8xf32> to vector<1x8xf32>
    %c0_17 = arith.constant 0 : index
    %c0_18 = arith.constant 0 : index
    %20 = vector.load %arg8[%c0_17, %c0_18] : memref<8x8xf32, #tpu.memory_space<vmem>>, vector<8x8xf32>
    %21 = vector.broadcast %19 : vector<1x8xf32> to vector<8x8xf32>
    %22 = arith.addf %21, %20 : vector<8x8xf32>
    %c0_19 = arith.constant 0 : index
    %c0_20 = arith.constant 0 : index
    %23 = vector.load %arg6[%c0_19, %c0_20] : memref<128x128xbf16, #tpu.memory_space<vmem>>, vector<128x128xbf16>
    %cst_21 = arith.constant 0.000000e+00 : f32
    %24 = vector.broadcast %cst_21 : f32 to vector<8x128xf32>
    %25 = vector.extract_strided_slice %9 {offsets = [0, 0], sizes = [8, 8], strides = [1, 1]} : vector<8x128xf32> to vector<8x8xf32>
    %26 = arith.truncf %25 : vector<8x8xf32> to vector<8x8xbf16>
    %27 = vector.extract_strided_slice %16 {offsets = [0, 0], sizes = [8, 8], strides = [1, 1]} : vector<8x128xf32> to vector<8x8xf32>
    %28 = arith.truncf %27 : vector<8x8xf32> to vector<8x8xbf16>
    %cst_22 = arith.constant dense<0.000000e+00> : vector<8x8xf32>
    %29 = tpu.matmul %26, %28, %cst_22 {dimension_numbers = #tpu.dot_dimension_numbers<[1], [1], [0], [0], [0, 0, 1, 0], [], []>} : vector<8x8xbf16>, vector<8x8xbf16>, vector<8x8xf32> -> vector<8x8xf32>
    %cst_23 = arith.constant 0.353553385 : f32
    %30 = vector.broadcast %cst_23 : f32 to vector<8x8xf32>
    %31 = arith.mulf %29, %30 : vector<8x8xf32>
    %32 = arith.addf %31, %22 : vector<8x8xf32>
    %cst_24 = arith.constant dense<0xFF800000> : vector<8xf32>
    %33 = vector.multi_reduction <maximumf>, %32, %cst_24 [1] : vector<8x8xf32> to vector<8xf32>
    %34 = vector.shape_cast %33 : vector<8xf32> to vector<8x1xf32>
    %35 = vector.broadcast %34 : vector<8x1xf32> to vector<8x8xf32>
    %36 = arith.subf %32, %35 : vector<8x8xf32>
    %37 = math.exp %36 : vector<8x8xf32>
    %cst_25 = arith.constant dense<0.000000e+00> : vector<8xf32>
    %38 = vector.multi_reduction <add>, %37, %cst_25 [1] : vector<8x8xf32> to vector<8xf32>
    %39 = vector.shape_cast %38 : vector<8xf32> to vector<8x1xf32>
    %40 = tpu.reciprocal %39 {approx = true} : vector<8x1xf32> -> vector<8x1xf32>
    %41 = vector.broadcast %40 : vector<8x1xf32> to vector<8x8xf32>
    %42 = arith.mulf %37, %41 : vector<8x8xf32>
    %43 = arith.truncf %42 : vector<8x8xf32> to vector<8x8xbf16>
    %44 = vector.extract_strided_slice %17 {offsets = [0, 0], sizes = [8, 8], strides = [1, 1]} : vector<8x128xf32> to vector<8x8xf32>
    %45 = arith.truncf %44 : vector<8x8xf32> to vector<8x8xbf16>
    %cst_26 = arith.constant dense<0.000000e+00> : vector<8x8xf32>
    %46 = tpu.matmul %43, %45, %cst_26 {dimension_numbers = #tpu.dot_dimension_numbers<[1], [0], [0], [1], [0, 0, 1, 1], [], []>} : vector<8x8xbf16>, vector<8x8xbf16>, vector<8x8xf32> -> vector<8x8xf32>
    %47 = arith.truncf %46 : vector<8x8xf32> to vector<8x8xbf16>
    %48 = vector.extract_strided_slice %23 {offsets = [0, 0], sizes = [8, 128], strides = [1, 1]} : vector<128x128xbf16> to vector<8x128xbf16>
    %cst_27 = arith.constant dense<0.000000e+00> : vector<8x128xf32>
    %49 = tpu.matmul %47, %48, %cst_27 {dimension_numbers = #tpu.dot_dimension_numbers<[1], [0], [0], [1], [0, 0, 1, 1], [], []>} : vector<8x8xbf16>, vector<8x128xbf16>, vector<8x128xf32> -> vector<8x128xf32>
    %50 = arith.addf %24, %49 : vector<8x128xf32>
    %51 = vector.extract_strided_slice %9 {offsets = [0, 8], sizes = [8, 8], strides = [1, 1]} : vector<8x128xf32> to vector<8x8xf32>
    %52 = arith.truncf %51 : vector<8x8xf32> to vector<8x8xbf16>
    %53 = vector.extract_strided_slice %16 {offsets = [0, 8], sizes = [8, 8], strides = [1, 1]} : vector<8x128xf32> to vector<8x8xf32>
    %54 = arith.truncf %53 : vector<8x8xf32> to vector<8x8xbf16>
    %cst_28 = arith.constant dense<0.000000e+00> : vector<8x8xf32>
    %55 = tpu.matmul %52, %54, %cst_28 {dimension_numbers = #tpu.dot_dimension_numbers<[1], [1], [0], [0], [0, 0, 1, 0], [], []>} : vector<8x8xbf16>, vector<8x8xbf16>, vector<8x8xf32> -> vector<8x8xf32>
    %cst_29 = arith.constant 0.353553385 : f32
    %56 = vector.broadcast %cst_29 : f32 to vector<8x8xf32>
    %57 = arith.mulf %55, %56 : vector<8x8xf32>
    %58 = arith.addf %57, %22 : vector<8x8xf32>
    %cst_30 = arith.constant dense<0xFF800000> : vector<8xf32>
    %59 = vector.multi_reduction <maximumf>, %58, %cst_30 [1] : vector<8x8xf32> to vector<8xf32>
    %60 = vector.shape_cast %59 : vector<8xf32> to vector<8x1xf32>
    %61 = vector.broadcast %60 : vector<8x1xf32> to vector<8x8xf32>
    %62 = arith.subf %58, %61 : vector<8x8xf32>
    %63 = math.exp %62 : vector<8x8xf32>
    %cst_31 = arith.constant dense<0.000000e+00> : vector<8xf32>
    %64 = vector.multi_reduction <add>, %63, %cst_31 [1] : vector<8x8xf32> to vector<8xf32>
    %65 = vector.shape_cast %64 : vector<8xf32> to vector<8x1xf32>
    %66 = tpu.reciprocal %65 {approx = true} : vector<8x1xf32> -> vector<8x1xf32>
    %67 = vector.broadcast %66 : vector<8x1xf32> to vector<8x8xf32>
    %68 = arith.mulf %63, %67 : vector<8x8xf32>
    %69 = arith.truncf %68 : vector<8x8xf32> to vector<8x8xbf16>
    %70 = vector.extract_strided_slice %17 {offsets = [0, 8], sizes = [8, 8], strides = [1, 1]} : vector<8x128xf32> to vector<8x8xf32>
    %71 = arith.truncf %70 : vector<8x8xf32> to vector<8x8xbf16>
    %cst_32 = arith.constant dense<0.000000e+00> : vector<8x8xf32>
    %72 = tpu.matmul %69, %71, %cst_32 {dimension_numbers = #tpu.dot_dimension_numbers<[1], [0], [0], [1], [0, 0, 1, 1], [], []>} : vector<8x8xbf16>, vector<8x8xbf16>, vector<8x8xf32> -> vector<8x8xf32>
    %73 = arith.truncf %72 : vector<8x8xf32> to vector<8x8xbf16>
    %74 = vector.extract_strided_slice %23 {offsets = [8, 0], sizes = [8, 128], strides = [1, 1]} : vector<128x128xbf16> to vector<8x128xbf16>
    %cst_33 = arith.constant dense<0.000000e+00> : vector<8x128xf32>
    %75 = tpu.matmul %73, %74, %cst_33 {dimension_numbers = #tpu.dot_dimension_numbers<[1], [0], [0], [1], [0, 0, 1, 1], [], []>} : vector<8x8xbf16>, vector<8x128xbf16>, vector<8x128xf32> -> vector<8x128xf32>
    %76 = arith.addf %50, %75 : vector<8x128xf32>
    %77 = vector.extract_strided_slice %9 {offsets = [0, 16], sizes = [8, 8], strides = [1, 1]} : vector<8x128xf32> to vector<8x8xf32>
    %78 = arith.truncf %77 : vector<8x8xf32> to vector<8x8xbf16>
    %79 = vector.extract_strided_slice %16 {offsets = [0, 16], sizes = [8, 8], strides = [1, 1]} : vector<8x128xf32> to vector<8x8xf32>
    %80 = arith.truncf %79 : vector<8x8xf32> to vector<8x8xbf16>
    %cst_34 = arith.constant dense<0.000000e+00> : vector<8x8xf32>
    %81 = tpu.matmul %78, %80, %cst_34 {dimension_numbers = #tpu.dot_dimension_numbers<[1], [1], [0], [0], [0, 0, 1, 0], [], []>} : vector<8x8xbf16>, vector<8x8xbf16>, vector<8x8xf32> -> vector<8x8xf32>
    %cst_35 = arith.constant 0.353553385 : f32
    %82 = vector.broadcast %cst_35 : f32 to vector<8x8xf32>
    %83 = arith.mulf %81, %82 : vector<8x8xf32>
    %84 = arith.addf %83, %22 : vector<8x8xf32>
    %cst_36 = arith.constant dense<0xFF800000> : vector<8xf32>
    %85 = vector.multi_reduction <maximumf>, %84, %cst_36 [1] : vector<8x8xf32> to vector<8xf32>
    %86 = vector.shape_cast %85 : vector<8xf32> to vector<8x1xf32>
    %87 = vector.broadcast %86 : vector<8x1xf32> to vector<8x8xf32>
    %88 = arith.subf %84, %87 : vector<8x8xf32>
    %89 = math.exp %88 : vector<8x8xf32>
    %cst_37 = arith.constant dense<0.000000e+00> : vector<8xf32>
    %90 = vector.multi_reduction <add>, %89, %cst_37 [1] : vector<8x8xf32> to vector<8xf32>
    %91 = vector.shape_cast %90 : vector<8xf32> to vector<8x1xf32>
    %92 = tpu.reciprocal %91 {approx = true} : vector<8x1xf32> -> vector<8x1xf32>
    %93 = vector.broadcast %92 : vector<8x1xf32> to vector<8x8xf32>
    %94 = arith.mulf %89, %93 : vector<8x8xf32>
    %95 = arith.truncf %94 : vector<8x8xf32> to vector<8x8xbf16>
    %96 = vector.extract_strided_slice %17 {offsets = [0, 16], sizes = [8, 8], strides = [1, 1]} : vector<8x128xf32> to vector<8x8xf32>
    %97 = arith.truncf %96 : vector<8x8xf32> to vector<8x8xbf16>
    %cst_38 = arith.constant dense<0.000000e+00> : vector<8x8xf32>
    %98 = tpu.matmul %95, %97, %cst_38 {dimension_numbers = #tpu.dot_dimension_numbers<[1], [0], [0], [1], [0, 0, 1, 1], [], []>} : vector<8x8xbf16>, vector<8x8xbf16>, vector<8x8xf32> -> vector<8x8xf32>
    %99 = arith.truncf %98 : vector<8x8xf32> to vector<8x8xbf16>
    %100 = vector.extract_strided_slice %23 {offsets = [16, 0], sizes = [8, 128], strides = [1, 1]} : vector<128x128xbf16> to vector<8x128xbf16>
    %cst_39 = arith.constant dense<0.000000e+00> : vector<8x128xf32>
    %101 = tpu.matmul %99, %100, %cst_39 {dimension_numbers = #tpu.dot_dimension_numbers<[1], [0], [0], [1], [0, 0, 1, 1], [], []>} : vector<8x8xbf16>, vector<8x128xbf16>, vector<8x128xf32> -> vector<8x128xf32>
    %102 = arith.addf %76, %101 : vector<8x128xf32>
    %103 = vector.extract_strided_slice %9 {offsets = [0, 24], sizes = [8, 8], strides = [1, 1]} : vector<8x128xf32> to vector<8x8xf32>
    %104 = arith.truncf %103 : vector<8x8xf32> to vector<8x8xbf16>
    %105 = vector.extract_strided_slice %16 {offsets = [0, 24], sizes = [8, 8], strides = [1, 1]} : vector<8x128xf32> to vector<8x8xf32>
    %106 = arith.truncf %105 : vector<8x8xf32> to vector<8x8xbf16>
    %cst_40 = arith.constant dense<0.000000e+00> : vector<8x8xf32>
    %107 = tpu.matmul %104, %106, %cst_40 {dimension_numbers = #tpu.dot_dimension_numbers<[1], [1], [0], [0], [0, 0, 1, 0], [], []>} : vector<8x8xbf16>, vector<8x8xbf16>, vector<8x8xf32> -> vector<8x8xf32>
    %cst_41 = arith.constant 0.353553385 : f32
    %108 = vector.broadcast %cst_41 : f32 to vector<8x8xf32>
    %109 = arith.mulf %107, %108 : vector<8x8xf32>
    %110 = arith.addf %109, %22 : vector<8x8xf32>
    %cst_42 = arith.constant dense<0xFF800000> : vector<8xf32>
    %111 = vector.multi_reduction <maximumf>, %110, %cst_42 [1] : vector<8x8xf32> to vector<8xf32>
    %112 = vector.shape_cast %111 : vector<8xf32> to vector<8x1xf32>
    %113 = vector.broadcast %112 : vector<8x1xf32> to vector<8x8xf32>
    %114 = arith.subf %110, %113 : vector<8x8xf32>
    %115 = math.exp %114 : vector<8x8xf32>
    %cst_43 = arith.constant dense<0.000000e+00> : vector<8xf32>
    %116 = vector.multi_reduction <add>, %115, %cst_43 [1] : vector<8x8xf32> to vector<8xf32>
    %117 = vector.shape_cast %116 : vector<8xf32> to vector<8x1xf32>
    %118 = tpu.reciprocal %117 {approx = true} : vector<8x1xf32> -> vector<8x1xf32>
    %119 = vector.broadcast %118 : vector<8x1xf32> to vector<8x8xf32>
    %120 = arith.mulf %115, %119 : vector<8x8xf32>
    %121 = arith.truncf %120 : vector<8x8xf32> to vector<8x8xbf16>
    %122 = vector.extract_strided_slice %17 {offsets = [0, 24], sizes = [8, 8], strides = [1, 1]} : vector<8x128xf32> to vector<8x8xf32>
    %123 = arith.truncf %122 : vector<8x8xf32> to vector<8x8xbf16>
    %cst_44 = arith.constant dense<0.000000e+00> : vector<8x8xf32>
    %124 = tpu.matmul %121, %123, %cst_44 {dimension_numbers = #tpu.dot_dimension_numbers<[1], [0], [0], [1], [0, 0, 1, 1], [], []>} : vector<8x8xbf16>, vector<8x8xbf16>, vector<8x8xf32> -> vector<8x8xf32>
    %125 = arith.truncf %124 : vector<8x8xf32> to vector<8x8xbf16>
    %126 = vector.extract_strided_slice %23 {offsets = [24, 0], sizes = [8, 128], strides = [1, 1]} : vector<128x128xbf16> to vector<8x128xbf16>
    %cst_45 = arith.constant dense<0.000000e+00> : vector<8x128xf32>
    %127 = tpu.matmul %125, %126, %cst_45 {dimension_numbers = #tpu.dot_dimension_numbers<[1], [0], [0], [1], [0, 0, 1, 1], [], []>} : vector<8x8xbf16>, vector<8x128xbf16>, vector<8x128xf32> -> vector<8x128xf32>
    %128 = arith.addf %102, %127 : vector<8x128xf32>
    %c0_46 = arith.constant 0 : index
    %c0_47 = arith.constant 0 : index
    %129 = vector.load %arg7[%c0_46, %c0_47] : memref<1x128xf32, #tpu.memory_space<vmem>>, vector<1x128xf32>
    %130 = vector.broadcast %129 : vector<1x128xf32> to vector<8x128xf32>
    %131 = arith.addf %128, %130 : vector<8x128xf32>
    %132 = arith.addf %1, %131 : vector<8x128xf32>
    %c0_48 = arith.constant 0 : index
    %c0_49 = arith.constant 0 : index
    %133 = vector.load %arg10[%c0_48, %c0_49] : memref<1x128xf32, #tpu.memory_space<vmem>>, vector<1x128xf32>
    %c0_50 = arith.constant 0 : index
    %c0_51 = arith.constant 0 : index
    %134 = vector.load %arg11[%c0_50, %c0_51] : memref<1x128xf32, #tpu.memory_space<vmem>>, vector<1x128xf32>
    %135 = tpu.iota {dimensions = array<i32: 1>} : vector<8x128xi32>
    %c32_i32 = arith.constant 32 : i32
    %136 = vector.broadcast %c32_i32 : i32 to vector<8x128xi32>
    %137 = arith.cmpi slt, %135, %136 : vector<8x128xi32>
    %138 = arith.extui %137 : vector<8x128xi1> to vector<8x128xi32>
    %139 = arith.sitofp %138 : vector<8x128xi32> to vector<8x128xf32>
    %140 = arith.mulf %132, %139 : vector<8x128xf32>
    %cst_52 = arith.constant dense<0.000000e+00> : vector<8xf32>
    %141 = vector.multi_reduction <add>, %140, %cst_52 [1] : vector<8x128xf32> to vector<8xf32>
    %142 = vector.shape_cast %141 : vector<8xf32> to vector<8x1xf32>
    %cst_53 = arith.constant 3.125000e-02 : f32
    %143 = vector.broadcast %cst_53 : f32 to vector<8x1xf32>
    %144 = arith.mulf %142, %143 : vector<8x1xf32>
    %145 = vector.broadcast %144 : vector<8x1xf32> to vector<8x128xf32>
    %146 = arith.subf %132, %145 : vector<8x128xf32>
    %147 = arith.mulf %146, %139 : vector<8x128xf32>
    %148 = arith.mulf %147, %147 : vector<8x128xf32>
    %cst_54 = arith.constant dense<0.000000e+00> : vector<8xf32>
    %149 = vector.multi_reduction <add>, %148, %cst_54 [1] : vector<8x128xf32> to vector<8xf32>
    %150 = vector.shape_cast %149 : vector<8xf32> to vector<8x1xf32>
    %cst_55 = arith.constant 3.125000e-02 : f32
    %151 = vector.broadcast %cst_55 : f32 to vector<8x1xf32>
    %152 = arith.mulf %150, %151 : vector<8x1xf32>
    %153 = vector.broadcast %144 : vector<8x1xf32> to vector<8x128xf32>
    %154 = arith.subf %132, %153 : vector<8x128xf32>
    %cst_56 = arith.constant 9.99999974E-6 : f32
    %155 = vector.broadcast %cst_56 : f32 to vector<8x1xf32>
    %156 = arith.addf %152, %155 : vector<8x1xf32>
    %157 = math.rsqrt %156 : vector<8x1xf32>
    %158 = vector.broadcast %157 : vector<8x1xf32> to vector<8x128xf32>
    %159 = arith.mulf %154, %158 : vector<8x128xf32>
    %160 = vector.broadcast %133 : vector<1x128xf32> to vector<8x128xf32>
    %161 = arith.mulf %159, %160 : vector<8x128xf32>
    %162 = vector.broadcast %134 : vector<1x128xf32> to vector<8x128xf32>
    %163 = arith.addf %161, %162 : vector<8x128xf32>
    %c0_57 = arith.constant 0 : index
    %c0_58 = arith.constant 0 : index
    %c0_59 = arith.constant 0 : index
    %164 = vector.load %arg12[%c0_57, %c0_58, %c0_59] : memref<1x8x128xf32, #tpu.memory_space<vmem>>, vector<1x8x128xf32>
    %165 = vector.shape_cast %164 : vector<1x8x128xf32> to vector<8x128xf32>
    %166 = vector.shape_cast %163 : vector<8x128xf32> to vector<1x8x128xf32>
    tpu.vector_store %arg12[%c0_57, %c0_58, %c0_59], %166 {strides = array<i32>} : memref<1x8x128xf32, #tpu.memory_space<vmem>>, vector<1x8x128xf32>,
    return
  }
  func.func @transform_0(%arg0: i32) -> (i32, i32, i32) {
    %c0_i32 = arith.constant 0 : i32
    %c0_i32_0 = arith.constant 0 : i32
    %c0_i32_1 = arith.constant 0 : i32
    return %arg0, %c0_i32, %c0_i32_0 : i32, i32, i32
  }
  func.func @transform_1(%arg0: i32) -> (i32, i32) {
    %c0_i32 = arith.constant 0 : i32
    %c0_i32_0 = arith.constant 0 : i32
    %c0_i32_1 = arith.constant 0 : i32
    return %c0_i32, %c0_i32_0 : i32, i32
  }
  func.func @transform_2(%arg0: i32) -> (i32, i32) {
    %c0_i32 = arith.constant 0 : i32
    %c0_i32_0 = arith.constant 0 : i32
    %c0_i32_1 = arith.constant 0 : i32
    return %c0_i32, %c0_i32_0 : i32, i32
  }
  func.func @transform_3(%arg0: i32) -> (i32, i32) {
    %c0_i32 = arith.constant 0 : i32
    %c0_i32_0 = arith.constant 0 : i32
    %c0_i32_1 = arith.constant 0 : i32
    return %c0_i32, %c0_i32_0 : i32, i32
  }
  func.func @transform_4(%arg0: i32) -> (i32, i32) {
    %c0_i32 = arith.constant 0 : i32
    %c0_i32_0 = arith.constant 0 : i32
    %c0_i32_1 = arith.constant 0 : i32
    return %c0_i32, %c0_i32_0 : i32, i32
  }
  func.func @transform_5(%arg0: i32) -> (i32, i32) {
    %c0_i32 = arith.constant 0 : i32
    %c0_i32_0 = arith.constant 0 : i32
    %c0_i32_1 = arith.constant 0 : i32
    return %c0_i32, %c0_i32_0 : i32, i32
  }
  func.func @transform_6(%arg0: i32) -> (i32, i32) {
    %c0_i32 = arith.constant 0 : i32
    %c0_i32_0 = arith.constant 0 : i32
    %c0_i32_1 = arith.constant 0 : i32
    return %c0_i32, %c0_i32_0 : i32, i32
  }
  func.func @transform_7(%arg0: i32) -> (i32, i32) {
    %c0_i32 = arith.constant 0 : i32
    %c0_i32_0 = arith.constant 0 : i32
    %c0_i32_1 = arith.constant 0 : i32
    return %c0_i32, %c0_i32_0 : i32, i32
  }
  func.func @transform_8(%arg0: i32) -> (i32, i32, i32) {
    %c0_i32 = arith.constant 0 : i32
    %c0_i32_0 = arith.constant 0 : i32
    %c0_i32_1 = arith.constant 0 : i32
    return %arg0, %c0_i32, %c0_i32_0 : i32, i32, i32
  }
  func.func @transform_9(%arg0: i32) -> (i32, i32) {
    %c0_i32 = arith.constant 0 : i32
    %c0_i32_0 = arith.constant 0 : i32
    %c0_i32_1 = arith.constant 0 : i32
    return %c0_i32, %c0_i32_0 : i32, i32
  }
  func.func @transform_10(%arg0: i32) -> (i32, i32) {
    %c0_i32 = arith.constant 0 : i32
    %c0_i32_0 = arith.constant 0 : i32
    %c0_i32_1 = arith.constant 0 : i32
    return %c0_i32, %c0_i32_0 : i32, i32
  }
  func.func @transform_11(%arg0: i32) -> (i32, i32, i32) {
    %c0_i32 = arith.constant 0 : i32
    %c0_i32_0 = arith.constant 0 : i32
    %c0_i32_1 = arith.constant 0 : i32
    return %arg0, %c0_i32, %c0_i32_0 : i32, i32, i32
  }
}

module attributes {stable_mosaic.version = 11 : i64} {
  func.func @_ffn_kernel(%arg0: i32, %arg1: memref<8x128xf32, #tpu.memory_space<vmem>>, %arg2: memref<128x128xbf16, #tpu.memory_space<vmem>>, %arg3: memref<1x128xf32, #tpu.memory_space<vmem>>, %arg4: memref<128x128xbf16, #tpu.memory_space<vmem>>, %arg5: memref<1x128xf32, #tpu.memory_space<vmem>>, %arg6: memref<1x128xf32, #tpu.memory_space<vmem>>, %arg7: memref<1x128xf32, #tpu.memory_space<vmem>>, %arg8: memref<8x128xf32, #tpu.memory_space<vmem>>) attributes {dimension_semantics = [#tpu.dimension_semantics<parallel>], iteration_bounds = array<i64: 2>, scalar_prefetch = 0 : i64, scratch_operands = 0 : i64, tpu.core_type = #tpu.core_type<tc>, window_params = [{transform_indices = @transform_0, window_bounds = array<i64: 8, 128>}, {pipeline_mode = #tpu.pipeline_mode<synchronous>, transform_indices = @transform_1, window_bounds = array<i64: 128, 128>}, {pipeline_mode = #tpu.pipeline_mode<synchronous>, transform_indices = @transform_2, window_bounds = array<i64: 1, 128>}, {pipeline_mode = #tpu.pipeline_mode<synchronous>, transform_indices = @transform_3, window_bounds = array<i64: 128, 128>}, {pipeline_mode = #tpu.pipeline_mode<synchronous>, transform_indices = @transform_4, window_bounds = array<i64: 1, 128>}, {pipeline_mode = #tpu.pipeline_mode<synchronous>, transform_indices = @transform_5, window_bounds = array<i64: 1, 128>}, {pipeline_mode = #tpu.pipeline_mode<synchronous>, transform_indices = @transform_6, window_bounds = array<i64: 1, 128>}, {transform_indices = @transform_7, window_bounds = array<i64: 8, 128>}]} {
    %c0 = arith.constant 0 : index
    %c0_0 = arith.constant 0 : index
    %0 = vector.load %arg1[%c0, %c0_0] : memref<8x128xf32, #tpu.memory_space<vmem>>, vector<8x128xf32>
    %1 = arith.truncf %0 : vector<8x128xf32> to vector<8x128xbf16>
    %c0_1 = arith.constant 0 : index
    %c0_2 = arith.constant 0 : index
    %2 = vector.load %arg2[%c0_1, %c0_2] : memref<128x128xbf16, #tpu.memory_space<vmem>>, vector<128x128xbf16>
    %cst = arith.constant dense<0.000000e+00> : vector<8x128xf32>
    %3 = tpu.matmul %1, %2, %cst {dimension_numbers = #tpu.dot_dimension_numbers<[1], [0], [0], [1], [0, 0, 1, 1], [], []>} : vector<8x128xbf16>, vector<128x128xbf16>, vector<8x128xf32> -> vector<8x128xf32>
    %c0_3 = arith.constant 0 : index
    %c0_4 = arith.constant 0 : index
    %4 = vector.load %arg3[%c0_3, %c0_4] : memref<1x128xf32, #tpu.memory_space<vmem>>, vector<1x128xf32>
    %5 = vector.broadcast %4 : vector<1x128xf32> to vector<8x128xf32>
    %6 = arith.addf %3, %5 : vector<8x128xf32>
    %cst_5 = arith.constant 0.000000e+00 : f32
    %7 = vector.broadcast %cst_5 : f32 to vector<8x128xf32>
    %8 = arith.maximumf %6, %7 : vector<8x128xf32>
    %9 = arith.truncf %8 : vector<8x128xf32> to vector<8x128xbf16>
    %c0_6 = arith.constant 0 : index
    %c0_7 = arith.constant 0 : index
    %10 = vector.load %arg4[%c0_6, %c0_7] : memref<128x128xbf16, #tpu.memory_space<vmem>>, vector<128x128xbf16>
    %cst_8 = arith.constant dense<0.000000e+00> : vector<8x128xf32>
    %11 = tpu.matmul %9, %10, %cst_8 {dimension_numbers = #tpu.dot_dimension_numbers<[1], [0], [0], [1], [0, 0, 1, 1], [], []>} : vector<8x128xbf16>, vector<128x128xbf16>, vector<8x128xf32> -> vector<8x128xf32>
    %c0_9 = arith.constant 0 : index
    %c0_10 = arith.constant 0 : index
    %12 = vector.load %arg5[%c0_9, %c0_10] : memref<1x128xf32, #tpu.memory_space<vmem>>, vector<1x128xf32>
    %13 = vector.broadcast %12 : vector<1x128xf32> to vector<8x128xf32>
    %14 = arith.addf %11, %13 : vector<8x128xf32>
    %15 = arith.addf %0, %14 : vector<8x128xf32>
    %c0_11 = arith.constant 0 : index
    %c0_12 = arith.constant 0 : index
    %16 = vector.load %arg6[%c0_11, %c0_12] : memref<1x128xf32, #tpu.memory_space<vmem>>, vector<1x128xf32>
    %c0_13 = arith.constant 0 : index
    %c0_14 = arith.constant 0 : index
    %17 = vector.load %arg7[%c0_13, %c0_14] : memref<1x128xf32, #tpu.memory_space<vmem>>, vector<1x128xf32>
    %18 = tpu.iota {dimensions = array<i32: 1>} : vector<8x128xi32>
    %c32_i32 = arith.constant 32 : i32
    %19 = vector.broadcast %c32_i32 : i32 to vector<8x128xi32>
    %20 = arith.cmpi slt, %18, %19 : vector<8x128xi32>
    %21 = arith.extui %20 : vector<8x128xi1> to vector<8x128xi32>
    %22 = arith.sitofp %21 : vector<8x128xi32> to vector<8x128xf32>
    %23 = arith.mulf %15, %22 : vector<8x128xf32>
    %cst_15 = arith.constant dense<0.000000e+00> : vector<8xf32>
    %24 = vector.multi_reduction <add>, %23, %cst_15 [1] : vector<8x128xf32> to vector<8xf32>
    %25 = vector.shape_cast %24 : vector<8xf32> to vector<8x1xf32>
    %cst_16 = arith.constant 3.125000e-02 : f32
    %26 = vector.broadcast %cst_16 : f32 to vector<8x1xf32>
    %27 = arith.mulf %25, %26 : vector<8x1xf32>
    %28 = vector.broadcast %27 : vector<8x1xf32> to vector<8x128xf32>
    %29 = arith.subf %15, %28 : vector<8x128xf32>
    %30 = arith.mulf %29, %22 : vector<8x128xf32>
    %31 = arith.mulf %30, %30 : vector<8x128xf32>
    %cst_17 = arith.constant dense<0.000000e+00> : vector<8xf32>
    %32 = vector.multi_reduction <add>, %31, %cst_17 [1] : vector<8x128xf32> to vector<8xf32>
    %33 = vector.shape_cast %32 : vector<8xf32> to vector<8x1xf32>
    %cst_18 = arith.constant 3.125000e-02 : f32
    %34 = vector.broadcast %cst_18 : f32 to vector<8x1xf32>
    %35 = arith.mulf %33, %34 : vector<8x1xf32>
    %36 = vector.broadcast %27 : vector<8x1xf32> to vector<8x128xf32>
    %37 = arith.subf %15, %36 : vector<8x128xf32>
    %cst_19 = arith.constant 9.99999974E-6 : f32
    %38 = vector.broadcast %cst_19 : f32 to vector<8x1xf32>
    %39 = arith.addf %35, %38 : vector<8x1xf32>
    %40 = math.rsqrt %39 : vector<8x1xf32>
    %41 = vector.broadcast %40 : vector<8x1xf32> to vector<8x128xf32>
    %42 = arith.mulf %37, %41 : vector<8x128xf32>
    %43 = vector.broadcast %16 : vector<1x128xf32> to vector<8x128xf32>
    %44 = arith.mulf %42, %43 : vector<8x128xf32>
    %45 = vector.broadcast %17 : vector<1x128xf32> to vector<8x128xf32>
    %46 = arith.addf %44, %45 : vector<8x128xf32>
    %c0_20 = arith.constant 0 : index
    %c0_21 = arith.constant 0 : index
    %47 = vector.load %arg8[%c0_20, %c0_21] : memref<8x128xf32, #tpu.memory_space<vmem>>, vector<8x128xf32>
    tpu.vector_store %arg8[%c0_20, %c0_21], %46 {strides = array<i32>} : memref<8x128xf32, #tpu.memory_space<vmem>>, vector<8x128xf32>,
    return
  }
  func.func @transform_0(%arg0: i32) -> (i32, i32) {
    %c0_i32 = arith.constant 0 : i32
    %c0_i32_0 = arith.constant 0 : i32
    return %arg0, %c0_i32 : i32, i32
  }
  func.func @transform_1(%arg0: i32) -> (i32, i32) {
    %c0_i32 = arith.constant 0 : i32
    %c0_i32_0 = arith.constant 0 : i32
    %c0_i32_1 = arith.constant 0 : i32
    return %c0_i32, %c0_i32_0 : i32, i32
  }
  func.func @transform_2(%arg0: i32) -> (i32, i32) {
    %c0_i32 = arith.constant 0 : i32
    %c0_i32_0 = arith.constant 0 : i32
    %c0_i32_1 = arith.constant 0 : i32
    return %c0_i32, %c0_i32_0 : i32, i32
  }
  func.func @transform_3(%arg0: i32) -> (i32, i32) {
    %c0_i32 = arith.constant 0 : i32
    %c0_i32_0 = arith.constant 0 : i32
    %c0_i32_1 = arith.constant 0 : i32
    return %c0_i32, %c0_i32_0 : i32, i32
  }
  func.func @transform_4(%arg0: i32) -> (i32, i32) {
    %c0_i32 = arith.constant 0 : i32
    %c0_i32_0 = arith.constant 0 : i32
    %c0_i32_1 = arith.constant 0 : i32
    return %c0_i32, %c0_i32_0 : i32, i32
  }
  func.func @transform_5(%arg0: i32) -> (i32, i32) {
    %c0_i32 = arith.constant 0 : i32
    %c0_i32_0 = arith.constant 0 : i32
    %c0_i32_1 = arith.constant 0 : i32
    return %c0_i32, %c0_i32_0 : i32, i32
  }
  func.func @transform_6(%arg0: i32) -> (i32, i32) {
    %c0_i32 = arith.constant 0 : i32
    %c0_i32_0 = arith.constant 0 : i32
    %c0_i32_1 = arith.constant 0 : i32
    return %c0_i32, %c0_i32_0 : i32, i32
  }
  func.func @transform_7(%arg0: i32) -> (i32, i32) {
    %c0_i32 = arith.constant 0 : i32
    %c0_i32_0 = arith.constant 0 : i32
    return %arg0, %c0_i32 : i32, i32
  }
}

module attributes {stable_mosaic.version = 11 : i64} {
  func.func @_ln_kernel(%arg0: i32, %arg1: memref<8x128xf32, #tpu.memory_space<vmem>>, %arg2: memref<1x128xf32, #tpu.memory_space<vmem>>, %arg3: memref<1x128xf32, #tpu.memory_space<vmem>>, %arg4: memref<8x128xf32, #tpu.memory_space<vmem>>) attributes {dimension_semantics = [#tpu.dimension_semantics<parallel>], iteration_bounds = array<i64: 2>, scalar_prefetch = 0 : i64, scratch_operands = 0 : i64, tpu.core_type = #tpu.core_type<tc>, window_params = [{transform_indices = @transform_0, window_bounds = array<i64: 8, 128>}, {pipeline_mode = #tpu.pipeline_mode<synchronous>, transform_indices = @transform_1, window_bounds = array<i64: 1, 128>}, {pipeline_mode = #tpu.pipeline_mode<synchronous>, transform_indices = @transform_2, window_bounds = array<i64: 1, 128>}, {transform_indices = @transform_3, window_bounds = array<i64: 8, 128>}]} {
    %c0 = arith.constant 0 : index
    %c0_0 = arith.constant 0 : index
    %0 = vector.load %arg1[%c0, %c0_0] : memref<8x128xf32, #tpu.memory_space<vmem>>, vector<8x128xf32>
    %c0_1 = arith.constant 0 : index
    %c0_2 = arith.constant 0 : index
    %1 = vector.load %arg2[%c0_1, %c0_2] : memref<1x128xf32, #tpu.memory_space<vmem>>, vector<1x128xf32>
    %c0_3 = arith.constant 0 : index
    %c0_4 = arith.constant 0 : index
    %2 = vector.load %arg3[%c0_3, %c0_4] : memref<1x128xf32, #tpu.memory_space<vmem>>, vector<1x128xf32>
    %3 = tpu.iota {dimensions = array<i32: 1>} : vector<8x128xi32>
    %c32_i32 = arith.constant 32 : i32
    %4 = vector.broadcast %c32_i32 : i32 to vector<8x128xi32>
    %5 = arith.cmpi slt, %3, %4 : vector<8x128xi32>
    %6 = arith.extui %5 : vector<8x128xi1> to vector<8x128xi32>
    %7 = arith.sitofp %6 : vector<8x128xi32> to vector<8x128xf32>
    %8 = arith.mulf %0, %7 : vector<8x128xf32>
    %cst = arith.constant dense<0.000000e+00> : vector<8xf32>
    %9 = vector.multi_reduction <add>, %8, %cst [1] : vector<8x128xf32> to vector<8xf32>
    %10 = vector.shape_cast %9 : vector<8xf32> to vector<8x1xf32>
    %cst_5 = arith.constant 3.125000e-02 : f32
    %11 = vector.broadcast %cst_5 : f32 to vector<8x1xf32>
    %12 = arith.mulf %10, %11 : vector<8x1xf32>
    %13 = vector.broadcast %12 : vector<8x1xf32> to vector<8x128xf32>
    %14 = arith.subf %0, %13 : vector<8x128xf32>
    %15 = arith.mulf %14, %7 : vector<8x128xf32>
    %16 = arith.mulf %15, %15 : vector<8x128xf32>
    %cst_6 = arith.constant dense<0.000000e+00> : vector<8xf32>
    %17 = vector.multi_reduction <add>, %16, %cst_6 [1] : vector<8x128xf32> to vector<8xf32>
    %18 = vector.shape_cast %17 : vector<8xf32> to vector<8x1xf32>
    %cst_7 = arith.constant 3.125000e-02 : f32
    %19 = vector.broadcast %cst_7 : f32 to vector<8x1xf32>
    %20 = arith.mulf %18, %19 : vector<8x1xf32>
    %21 = vector.broadcast %12 : vector<8x1xf32> to vector<8x128xf32>
    %22 = arith.subf %0, %21 : vector<8x128xf32>
    %cst_8 = arith.constant 9.99999974E-6 : f32
    %23 = vector.broadcast %cst_8 : f32 to vector<8x1xf32>
    %24 = arith.addf %20, %23 : vector<8x1xf32>
    %25 = math.rsqrt %24 : vector<8x1xf32>
    %26 = vector.broadcast %25 : vector<8x1xf32> to vector<8x128xf32>
    %27 = arith.mulf %22, %26 : vector<8x128xf32>
    %28 = vector.broadcast %1 : vector<1x128xf32> to vector<8x128xf32>
    %29 = arith.mulf %27, %28 : vector<8x128xf32>
    %30 = vector.broadcast %2 : vector<1x128xf32> to vector<8x128xf32>
    %31 = arith.addf %29, %30 : vector<8x128xf32>
    %c0_9 = arith.constant 0 : index
    %c0_10 = arith.constant 0 : index
    %32 = vector.load %arg4[%c0_9, %c0_10] : memref<8x128xf32, #tpu.memory_space<vmem>>, vector<8x128xf32>
    tpu.vector_store %arg4[%c0_9, %c0_10], %31 {strides = array<i32>} : memref<8x128xf32, #tpu.memory_space<vmem>>, vector<8x128xf32>,
    return
  }
  func.func @transform_0(%arg0: i32) -> (i32, i32) {
    %c0_i32 = arith.constant 0 : i32
    %c0_i32_0 = arith.constant 0 : i32
    return %arg0, %c0_i32 : i32, i32
  }
  func.func @transform_1(%arg0: i32) -> (i32, i32) {
    %c0_i32 = arith.constant 0 : i32
    %c0_i32_0 = arith.constant 0 : i32
    %c0_i32_1 = arith.constant 0 : i32
    return %c0_i32, %c0_i32_0 : i32, i32
  }
  func.func @transform_2(%arg0: i32) -> (i32, i32) {
    %c0_i32 = arith.constant 0 : i32
    %c0_i32_0 = arith.constant 0 : i32
    %c0_i32_1 = arith.constant 0 : i32
    return %c0_i32, %c0_i32_0 : i32, i32
  }
  func.func @transform_3(%arg0: i32) -> (i32, i32) {
    %c0_i32 = arith.constant 0 : i32
    %c0_i32_0 = arith.constant 0 : i32
    return %arg0, %c0_i32 : i32, i32
  }
}

module attributes {stable_mosaic.version = 11 : i64} {
  func.func @_mha_kernel(%arg0: i32, %arg1: memref<1x8x128xf32, #tpu.memory_space<vmem>>, %arg2: memref<1x8x128xf32, #tpu.memory_space<vmem>>, %arg3: memref<128x128xbf16, #tpu.memory_space<vmem>>, %arg4: memref<1x128xf32, #tpu.memory_space<vmem>>, %arg5: memref<128x256xbf16, #tpu.memory_space<vmem>>, %arg6: memref<1x256xf32, #tpu.memory_space<vmem>>, %arg7: memref<128x128xbf16, #tpu.memory_space<vmem>>, %arg8: memref<1x128xf32, #tpu.memory_space<vmem>>, %arg9: memref<1x1x8xf32, #tpu.memory_space<vmem>>, %arg10: memref<1x128xf32, #tpu.memory_space<vmem>>, %arg11: memref<1x128xf32, #tpu.memory_space<vmem>>, %arg12: memref<1x8x128xf32, #tpu.memory_space<vmem>>) attributes {dimension_semantics = [#tpu.dimension_semantics<parallel>], iteration_bounds = array<i64: 2>, scalar_prefetch = 0 : i64, scratch_operands = 0 : i64, tpu.core_type = #tpu.core_type<tc>, window_params = [{transform_indices = @transform_0, window_bounds = array<i64: 1, 8, 128>}, {transform_indices = @transform_1, window_bounds = array<i64: 1, 8, 128>}, {pipeline_mode = #tpu.pipeline_mode<synchronous>, transform_indices = @transform_2, window_bounds = array<i64: 128, 128>}, {pipeline_mode = #tpu.pipeline_mode<synchronous>, transform_indices = @transform_3, window_bounds = array<i64: 1, 128>}, {pipeline_mode = #tpu.pipeline_mode<synchronous>, transform_indices = @transform_4, window_bounds = array<i64: 128, 256>}, {pipeline_mode = #tpu.pipeline_mode<synchronous>, transform_indices = @transform_5, window_bounds = array<i64: 1, 256>}, {pipeline_mode = #tpu.pipeline_mode<synchronous>, transform_indices = @transform_6, window_bounds = array<i64: 128, 128>}, {pipeline_mode = #tpu.pipeline_mode<synchronous>, transform_indices = @transform_7, window_bounds = array<i64: 1, 128>}, {transform_indices = @transform_8, window_bounds = array<i64: 1, 1, 8>}, {pipeline_mode = #tpu.pipeline_mode<synchronous>, transform_indices = @transform_9, window_bounds = array<i64: 1, 128>}, {pipeline_mode = #tpu.pipeline_mode<synchronous>, transform_indices = @transform_10, window_bounds = array<i64: 1, 128>}, {transform_indices = @transform_11, window_bounds = array<i64: 1, 8, 128>}]} {
    %c0 = arith.constant 0 : index
    %c0_0 = arith.constant 0 : index
    %c0_1 = arith.constant 0 : index
    %0 = vector.load %arg1[%c0, %c0_0, %c0_1] : memref<1x8x128xf32, #tpu.memory_space<vmem>>, vector<1x8x128xf32>
    %1 = vector.shape_cast %0 : vector<1x8x128xf32> to vector<8x128xf32>
    %c0_2 = arith.constant 0 : index
    %c0_3 = arith.constant 0 : index
    %c0_4 = arith.constant 0 : index
    %2 = vector.load %arg2[%c0_2, %c0_3, %c0_4] : memref<1x8x128xf32, #tpu.memory_space<vmem>>, vector<1x8x128xf32>
    %3 = vector.shape_cast %2 : vector<1x8x128xf32> to vector<8x128xf32>
    %4 = arith.truncf %1 : vector<8x128xf32> to vector<8x128xbf16>
    %c0_5 = arith.constant 0 : index
    %c0_6 = arith.constant 0 : index
    %5 = vector.load %arg3[%c0_5, %c0_6] : memref<128x128xbf16, #tpu.memory_space<vmem>>, vector<128x128xbf16>
    %cst = arith.constant dense<0.000000e+00> : vector<8x128xf32>
    %6 = tpu.matmul %4, %5, %cst {dimension_numbers = #tpu.dot_dimension_numbers<[1], [0], [0], [1], [0, 0, 1, 1], [], []>} : vector<8x128xbf16>, vector<128x128xbf16>, vector<8x128xf32> -> vector<8x128xf32>
    %c0_7 = arith.constant 0 : index
    %c0_8 = arith.constant 0 : index
    %7 = vector.load %arg4[%c0_7, %c0_8] : memref<1x128xf32, #tpu.memory_space<vmem>>, vector<1x128xf32>
    %8 = vector.broadcast %7 : vector<1x128xf32> to vector<8x128xf32>
    %9 = arith.addf %6, %8 : vector<8x128xf32>
    %10 = arith.truncf %3 : vector<8x128xf32> to vector<8x128xbf16>
    %c0_9 = arith.constant 0 : index
    %c0_10 = arith.constant 0 : index
    %11 = vector.load %arg5[%c0_9, %c0_10] : memref<128x256xbf16, #tpu.memory_space<vmem>>, vector<128x256xbf16>
    %cst_11 = arith.constant dense<0.000000e+00> : vector<8x256xf32>
    %12 = tpu.matmul %10, %11, %cst_11 {dimension_numbers = #tpu.dot_dimension_numbers<[1], [0], [0], [1], [0, 0, 1, 1], [], []>} : vector<8x128xbf16>, vector<128x256xbf16>, vector<8x256xf32> -> vector<8x256xf32>
    %c0_12 = arith.constant 0 : index
    %c0_13 = arith.constant 0 : index
    %13 = vector.load %arg6[%c0_12, %c0_13] : memref<1x256xf32, #tpu.memory_space<vmem>>, vector<1x256xf32>
    %14 = vector.broadcast %13 : vector<1x256xf32> to vector<8x256xf32>
    %15 = arith.addf %12, %14 : vector<8x256xf32>
    %16 = vector.extract_strided_slice %15 {offsets = [0, 0], sizes = [8, 128], strides = [1, 1]} : vector<8x256xf32> to vector<8x128xf32>
    %17 = vector.extract_strided_slice %15 {offsets = [0, 128], sizes = [8, 128], strides = [1, 1]} : vector<8x256xf32> to vector<8x128xf32>
    %c0_14 = arith.constant 0 : index
    %c0_15 = arith.constant 0 : index
    %c0_16 = arith.constant 0 : index
    %18 = vector.load %arg9[%c0_14, %c0_15, %c0_16] : memref<1x1x8xf32, #tpu.memory_space<vmem>>, vector<1x1x8xf32>
    %19 = vector.shape_cast %18 : vector<1x1x8xf32> to vector<1x8xf32>
    %c0_17 = arith.constant 0 : index
    %c0_18 = arith.constant 0 : index
    %20 = vector.load %arg7[%c0_17, %c0_18] : memref<128x128xbf16, #tpu.memory_space<vmem>>, vector<128x128xbf16>
    %cst_19 = arith.constant 0.000000e+00 : f32
    %21 = vector.broadcast %cst_19 : f32 to vector<8x128xf32>
    %22 = vector.extract_strided_slice %9 {offsets = [0, 0], sizes = [8, 8], strides = [1, 1]} : vector<8x128xf32> to vector<8x8xf32>
    %23 = arith.truncf %22 : vector<8x8xf32> to vector<8x8xbf16>
    %24 = vector.extract_strided_slice %16 {offsets = [0, 0], sizes = [8, 8], strides = [1, 1]} : vector<8x128xf32> to vector<8x8xf32>
    %25 = arith.truncf %24 : vector<8x8xf32> to vector<8x8xbf16>
    %cst_20 = arith.constant dense<0.000000e+00> : vector<8x8xf32>
    %26 = tpu.matmul %23, %25, %cst_20 {dimension_numbers = #tpu.dot_dimension_numbers<[1], [1], [0], [0], [0, 0, 1, 0], [], []>} : vector<8x8xbf16>, vector<8x8xbf16>, vector<8x8xf32> -> vector<8x8xf32>
    %cst_21 = arith.constant 0.353553385 : f32
    %27 = vector.broadcast %cst_21 : f32 to vector<8x8xf32>
    %28 = arith.mulf %26, %27 : vector<8x8xf32>
    %29 = vector.broadcast %19 : vector<1x8xf32> to vector<8x8xf32>
    %30 = arith.addf %28, %29 : vector<8x8xf32>
    %cst_22 = arith.constant dense<0xFF800000> : vector<8xf32>
    %31 = vector.multi_reduction <maximumf>, %30, %cst_22 [1] : vector<8x8xf32> to vector<8xf32>
    %32 = vector.shape_cast %31 : vector<8xf32> to vector<8x1xf32>
    %33 = vector.broadcast %32 : vector<8x1xf32> to vector<8x8xf32>
    %34 = arith.subf %30, %33 : vector<8x8xf32>
    %35 = math.exp %34 : vector<8x8xf32>
    %cst_23 = arith.constant dense<0.000000e+00> : vector<8xf32>
    %36 = vector.multi_reduction <add>, %35, %cst_23 [1] : vector<8x8xf32> to vector<8xf32>
    %37 = vector.shape_cast %36 : vector<8xf32> to vector<8x1xf32>
    %38 = tpu.reciprocal %37 {approx = true} : vector<8x1xf32> -> vector<8x1xf32>
    %39 = vector.broadcast %38 : vector<8x1xf32> to vector<8x8xf32>
    %40 = arith.mulf %35, %39 : vector<8x8xf32>
    %41 = arith.truncf %40 : vector<8x8xf32> to vector<8x8xbf16>
    %42 = vector.extract_strided_slice %17 {offsets = [0, 0], sizes = [8, 8], strides = [1, 1]} : vector<8x128xf32> to vector<8x8xf32>
    %43 = arith.truncf %42 : vector<8x8xf32> to vector<8x8xbf16>
    %cst_24 = arith.constant dense<0.000000e+00> : vector<8x8xf32>
    %44 = tpu.matmul %41, %43, %cst_24 {dimension_numbers = #tpu.dot_dimension_numbers<[1], [0], [0], [1], [0, 0, 1, 1], [], []>} : vector<8x8xbf16>, vector<8x8xbf16>, vector<8x8xf32> -> vector<8x8xf32>
    %45 = arith.truncf %44 : vector<8x8xf32> to vector<8x8xbf16>
    %46 = vector.extract_strided_slice %20 {offsets = [0, 0], sizes = [8, 128], strides = [1, 1]} : vector<128x128xbf16> to vector<8x128xbf16>
    %cst_25 = arith.constant dense<0.000000e+00> : vector<8x128xf32>
    %47 = tpu.matmul %45, %46, %cst_25 {dimension_numbers = #tpu.dot_dimension_numbers<[1], [0], [0], [1], [0, 0, 1, 1], [], []>} : vector<8x8xbf16>, vector<8x128xbf16>, vector<8x128xf32> -> vector<8x128xf32>
    %48 = arith.addf %21, %47 : vector<8x128xf32>
    %49 = vector.extract_strided_slice %9 {offsets = [0, 8], sizes = [8, 8], strides = [1, 1]} : vector<8x128xf32> to vector<8x8xf32>
    %50 = arith.truncf %49 : vector<8x8xf32> to vector<8x8xbf16>
    %51 = vector.extract_strided_slice %16 {offsets = [0, 8], sizes = [8, 8], strides = [1, 1]} : vector<8x128xf32> to vector<8x8xf32>
    %52 = arith.truncf %51 : vector<8x8xf32> to vector<8x8xbf16>
    %cst_26 = arith.constant dense<0.000000e+00> : vector<8x8xf32>
    %53 = tpu.matmul %50, %52, %cst_26 {dimension_numbers = #tpu.dot_dimension_numbers<[1], [1], [0], [0], [0, 0, 1, 0], [], []>} : vector<8x8xbf16>, vector<8x8xbf16>, vector<8x8xf32> -> vector<8x8xf32>
    %cst_27 = arith.constant 0.353553385 : f32
    %54 = vector.broadcast %cst_27 : f32 to vector<8x8xf32>
    %55 = arith.mulf %53, %54 : vector<8x8xf32>
    %56 = vector.broadcast %19 : vector<1x8xf32> to vector<8x8xf32>
    %57 = arith.addf %55, %56 : vector<8x8xf32>
    %cst_28 = arith.constant dense<0xFF800000> : vector<8xf32>
    %58 = vector.multi_reduction <maximumf>, %57, %cst_28 [1] : vector<8x8xf32> to vector<8xf32>
    %59 = vector.shape_cast %58 : vector<8xf32> to vector<8x1xf32>
    %60 = vector.broadcast %59 : vector<8x1xf32> to vector<8x8xf32>
    %61 = arith.subf %57, %60 : vector<8x8xf32>
    %62 = math.exp %61 : vector<8x8xf32>
    %cst_29 = arith.constant dense<0.000000e+00> : vector<8xf32>
    %63 = vector.multi_reduction <add>, %62, %cst_29 [1] : vector<8x8xf32> to vector<8xf32>
    %64 = vector.shape_cast %63 : vector<8xf32> to vector<8x1xf32>
    %65 = tpu.reciprocal %64 {approx = true} : vector<8x1xf32> -> vector<8x1xf32>
    %66 = vector.broadcast %65 : vector<8x1xf32> to vector<8x8xf32>
    %67 = arith.mulf %62, %66 : vector<8x8xf32>
    %68 = arith.truncf %67 : vector<8x8xf32> to vector<8x8xbf16>
    %69 = vector.extract_strided_slice %17 {offsets = [0, 8], sizes = [8, 8], strides = [1, 1]} : vector<8x128xf32> to vector<8x8xf32>
    %70 = arith.truncf %69 : vector<8x8xf32> to vector<8x8xbf16>
    %cst_30 = arith.constant dense<0.000000e+00> : vector<8x8xf32>
    %71 = tpu.matmul %68, %70, %cst_30 {dimension_numbers = #tpu.dot_dimension_numbers<[1], [0], [0], [1], [0, 0, 1, 1], [], []>} : vector<8x8xbf16>, vector<8x8xbf16>, vector<8x8xf32> -> vector<8x8xf32>
    %72 = arith.truncf %71 : vector<8x8xf32> to vector<8x8xbf16>
    %73 = vector.extract_strided_slice %20 {offsets = [8, 0], sizes = [8, 128], strides = [1, 1]} : vector<128x128xbf16> to vector<8x128xbf16>
    %cst_31 = arith.constant dense<0.000000e+00> : vector<8x128xf32>
    %74 = tpu.matmul %72, %73, %cst_31 {dimension_numbers = #tpu.dot_dimension_numbers<[1], [0], [0], [1], [0, 0, 1, 1], [], []>} : vector<8x8xbf16>, vector<8x128xbf16>, vector<8x128xf32> -> vector<8x128xf32>
    %75 = arith.addf %48, %74 : vector<8x128xf32>
    %76 = vector.extract_strided_slice %9 {offsets = [0, 16], sizes = [8, 8], strides = [1, 1]} : vector<8x128xf32> to vector<8x8xf32>
    %77 = arith.truncf %76 : vector<8x8xf32> to vector<8x8xbf16>
    %78 = vector.extract_strided_slice %16 {offsets = [0, 16], sizes = [8, 8], strides = [1, 1]} : vector<8x128xf32> to vector<8x8xf32>
    %79 = arith.truncf %78 : vector<8x8xf32> to vector<8x8xbf16>
    %cst_32 = arith.constant dense<0.000000e+00> : vector<8x8xf32>
    %80 = tpu.matmul %77, %79, %cst_32 {dimension_numbers = #tpu.dot_dimension_numbers<[1], [1], [0], [0], [0, 0, 1, 0], [], []>} : vector<8x8xbf16>, vector<8x8xbf16>, vector<8x8xf32> -> vector<8x8xf32>
    %cst_33 = arith.constant 0.353553385 : f32
    %81 = vector.broadcast %cst_33 : f32 to vector<8x8xf32>
    %82 = arith.mulf %80, %81 : vector<8x8xf32>
    %83 = vector.broadcast %19 : vector<1x8xf32> to vector<8x8xf32>
    %84 = arith.addf %82, %83 : vector<8x8xf32>
    %cst_34 = arith.constant dense<0xFF800000> : vector<8xf32>
    %85 = vector.multi_reduction <maximumf>, %84, %cst_34 [1] : vector<8x8xf32> to vector<8xf32>
    %86 = vector.shape_cast %85 : vector<8xf32> to vector<8x1xf32>
    %87 = vector.broadcast %86 : vector<8x1xf32> to vector<8x8xf32>
    %88 = arith.subf %84, %87 : vector<8x8xf32>
    %89 = math.exp %88 : vector<8x8xf32>
    %cst_35 = arith.constant dense<0.000000e+00> : vector<8xf32>
    %90 = vector.multi_reduction <add>, %89, %cst_35 [1] : vector<8x8xf32> to vector<8xf32>
    %91 = vector.shape_cast %90 : vector<8xf32> to vector<8x1xf32>
    %92 = tpu.reciprocal %91 {approx = true} : vector<8x1xf32> -> vector<8x1xf32>
    %93 = vector.broadcast %92 : vector<8x1xf32> to vector<8x8xf32>
    %94 = arith.mulf %89, %93 : vector<8x8xf32>
    %95 = arith.truncf %94 : vector<8x8xf32> to vector<8x8xbf16>
    %96 = vector.extract_strided_slice %17 {offsets = [0, 16], sizes = [8, 8], strides = [1, 1]} : vector<8x128xf32> to vector<8x8xf32>
    %97 = arith.truncf %96 : vector<8x8xf32> to vector<8x8xbf16>
    %cst_36 = arith.constant dense<0.000000e+00> : vector<8x8xf32>
    %98 = tpu.matmul %95, %97, %cst_36 {dimension_numbers = #tpu.dot_dimension_numbers<[1], [0], [0], [1], [0, 0, 1, 1], [], []>} : vector<8x8xbf16>, vector<8x8xbf16>, vector<8x8xf32> -> vector<8x8xf32>
    %99 = arith.truncf %98 : vector<8x8xf32> to vector<8x8xbf16>
    %100 = vector.extract_strided_slice %20 {offsets = [16, 0], sizes = [8, 128], strides = [1, 1]} : vector<128x128xbf16> to vector<8x128xbf16>
    %cst_37 = arith.constant dense<0.000000e+00> : vector<8x128xf32>
    %101 = tpu.matmul %99, %100, %cst_37 {dimension_numbers = #tpu.dot_dimension_numbers<[1], [0], [0], [1], [0, 0, 1, 1], [], []>} : vector<8x8xbf16>, vector<8x128xbf16>, vector<8x128xf32> -> vector<8x128xf32>
    %102 = arith.addf %75, %101 : vector<8x128xf32>
    %103 = vector.extract_strided_slice %9 {offsets = [0, 24], sizes = [8, 8], strides = [1, 1]} : vector<8x128xf32> to vector<8x8xf32>
    %104 = arith.truncf %103 : vector<8x8xf32> to vector<8x8xbf16>
    %105 = vector.extract_strided_slice %16 {offsets = [0, 24], sizes = [8, 8], strides = [1, 1]} : vector<8x128xf32> to vector<8x8xf32>
    %106 = arith.truncf %105 : vector<8x8xf32> to vector<8x8xbf16>
    %cst_38 = arith.constant dense<0.000000e+00> : vector<8x8xf32>
    %107 = tpu.matmul %104, %106, %cst_38 {dimension_numbers = #tpu.dot_dimension_numbers<[1], [1], [0], [0], [0, 0, 1, 0], [], []>} : vector<8x8xbf16>, vector<8x8xbf16>, vector<8x8xf32> -> vector<8x8xf32>
    %cst_39 = arith.constant 0.353553385 : f32
    %108 = vector.broadcast %cst_39 : f32 to vector<8x8xf32>
    %109 = arith.mulf %107, %108 : vector<8x8xf32>
    %110 = vector.broadcast %19 : vector<1x8xf32> to vector<8x8xf32>
    %111 = arith.addf %109, %110 : vector<8x8xf32>
    %cst_40 = arith.constant dense<0xFF800000> : vector<8xf32>
    %112 = vector.multi_reduction <maximumf>, %111, %cst_40 [1] : vector<8x8xf32> to vector<8xf32>
    %113 = vector.shape_cast %112 : vector<8xf32> to vector<8x1xf32>
    %114 = vector.broadcast %113 : vector<8x1xf32> to vector<8x8xf32>
    %115 = arith.subf %111, %114 : vector<8x8xf32>
    %116 = math.exp %115 : vector<8x8xf32>
    %cst_41 = arith.constant dense<0.000000e+00> : vector<8xf32>
    %117 = vector.multi_reduction <add>, %116, %cst_41 [1] : vector<8x8xf32> to vector<8xf32>
    %118 = vector.shape_cast %117 : vector<8xf32> to vector<8x1xf32>
    %119 = tpu.reciprocal %118 {approx = true} : vector<8x1xf32> -> vector<8x1xf32>
    %120 = vector.broadcast %119 : vector<8x1xf32> to vector<8x8xf32>
    %121 = arith.mulf %116, %120 : vector<8x8xf32>
    %122 = arith.truncf %121 : vector<8x8xf32> to vector<8x8xbf16>
    %123 = vector.extract_strided_slice %17 {offsets = [0, 24], sizes = [8, 8], strides = [1, 1]} : vector<8x128xf32> to vector<8x8xf32>
    %124 = arith.truncf %123 : vector<8x8xf32> to vector<8x8xbf16>
    %cst_42 = arith.constant dense<0.000000e+00> : vector<8x8xf32>
    %125 = tpu.matmul %122, %124, %cst_42 {dimension_numbers = #tpu.dot_dimension_numbers<[1], [0], [0], [1], [0, 0, 1, 1], [], []>} : vector<8x8xbf16>, vector<8x8xbf16>, vector<8x8xf32> -> vector<8x8xf32>
    %126 = arith.truncf %125 : vector<8x8xf32> to vector<8x8xbf16>
    %127 = vector.extract_strided_slice %20 {offsets = [24, 0], sizes = [8, 128], strides = [1, 1]} : vector<128x128xbf16> to vector<8x128xbf16>
    %cst_43 = arith.constant dense<0.000000e+00> : vector<8x128xf32>
    %128 = tpu.matmul %126, %127, %cst_43 {dimension_numbers = #tpu.dot_dimension_numbers<[1], [0], [0], [1], [0, 0, 1, 1], [], []>} : vector<8x8xbf16>, vector<8x128xbf16>, vector<8x128xf32> -> vector<8x128xf32>
    %129 = arith.addf %102, %128 : vector<8x128xf32>
    %c0_44 = arith.constant 0 : index
    %c0_45 = arith.constant 0 : index
    %130 = vector.load %arg8[%c0_44, %c0_45] : memref<1x128xf32, #tpu.memory_space<vmem>>, vector<1x128xf32>
    %131 = vector.broadcast %130 : vector<1x128xf32> to vector<8x128xf32>
    %132 = arith.addf %129, %131 : vector<8x128xf32>
    %133 = arith.addf %1, %132 : vector<8x128xf32>
    %c0_46 = arith.constant 0 : index
    %c0_47 = arith.constant 0 : index
    %134 = vector.load %arg10[%c0_46, %c0_47] : memref<1x128xf32, #tpu.memory_space<vmem>>, vector<1x128xf32>
    %c0_48 = arith.constant 0 : index
    %c0_49 = arith.constant 0 : index
    %135 = vector.load %arg11[%c0_48, %c0_49] : memref<1x128xf32, #tpu.memory_space<vmem>>, vector<1x128xf32>
    %136 = tpu.iota {dimensions = array<i32: 1>} : vector<8x128xi32>
    %c32_i32 = arith.constant 32 : i32
    %137 = vector.broadcast %c32_i32 : i32 to vector<8x128xi32>
    %138 = arith.cmpi slt, %136, %137 : vector<8x128xi32>
    %139 = arith.extui %138 : vector<8x128xi1> to vector<8x128xi32>
    %140 = arith.sitofp %139 : vector<8x128xi32> to vector<8x128xf32>
    %141 = arith.mulf %133, %140 : vector<8x128xf32>
    %cst_50 = arith.constant dense<0.000000e+00> : vector<8xf32>
    %142 = vector.multi_reduction <add>, %141, %cst_50 [1] : vector<8x128xf32> to vector<8xf32>
    %143 = vector.shape_cast %142 : vector<8xf32> to vector<8x1xf32>
    %cst_51 = arith.constant 3.125000e-02 : f32
    %144 = vector.broadcast %cst_51 : f32 to vector<8x1xf32>
    %145 = arith.mulf %143, %144 : vector<8x1xf32>
    %146 = vector.broadcast %145 : vector<8x1xf32> to vector<8x128xf32>
    %147 = arith.subf %133, %146 : vector<8x128xf32>
    %148 = arith.mulf %147, %140 : vector<8x128xf32>
    %149 = arith.mulf %148, %148 : vector<8x128xf32>
    %cst_52 = arith.constant dense<0.000000e+00> : vector<8xf32>
    %150 = vector.multi_reduction <add>, %149, %cst_52 [1] : vector<8x128xf32> to vector<8xf32>
    %151 = vector.shape_cast %150 : vector<8xf32> to vector<8x1xf32>
    %cst_53 = arith.constant 3.125000e-02 : f32
    %152 = vector.broadcast %cst_53 : f32 to vector<8x1xf32>
    %153 = arith.mulf %151, %152 : vector<8x1xf32>
    %154 = vector.broadcast %145 : vector<8x1xf32> to vector<8x128xf32>
    %155 = arith.subf %133, %154 : vector<8x128xf32>
    %cst_54 = arith.constant 9.99999974E-6 : f32
    %156 = vector.broadcast %cst_54 : f32 to vector<8x1xf32>
    %157 = arith.addf %153, %156 : vector<8x1xf32>
    %158 = math.rsqrt %157 : vector<8x1xf32>
    %159 = vector.broadcast %158 : vector<8x1xf32> to vector<8x128xf32>
    %160 = arith.mulf %155, %159 : vector<8x128xf32>
    %161 = vector.broadcast %134 : vector<1x128xf32> to vector<8x128xf32>
    %162 = arith.mulf %160, %161 : vector<8x128xf32>
    %163 = vector.broadcast %135 : vector<1x128xf32> to vector<8x128xf32>
    %164 = arith.addf %162, %163 : vector<8x128xf32>
    %c0_55 = arith.constant 0 : index
    %c0_56 = arith.constant 0 : index
    %c0_57 = arith.constant 0 : index
    %165 = vector.load %arg12[%c0_55, %c0_56, %c0_57] : memref<1x8x128xf32, #tpu.memory_space<vmem>>, vector<1x8x128xf32>
    %166 = vector.shape_cast %165 : vector<1x8x128xf32> to vector<8x128xf32>
    %167 = vector.shape_cast %164 : vector<8x128xf32> to vector<1x8x128xf32>
    tpu.vector_store %arg12[%c0_55, %c0_56, %c0_57], %167 {strides = array<i32>} : memref<1x8x128xf32, #tpu.memory_space<vmem>>, vector<1x8x128xf32>,
    return
  }
  func.func @transform_0(%arg0: i32) -> (i32, i32, i32) {
    %c0_i32 = arith.constant 0 : i32
    %c0_i32_0 = arith.constant 0 : i32
    %c0_i32_1 = arith.constant 0 : i32
    return %arg0, %c0_i32, %c0_i32_0 : i32, i32, i32
  }
  func.func @transform_1(%arg0: i32) -> (i32, i32, i32) {
    %c0_i32 = arith.constant 0 : i32
    %c0_i32_0 = arith.constant 0 : i32
    %c0_i32_1 = arith.constant 0 : i32
    return %arg0, %c0_i32, %c0_i32_0 : i32, i32, i32
  }
  func.func @transform_2(%arg0: i32) -> (i32, i32) {
    %c0_i32 = arith.constant 0 : i32
    %c0_i32_0 = arith.constant 0 : i32
    %c0_i32_1 = arith.constant 0 : i32
    return %c0_i32, %c0_i32_0 : i32, i32
  }
  func.func @transform_3(%arg0: i32) -> (i32, i32) {
    %c0_i32 = arith.constant 0 : i32
    %c0_i32_0 = arith.constant 0 : i32
    %c0_i32_1 = arith.constant 0 : i32
    return %c0_i32, %c0_i32_0 : i32, i32
  }
  func.func @transform_4(%arg0: i32) -> (i32, i32) {
    %c0_i32 = arith.constant 0 : i32
    %c0_i32_0 = arith.constant 0 : i32
    %c0_i32_1 = arith.constant 0 : i32
    return %c0_i32, %c0_i32_0 : i32, i32
  }
  func.func @transform_5(%arg0: i32) -> (i32, i32) {
    %c0_i32 = arith.constant 0 : i32
    %c0_i32_0 = arith.constant 0 : i32
    %c0_i32_1 = arith.constant 0 : i32
    return %c0_i32, %c0_i32_0 : i32, i32
  }
  func.func @transform_6(%arg0: i32) -> (i32, i32) {
    %c0_i32 = arith.constant 0 : i32
    %c0_i32_0 = arith.constant 0 : i32
    %c0_i32_1 = arith.constant 0 : i32
    return %c0_i32, %c0_i32_0 : i32, i32
  }
  func.func @transform_7(%arg0: i32) -> (i32, i32) {
    %c0_i32 = arith.constant 0 : i32
    %c0_i32_0 = arith.constant 0 : i32
    %c0_i32_1 = arith.constant 0 : i32
    return %c0_i32, %c0_i32_0 : i32, i32
  }
  func.func @transform_8(%arg0: i32) -> (i32, i32, i32) {
    %c0_i32 = arith.constant 0 : i32
    %c0_i32_0 = arith.constant 0 : i32
    %c0_i32_1 = arith.constant 0 : i32
    return %arg0, %c0_i32, %c0_i32_0 : i32, i32, i32
  }
  func.func @transform_9(%arg0: i32) -> (i32, i32) {
    %c0_i32 = arith.constant 0 : i32
    %c0_i32_0 = arith.constant 0 : i32
    %c0_i32_1 = arith.constant 0 : i32
    return %c0_i32, %c0_i32_0 : i32, i32
  }
  func.func @transform_10(%arg0: i32) -> (i32, i32) {
    %c0_i32 = arith.constant 0 : i32
    %c0_i32_0 = arith.constant 0 : i32
    %c0_i32_1 = arith.constant 0 : i32
    return %c0_i32, %c0_i32_0 : i32, i32
  }
  func.func @transform_11(%arg0: i32) -> (i32, i32, i32) {
    %c0_i32 = arith.constant 0 : i32
    %c0_i32_0 = arith.constant 0 : i32
    %c0_i32_1 = arith.constant 0 : i32
    return %arg0, %c0_i32, %c0_i32_0 : i32, i32, i32
  }
}

module attributes {stable_mosaic.version = 11 : i64} {
  func.func @_linear_simple_kernel(%arg0: i32, %arg1: i32, %arg2: memref<8x128xf32, #tpu.memory_space<vmem>>, %arg3: memref<128x128xbf16, #tpu.memory_space<vmem>>, %arg4: memref<1x128xf32, #tpu.memory_space<vmem>>, %arg5: memref<8x128xf32, #tpu.memory_space<vmem>>) attributes {dimension_semantics = [#tpu.dimension_semantics<parallel>, #tpu.dimension_semantics<parallel>], iteration_bounds = array<i64: 2, 1>, scalar_prefetch = 0 : i64, scratch_operands = 0 : i64, tpu.core_type = #tpu.core_type<tc>, window_params = [{transform_indices = @transform_0, window_bounds = array<i64: 8, 128>}, {transform_indices = @transform_1, window_bounds = array<i64: 128, 128>}, {transform_indices = @transform_2, window_bounds = array<i64: 1, 128>}, {transform_indices = @transform_3, window_bounds = array<i64: 8, 128>}]} {
    %c0 = arith.constant 0 : index
    %c0_0 = arith.constant 0 : index
    %0 = vector.load %arg2[%c0, %c0_0] : memref<8x128xf32, #tpu.memory_space<vmem>>, vector<8x128xf32>
    %1 = arith.truncf %0 : vector<8x128xf32> to vector<8x128xbf16>
    %c0_1 = arith.constant 0 : index
    %c0_2 = arith.constant 0 : index
    %2 = vector.load %arg3[%c0_1, %c0_2] : memref<128x128xbf16, #tpu.memory_space<vmem>>, vector<128x128xbf16>
    %cst = arith.constant dense<0.000000e+00> : vector<8x128xf32>
    %3 = tpu.matmul %1, %2, %cst {dimension_numbers = #tpu.dot_dimension_numbers<[1], [0], [0], [1], [0, 0, 1, 1], [], []>} : vector<8x128xbf16>, vector<128x128xbf16>, vector<8x128xf32> -> vector<8x128xf32>
    %c0_3 = arith.constant 0 : index
    %c0_4 = arith.constant 0 : index
    %4 = vector.load %arg4[%c0_3, %c0_4] : memref<1x128xf32, #tpu.memory_space<vmem>>, vector<1x128xf32>
    %5 = vector.broadcast %4 : vector<1x128xf32> to vector<8x128xf32>
    %6 = arith.addf %3, %5 : vector<8x128xf32>
    %c0_5 = arith.constant 0 : index
    %c0_6 = arith.constant 0 : index
    %7 = vector.load %arg5[%c0_5, %c0_6] : memref<8x128xf32, #tpu.memory_space<vmem>>, vector<8x128xf32>
    tpu.vector_store %arg5[%c0_5, %c0_6], %6 {strides = array<i32>} : memref<8x128xf32, #tpu.memory_space<vmem>>, vector<8x128xf32>,
    return
  }
  func.func @transform_0(%arg0: i32, %arg1: i32) -> (i32, i32) {
    %c0_i32 = arith.constant 0 : i32
    %c0_i32_0 = arith.constant 0 : i32
    return %arg0, %c0_i32 : i32, i32
  }
  func.func @transform_1(%arg0: i32, %arg1: i32) -> (i32, i32) {
    %c0_i32 = arith.constant 0 : i32
    %c0_i32_0 = arith.constant 0 : i32
    return %c0_i32, %arg1 : i32, i32
  }
  func.func @transform_2(%arg0: i32, %arg1: i32) -> (i32, i32) {
    %c0_i32 = arith.constant 0 : i32
    %c0_i32_0 = arith.constant 0 : i32
    return %c0_i32, %arg1 : i32, i32
  }
  func.func @transform_3(%arg0: i32, %arg1: i32) -> (i32, i32) {
    %c0_i32 = arith.constant 0 : i32
    return %arg0, %arg1 : i32, i32
  }
}

</mosaic_0001>

<bundles_post_ra>
// kernel: seq2seq_transformer_forward.14
= control target key start
LH: loop header
LB: loop body
LE: loop exit
PB: predicated region body
PF: predicated region fallthrough
CT: control target
= control target key end

     0   :  { %s756_s24 = smov 0   ;;  %s863_s0 = inlined_call_operand.vmem [shape: f32[16,128], index: 0, kind: input, shape index: {}]   ;;  %s864_s1 = inlined_call_operand.vmem [shape: bf16[128,128], index: 1, kind: input, shape index: {}]   ;;  %s865_s2 = inlined_call_operand.vmem [shape: f32[1,128], index: 2, kind: input, shape index: {}, may-alias: {2,4,6}]   ;;  %s866_s3 = inlined_call_operand.vmem [shape: bf16[128,128], index: 3, kind: input, shape index: {}]   ;;  %s867_s4 = inlined_call_operand.vmem [shape: f32[1,128], index: 4, kind: input, shape index: {}, may-alias: {2,4,6}]   ;;  %s868_s5 = inlined_call_operand.vmem [shape: f32[1,128], index: 5, kind: input, shape index: {}]   ;;  %s869_s6 = inlined_call_operand.vmem [shape: f32[1,128], index: 6, kind: input, shape index: {}, may-alias: {2,4,6}]   ;;  %s870_s7 = inlined_call_operand.vmem [shape: f32[16,128], index: 7, kind: output, shape index: {}]  }
   0x1 LB: > { %s590_s25 = sadd.s32 4294967295, %s712_s24   ;;  %p594_p0 = scmp.ge.s32.totalorder %s712_s24, 1  ;;  %s712_s24 = sphi %s756_s24, %s17_s24  }
   0x2   : > { %p236_p1 = scmp.lt.s32.totalorder %s712_s24, 3 }
   0x4   : > { %p237_p2 = pnand %p594_p0, %p236_p1 }
   0x5   : > { %v688_v0 = vld [vmem:[%s864_s1] sm:$0xff] (!%p237_p2)   ;;  %v714_v1 = vmov (!%p237_p2), 0.0   ;;  %v689_v2 = vld [vmem:[%s864_s1 + $0x8] sm:$0xff] (!%p237_p2)   ;;  %vm715_vm0 = vmmov (!%p237_p2), 0   ;;  %v690_v3 = vld [vmem:[%s864_s1 + $0x10] sm:$0xff] (!%p237_p2)   ;;  %p266_p3 = scmp.lt.s32.totalorder (!%p237_p2), %s590_s25, 1  ;;  %v504_v27 = vlaneseq (!%p237_p2) }
   0x6   : > { %240 = sbr.rel (%p237_p2) target bundleno = 788 (0x314), region = 48  ;;  %638 = vmatprep.subr.bf16.mxu0 (!%p237_p2), %v714_v1  ;;  %658 = vmatprep.subr.bf16.mxu1 (!%p237_p2), %v714_v1  ;;  %v696_v4 = vld [vmem:[%s866_s3] sm:$0xff] (!%p237_p2)   ;;  %v691_v5 = vld [vmem:[%s864_s1 + $0x18] sm:$0xff] (!%p237_p2)   ;;  %v697_v6 = vld [vmem:[%s866_s3 + $0x8] sm:$0xff] (!%p237_p2)  }
   0x7   : > { %639 = vmatpush3.bf16.msra.mxu0 (!%p237_p2), %v688_v0  ;;  %654 = vmatprep.mubr.msk.bf16.mxu0 (!%p237_p2), %vm715_vm0, %v714_v1  ;;  %v692_v7 = vld [vmem:[%s864_s1 + $0x20] sm:$0xff] (!%p237_p2)   ;;  %v698_v8 = vld [vmem:[%s866_s3 + $0x10] sm:$0xff] (!%p237_p2)   ;;  %v693_v9 = vld [vmem:[%s864_s1 + $0x28] sm:$0xff] (!%p237_p2)   ;;  %v505_v28 = vand.u32 (!%p237_p2), 127, %v504_v27 }
   0x8   : > { %640 = vmatprep.subr.bf16.mxu0 (!%p237_p2), %v714_v1  ;;  %674 = vmatprep.mubr.msk.bf16.mxu1 (!%p237_p2), %vm715_vm0, %v714_v1  ;;  %v699_v10 = vld [vmem:[%s866_s3 + $0x18] sm:$0xff] (!%p237_p2)   ;;  %v694_v11 = vld [vmem:[%s864_s1 + $0x30] sm:$0xff] (!%p237_p2)   ;;  %v700_v12 = vld [vmem:[%s866_s3 + $0x20] sm:$0xff] (!%p237_p2)  }
   0x9   : > { %659 = vmatpush3.bf16.msra.mxu1 (!%p237_p2), %v696_v4  ;;  %v695_v13 = vld [vmem:[%s864_s1 + $0x38] sm:$0xff] (!%p237_p2)   ;;  %v701_v15 = vld [vmem:[%s866_s3 + $0x28] sm:$0xff] (!%p237_p2)   ;;  %v702_v17 = vld [vmem:[%s866_s3 + $0x30] sm:$0xff] (!%p237_p2)   ;;  %vm506_vm1 = vcmp.lt.s32.totalorder (!%p237_p2), %v505_v28, 32 }
   0xa   : > { %660 = vmatprep.subr.bf16.mxu1 (!%p237_p2), %v714_v1  ;;  %v703_v18 = vld [vmem:[%s866_s3 + $0x38] sm:$0xff] (!%p237_p2)   ;;  %v597_v19 = vld [vmem:[%s865_s2] ss:$0 sm:$0xff] (!%p237_p2)  ;;  %v615_v34 = vsel (!%p237_p2), %vm506_vm1, 1.0, %v714_v1 }
   0xb   : > { %641 = vmatpush3.bf16.msra.mxu0 (!%p237_p2), %v689_v2  ;;  %v606_v29 = vld [vmem:[%s867_s4] ss:$0 sm:$0xff] (!%p237_p2) }
   0xc   : > { %642 = vmatprep.subr.bf16.mxu0 (!%p237_p2), %v714_v1  ;;  %v616_v47 = vld [vmem:[%s868_s5] ss:$0 sm:$0xff] (!%p237_p2) }
   0xd   : > { %661 = vmatpush3.bf16.msra.mxu1 %v697_v6  ;;  %s872_s25 = smov (!%p266_p3, %s590_s25), 1  ;;  %v617_v49 = vld [vmem:[%s869_s6] ss:$0 sm:$0xff] }
   0xe   : > { %662 = vmatprep.subr.bf16.mxu1 %v714_v1  ;;  %s595_s23 = sshll.u32 %s872_s25, 3 }
   0xf   : > { %643 = vmatpush3.bf16.msra.mxu0 %v690_v3  ;;  %s269_s30 = scalar_lea.vmem %s863_s0, %s595_s23  ;;  %s273_s8 = scalar_lea.vmem %s870_s7, %s595_s23 }
  0x10   : > { %644 = vmatprep.subr.bf16.mxu0 %v714_v1  ;;  %v275_v14 = vld [vmem:[%s269_s30] sm:$0xff] }
  0x11   : > { %663 = vmatpush3.bf16.msra.mxu1 %v698_v8  ;;  %v276_v16 = vpack.c.bf16 %v275_v14, %v275_v14 }
  0x12   : > { %664 = vmatprep.subr.bf16.mxu1 %v714_v1 }
  0x13   : > { %645 = vmatpush3.bf16.msra.mxu0 %v691_v5 }
  0x14   : > { %646 = vmatprep.subr.bf16.mxu0 %v714_v1 }
  0x15   : > { %665 = vmatpush3.bf16.msra.mxu1 %v699_v10 }
  0x16   : > { %666 = vmatprep.subr.bf16.mxu1 %v714_v1 }
  0x17   : > { %647 = vmatpush3.bf16.msra.mxu0 %v692_v7 }
  0x18   : > { %648 = vmatprep.subr.bf16.mxu0 %v714_v1 }
  0x19   : > { %667 = vmatpush3.bf16.msra.mxu1 %v700_v12 }
  0x1a   : > { %668 = vmatprep.subr.bf16.mxu1 %v714_v1 }
  0x1b   : > { %649 = vmatpush3.bf16.msra.mxu0 %v693_v9 }
  0x1c   : > { %650 = vmatprep.subr.bf16.mxu0 %v714_v1 }
  0x1d   : > { %669 = vmatpush3.bf16.msra.mxu1 %v701_v15 }
  0x1e   : > { %670 = vmatprep.subr.bf16.mxu1 %v714_v1 }
  0x1f   : > { %651 = vmatpush3.bf16.msra.mxu0 %v694_v11 }
  0x20   : > { %652 = vmatprep.subr.bf16.mxu0 %v714_v1 }
  0x21   : > { %671 = vmatpush3.bf16.msra.mxu1 %v702_v17 }
  0x22   : > { %672 = vmatprep.subr.bf16.mxu1 %v714_v1 }
  0x23   : > { %653 = vmatpush3.bf16.msra.mxu0 %v695_v13 }
  0x25   : > { %673 = vmatpush3.bf16.msra.mxu1 %v703_v18 }
  0x26   : > { %655 = vmatmul.mubr.bf16.vlgmr.msra.gmra.mrb[0].mxu0 %v276_v16 }
  0xf9   : > { %v382_v20 = vpop.f32.mrb[0].mxu0 }
  0xfa   : > { %v383_v21 = vadd.f32 %v597_v19, %v382_v20  ;;  %v656_v22 = vpop.f32.mrb[1].mxu0 }
  0xfb   : > { %v385_v23 = vpop.f32.mrb[2].mxu0 }
  0xfc   : > { %v388_v24 = vmax.f32 %v383_v21, 0.0  ;;  %v657_v25 = vpop.f32.mrb[3].mxu0 }
  0xfe   : > { %v389_v26 = vpack.c.bf16 %v388_v24, %v388_v24 }
 0x100   : > { %675 = vmatmul.mubr.bf16.vlgmr.msra.gmra.mrb[0].mxu1 %v389_v26 }
 0x1d3   : > { %v495_v30 = vpop.f32.mrb[0].mxu1 }
 0x1d4   : > { %v496_v31 = vadd.f32 %v606_v29, %v495_v30  ;;  %v676_v32 = vpop.f32.mrb[1].mxu1 }
 0x1d5   : > { %v498_v33 = vpop.f32.mrb[2].mxu1 }
 0x1d6   : > { %v677_v35 = vpop.f32.mrb[3].mxu1  ;;  %v501_v36 = vadd.f32 %v496_v31, %v275_v14 }
 0x1d8   : > { %v509_v37 = vmul.f32 %v615_v34, %v501_v36 }
 0x1da   : > { %510 = vadd.xlane.f32.xlu0 %v509_v37 }
 0x267   : > { %v511_v38 = vpop.xlane.xlu0 %510 }
 0x268   : > { %v512_v39 = vmul.f32 0.03125, %v511_v38 }
 0x26a   : > { %v513_v40 = vsub.f32 %v501_v36, %v512_v39 }
 0x26c   : > { %v514_v41 = vmul.f32 %v615_v34, %v513_v40 }
 0x26e   : > { %v515_v42 = vmul.f32 %v514_v41, %v514_v41 }
 0x270   : > { %516 = vadd.xlane.f32.xlu0 %v515_v42 }
 0x2fd   : > { %v517_v43 = vpop.xlane.xlu0 %516 }
 0x2fe   : > { %v518_v44 = vmul.f32 0.03125, %v517_v43 }
 0x300   : > { %v519_v45 = vadd.f32 1e-05, %v518_v44 }
 0x302   : > { %704 = vrsqrt.f32 %v519_v45 }
 0x30c   : > { %v705_v46 = vpop.eup %704 }
 0x30d   : > { %v521_v48 = vmul.f32 %v705_v46, %v513_v40 }
 0x30f   : > { %v528_v50 = vmul.f32 %v616_v47, %v521_v48 }
 0x311   : > { %v535_v51 = vadd.f32 %v617_v49, %v528_v50 }
 0x313   : > { %536 = vst [vmem:[%s273_s8] sm:$0xff] %v535_v51 }
 0x314 PF: > { %s17_s24 = sadd.s32 1, %s712_s24  }
 0x315   : > { %p14_p4 = scmp.ge.s32.totalorder %s17_s24, 4  }
 0x317   :  { %16 = sbr.rel (!%p14_p4) target bundleno = 1 (0x1), region = 78 }

// kernel: seq2seq_transformer_forward.13
= control target key start
LH: loop header
LB: loop body
LE: loop exit
PB: predicated region body
PF: predicated region fallthrough
CT: control target
= control target key end

     0   :  { %s1732_s17 = smov 0   ;;  %s1985_s0 = inlined_call_operand.vmem [shape: f32[2,8,128], index: 0, kind: input, shape index: {}]   ;;  %s1986_s1 = inlined_call_operand.vmem [shape: bf16[128,128], index: 1, kind: input, shape index: {}]   ;;  %s1987_s2 = inlined_call_operand.vmem [shape: f32[1,128], index: 2, kind: input, shape index: {}, may-alias: {2,6,10}]   ;;  %s1988_s3 = inlined_call_operand.vmem [shape: bf16[128,256], index: 3, kind: input, shape index: {}]   ;;  %s1989_s4 = inlined_call_operand.vmem [shape: f32[1,256], index: 4, kind: input, shape index: {}]   ;;  %s1990_s5 = inlined_call_operand.vmem [shape: bf16[128,128], index: 5, kind: input, shape index: {}]   ;;  %s1991_s6 = inlined_call_operand.vmem [shape: f32[1,128], index: 6, kind: input, shape index: {}, may-alias: {2,6,10}]   ;;  %s1992_s7 = inlined_call_operand.vmem [shape: f32[8,8], index: 7, kind: input, shape index: {}]   ;;  %s1993_s8 = inlined_call_operand.vmem [shape: f32[2,1,8], index: 8, kind: input, shape index: {}]   ;;  %s1994_s9 = inlined_call_operand.vmem [shape: f32[1,128], index: 9, kind: input, shape index: {}]   ;;  %s1995_s10 = inlined_call_operand.vmem [shape: f32[1,128], index: 10, kind: input, shape index: {}, may-alias: {2,6,10}]   ;;  %s1996_s11 = inlined_call_operand.vmem [shape: f32[2,8,128], index: 11, kind: output, shape index: {}]  }
   0x1 LB: > { %s1418_s18 = sadd.s32 4294967295, %s1664_s17   ;;  %p1422_p0 = scmp.ge.s32.totalorder %s1664_s17, 1  ;;  %s1664_s17 = sphi %s1732_s17, %s21_s17  }
   0x2   : > { %p344_p1 = scmp.lt.s32.totalorder %s1664_s17, 3 }
   0x4   : > { %p345_p2 = pnand %p1422_p0, %p344_p1 }
   0x5   : > { %v1608_v0 = vld [vmem:[%s1988_s3 + $0x4] ss:$8 sps:$4 sm:$0xff] (!%p345_p2)   ;;  %v1610_v1 = vld [vmem:[%s1988_s3] ss:$8 sps:$4 sm:$0xff] (!%p345_p2)   ;;  %v1666_v2 = vmov (!%p345_p2), 0.0   ;;  %v1667_v3 = vmov (!%p345_p2), 0   ;;  %v528_v28 = vlaneseq (!%p345_p2) }
   0x6   : > { %348 = sbr.rel (%p345_p2) target bundleno = 2952 (0xb88), region = 64  ;;  %1502 = vmatprep.subr.bf16.mxu0 (!%p345_p2), %v1666_v2  ;;  %650 = vmatprep.mubr.bf16.mxu1 (!%p345_p2), %v1667_v3  ;;  %v1611_v4 = vld [vmem:[%s1988_s3 + $0x14] ss:$8 sps:$4 sm:$0xff] (!%p345_p2)   ;;  %v1613_v5 = vld [vmem:[%s1988_s3 + $0x10] ss:$8 sps:$4 sm:$0xff] (!%p345_p2)   ;;  %vm1668_vm0 = vmmov (!%p345_p2), 0  }
   0x7   : > { %618 = vmatprep.subr.bf16.mxu1 (!%p345_p2), %v1608_v0  ;;  %1518 = vmatprep.mubr.msk.bf16.mxu0 (!%p345_p2), %vm1668_vm0, %v1666_v2  ;;  %v1614_v6 = vld [vmem:[%s1986_s1] sm:$0xff] (!%p345_p2)   ;;  %v1618_v8 = vld [vmem:[%s1986_s1 + $0x8] sm:$0xff] (!%p345_p2)   ;;  %v1619_v10 = vld [vmem:[%s1988_s3 + $0x34] ss:$8 sps:$4 sm:$0xff] (!%p345_p2)   ;;  %p385_p3 = scmp.lt.s32.totalorder (!%p345_p2), %s1418_s18, 1  ;;  %v529_v29 = vshrl.u32 (!%p345_p2), %v528_v28, 7 }
   0x8   : > { %619 = vmatpush1.bf16.msra.mxu1 (!%p345_p2), %v1610_v1  ;;  %v1615_v7 = vld [vmem:[%s1988_s3 + $0x24] ss:$8 sps:$4 sm:$0xff] (!%p345_p2)   ;;  %1503 = vmatpush3.bf16.msra.mxu0 (!%p345_p2), %v1614_v6  ;;  %v1617_v9 = vld [vmem:[%s1988_s3 + $0x20] ss:$8 sps:$4 sm:$0xff] (!%p345_p2)   ;;  %v1622_v11 = vld [vmem:[%s1986_s1 + $0x10] sm:$0xff] (!%p345_p2)   ;;  %vm674_vm1 = vcmask (!%p345_p2), 64512  }
   0x9   : > { %620 = vmatprep.subr.bf16.mxu1 (!%p345_p2), %v1611_v4  ;;  %1504 = vmatprep.subr.bf16.mxu0 (!%p345_p2), %v1666_v2  ;;  %v1621_v12 = vld [vmem:[%s1988_s3 + $0x30] ss:$8 sps:$4 sm:$0xff] (!%p345_p2)   ;;  %v1623_v13 = vld [vmem:[%s1988_s3 + $0x44] ss:$8 sps:$4 sm:$0xff] (!%p345_p2)   ;;  %v1625_v15 = vld [vmem:[%s1988_s3 + $0x40] ss:$8 sps:$4 sm:$0xff] (!%p345_p2)  }
   0xa   : > { %v1626_v14 = vld [vmem:[%s1986_s1 + $0x18] sm:$0xff] (!%p345_p2)   ;;  %v1630_v17 = vld [vmem:[%s1986_s1 + $0x20] sm:$0xff] (!%p345_p2)   ;;  %v1634_v20 = vld [vmem:[%s1986_s1 + $0x28] sm:$0xff] (!%p345_p2)   ;;  %v530_v30 = vsub.s32 (!%p345_p2), 0, %v529_v29  ;;  %v534_v32 = vsub.s32 (!%p345_p2), 1, %v529_v29  ;;  %vm739_vm2 = vcmask (!%p345_p2), 1043456  }
   0xb   : > { %v1627_v16 = vld [vmem:[%s1988_s3 + $0x54] ss:$8 sps:$4 sm:$0xff] (!%p345_p2)   ;;  %v1629_v18 = vld [vmem:[%s1988_s3 + $0x50] ss:$8 sps:$4 sm:$0xff] (!%p345_p2)   ;;  %v1631_v19 = vld [vmem:[%s1988_s3 + $0x64] ss:$8 sps:$4 sm:$0xff] (!%p345_p2)  }
   0xc   : > { %621 = vmatpush1.bf16.msra.mxu1 (!%p345_p2), %v1613_v5  ;;  %1505 = vmatpush3.bf16.msra.mxu0 (!%p345_p2), %v1618_v8  ;;  %v1633_v21 = vld [vmem:[%s1988_s3 + $0x60] ss:$8 sps:$4 sm:$0xff] (!%p345_p2)   ;;  %v1635_v22 = vld [vmem:[%s1988_s3 + $0x74] ss:$8 sps:$4 sm:$0xff] (!%p345_p2)   ;;  %v1637_v24 = vld [vmem:[%s1988_s3 + $0x70] ss:$8 sps:$4 sm:$0xff] (!%p345_p2)  }
   0xd   : > { %622 = vmatprep.subr.bf16.mxu1 %v1615_v7  ;;  %1506 = vmatprep.subr.bf16.mxu0 %v1666_v2  ;;  %s1998_s18 = smov (!%p385_p3, %s1418_s18), 1  ;;  %v1638_v23 = vld [vmem:[%s1986_s1 + $0x30] sm:$0xff]   ;;  %v1639_v26 = vld [vmem:[%s1986_s1 + $0x38] sm:$0xff]   ;;  %v526_v31 = vld [vmem:[%s1989_s4] sm:$0x3]  ;;  %s1669_s25 = smov 120  }
   0xe   : > { %s1423_s23 = sshll.u32 %s1998_s18, 3  ;;  %v531_v33 = vrot.slane %v526_v31, %v530_v30  ;;  %v535_v34 = vrot.slane %v526_v31, %v534_v32  ;;  %v1425_v36 = vld [vmem:[%s1987_s2] ss:$0 sm:$0xff]  ;;  %s391_s28 = scalar_lea.vmem %s1993_s8, %s1998_s18 }
   0xf   : > { %s388_s30 = scalar_lea.vmem %s1985_s0, %s1423_s23  ;;  %v1450_v55 = vld [vmem:[%s391_s28] ss:$0 sm:$0xff]  ;;  %s1670_s12 = smov 112  }
  0x10   : > { %623 = vmatpush1.bf16.msra.mxu1 %v1617_v9  ;;  %1507 = vmatpush3.bf16.msra.mxu0 %v1622_v11  ;;  %v1830_v25 = vld [vmem:[%s388_s30] sm:$0xff]  ;;  %s1671_s19 = smov 104   ;;  %s395_s14 = scalar_lea.vmem %s1996_s11, %s1423_s23 }
  0x11   : > { %624 = vmatprep.subr.bf16.mxu1 %v1619_v10  ;;  %1508 = vmatprep.subr.bf16.mxu0 %v1666_v2  ;;  %v398_v27 = vpack.c.bf16 %v1830_v25, %v1830_v25  ;;  %v660_v56 = vld [vmem:[%s1992_s7] sm:$0xff] }
  0x12   : > { %v1883_v57 = vadd.f32 %v1450_v55, %v660_v56  ;;  %v668_v31 = vld [vmem:[%s1990_s5] sm:$0xf] }
  0x14   : > { %625 = vmatpush1.bf16.msra.mxu1 %v1621_v12  ;;  %1509 = vmatpush3.bf16.msra.mxu0 %v1626_v14 }
  0x15   : > { %626 = vmatprep.subr.bf16.mxu1 %v1623_v13  ;;  %1510 = vmatprep.subr.bf16.mxu0 %v1666_v2 }
  0x18   : > { %627 = vmatpush1.bf16.msra.mxu1 %v1625_v15  ;;  %1511 = vmatpush3.bf16.msra.mxu0 %v1630_v17 }
  0x19   : > { %628 = vmatprep.subr.bf16.mxu1 %v1627_v16  ;;  %1512 = vmatprep.subr.bf16.mxu0 %v1666_v2 }
  0x1c   : > { %629 = vmatpush1.bf16.msra.mxu1 %v1629_v18  ;;  %1513 = vmatpush3.bf16.msra.mxu0 %v1634_v20 }
  0x1d   : > { %630 = vmatprep.subr.bf16.mxu1 %v1631_v19  ;;  %1514 = vmatprep.subr.bf16.mxu0 %v1666_v2 }
  0x20   : > { %631 = vmatpush1.bf16.msra.mxu1 %v1633_v21  ;;  %1515 = vmatpush3.bf16.msra.mxu0 %v1638_v23  ;;  %v669_v23 = vld [vmem:[%s1990_s5 + $0x4] sm:$0xf] }
  0x21   : > { %632 = vmatprep.subr.bf16.mxu1 %v1635_v22  ;;  %1516 = vmatprep.subr.bf16.mxu0 %v1666_v2 }
  0x24   : > { %633 = vmatpush1.bf16.msra.mxu1 %v1637_v24  ;;  %1517 = vmatpush3.bf16.msra.mxu0 %v1639_v26  ;;  %v904_v24 = vsel %vm739_vm2, %v669_v23, 0 }
  0x25   : > { %1528 = vmatprep.subr.bf16.mxu1 %v1666_v2  ;;  %1522 = vmatprep.subr.bf16.mxu0 %v1666_v2 }
  0x27   : > { %651 = vmatmul.mubr.bf16.vlgmr.msra.gmra.mrb[0].mxu1 %v398_v27  ;;  %1519 = vmatmul.mubr.bf16.vlgmr.msra.gmra.mrb[0].mxu0 %v398_v27 }
  0x28   : > { %1530 = vmatprep.mubr.msk.bf16.mxu1 %vm1668_vm0, %v1666_v2  ;;  %1524 = vmatprep.mubr.msk.bf16.mxu0 %vm1668_vm0, %v1666_v2 }
  0xfa   : > { %v652_v35 = vpop.f32.mrb[0].mxu1  ;;  %v504_v41 = vpop.f32.mrb[0].mxu0 }
  0xfb   : > { %v653_v37 = vadd.f32 %v652_v35, %v531_v33  ;;  %v654_v38 = vpop.f32.mrb[1].mxu1  ;;  %v505_v44 = vadd.f32 %v1425_v36, %v504_v41  ;;  %v1520_v45 = vpop.f32.mrb[1].mxu0 }
  0xfc   : > { %v655_v39 = vadd.f32 %v654_v38, %v535_v34  ;;  %v656_v40 = vpop.f32.mrb[2].mxu1  ;;  %v507_v47 = vpop.f32.mrb[2].mxu0  ;;  %v950_v34 = vsel %vm739_vm2, %v668_v31, 0 }
  0xfd   : > { %v1851_v42 = vpack.c.bf16 %v653_v37, %v653_v37  ;;  %v657_v43 = vpop.f32.mrb[3].mxu1  ;;  %v1857_v48 = vpack.c.bf16 %v505_v44, %v505_v44  ;;  %v1521_v50 = vpop.f32.mrb[3].mxu0 }
  0xfe   : > { %v1853_v46 = vpack.c.bf16 %v655_v39, %v655_v39 }
  0xff   : > { %788 = vrot.lane.b32.xlu0 %v1851_v42, %s1669_s25  ;;  %v679_v49 = vsel %vm674_vm1, %v1851_v42, 0 }
 0x100   : > { %1523 = vmatpush3.bf16.xpose.msra.mxu0 %v679_v49  ;;  %v741_v51 = vsel %vm739_vm2, %v1853_v46, 0 }
 0x101   : > { %1529 = vmatpush3.bf16.msra.mxu1 %v741_v51  ;;  %1534 = vmatprep.subr.bf16.mxu0 %v1666_v2 }
 0x102   : > { %1540 = vmatprep.subr.bf16.mxu1 %v1666_v2 }
 0x103   : > { %785 = vrot.lane.b32.xlu0 %v1857_v48, %s1669_s25 }
 0x107   : > { %1525 = vmatmul.mubr.msk.bf16.vlgmr.msra.gmra.mrb[4].mxu0 %vm674_vm1, %v1857_v48 }
 0x108   : > { %1536 = vmatprep.mubr.msk.bf16.mxu0 %vm1668_vm0, %v1666_v2 }
 0x171   : > { %v789_v52 = vpop.permute.xlu0 %788 }
 0x172   : > { %v794_v53 = vsel %vm674_vm1, %v789_v52, 0 }
 0x173   : > { %1535 = vmatpush3.bf16.xpose.msra.mxu0 %v794_v53 }
 0x174   : > { %1546 = vmatprep.subr.bf16.mxu0 %v1666_v2 }
 0x175   : > { %v786_v54 = vpop.permute.xlu0 %785 }
 0x17a   : > { %1537 = vmatmul.mubr.msk.bf16.vlgmr.msra.gmra.mrb[8].mxu0 %vm674_vm1, %v786_v54 }
 0x17b   : > { %1548 = vmatprep.mubr.msk.bf16.mxu0 %vm1668_vm0, %v1666_v2  ;;  %1547 = vmatpush3.bf16.msra.mxu0 %v904_v24 }
 0x17c   : > { %1558 = vmatprep.subr.bf16.mxu0 %v1666_v2 }
 0x1da   : > { %v715_v58 = vpop.f32.mrb[4].mxu0 }
 0x1db   : > { %v721_v59 = vmul.f32 0.35355338, %v715_v58  ;;  %v1526_v60 = vpop.f32.mrb[5].mxu0 }
 0x1dc   : > { %v718_v61 = vpop.f32.mrb[6].mxu0 }
 0x1dd   : > { %v1527_v62 = vpop.f32.mrb[7].mxu0  ;;  %v722_v63 = vadd.f32 %v721_v59, %v1883_v57 }
 0x1df   : > { %v723_v0 = vsel %vm674_vm1, %v722_v63, -inf }
 0x1e0   : > { %724 = vmax.xlane.f32.xlu1 %v723_v0 }
 0x24d   : > { %v830_v1 = vpop.f32.mrb[8].mxu0 }
 0x24e   : > { %v836_v3 = vmul.f32 0.35355338, %v830_v1  ;;  %v1538_v4 = vpop.f32.mrb[9].mxu0 }
 0x24f   : > { %v833_v5 = vpop.f32.mrb[10].mxu0 }
 0x250   : > { %v1539_v6 = vpop.f32.mrb[11].mxu0  ;;  %v837_v7 = vadd.f32 %v836_v3, %v1883_v57 }
 0x252   : > { %v838_v8 = vsel %vm674_vm1, %v837_v7, -inf }
 0x253   : > { %839 = vmax.xlane.f32.xlu1 %v838_v8 }
 0x26d   : > { %v725_v9 = vpop.xlane.xlu1 %724 }
 0x26e   : > { %v726_v10 = vsub.f32 %v722_v63, %v725_v9 }
 0x270   : > { %v727_v11 = vmul.f32 1.442695, %v726_v10 }
 0x272   : > { %1640 = vpow2.f32 %v727_v11 }
 0x27c   : > { %v1641_v12 = vpop.eup %1640 }
 0x27d   : > { %v729_v13 = vsel %vm674_vm1, %v1641_v12, 0.0 }
 0x27e   : > { %730 = vadd.xlane.f32.xlu0 %v729_v13 }
 0x294   : > { %1056 = vrot.lane.b32.xlu0 %v1853_v46, %s1670_s12 }
 0x2e0   : > { %v840_v14 = vpop.xlane.xlu1 %839 }
 0x2e1   : > { %v841_v15 = vsub.f32 %v837_v7, %v840_v14 }
 0x2e3   : > { %v842_v16 = vmul.f32 1.442695, %v841_v15 }
 0x2e5   : > { %1642 = vpow2.f32 %v842_v16 }
 0x2ef   : > { %v1643_v17 = vpop.eup %1642 }
 0x2f0   : > { %v844_v18 = vsel %vm674_vm1, %v1643_v17, 0.0 }
 0x2f1   : > { %845 = vadd.xlane.f32.xlu1 %v844_v18 }
 0x302   : > { %851 = vrot.lane.b32.xlu1 %v1853_v46, %s1669_s25 }
 0x306   : > { %994 = vrot.lane.b32.xlu1 %v1851_v42, %s1670_s12 }
 0x30a   : > { %992 = vrot.lane.b32.xlu1 %v1857_v48, %s1670_s12 }
 0x30b   : > { %v731_v19 = vpop.xlane.xlu0 %730 }
 0x30c   : > { %1644 = vrcp.f32 %v731_v19 }
 0x30f   : > { %v1057_v35 = vpop.permute.xlu0 %1056 }
 0x310   : > { %v1062_v40 = vsel %vm739_vm2, %v1057_v35, 0 }
 0x316   : > { %v1645_v20 = vpop.eup %1644 }
 0x317   : > { %v733_v21 = vmul.f32 %v1645_v20, %v1641_v12 }
 0x319   : > { %v734_v22 = vpack.c.bf16 %v733_v21, %v733_v21 }
 0x31b   : > { %1531 = vmatmul.mubr.msk.bf16.vlgmr.msra.gmra.mrb[4].mxu1 %vm674_vm1, %v734_v22 }
 0x31c   : > { %1542 = vmatprep.mubr.msk.bf16.mxu1 %vm1668_vm0, %v1666_v2 }
 0x37e   : > { %v846_v26 = vpop.xlane.xlu1 %845 }
 0x37f   : > { %1646 = vrcp.f32 %v846_v26 }
 0x382   : > { %v852_v27 = vpop.permute.xlu1 %851 }
 0x383   : > { %v857_v29 = vsel %vm739_vm2, %v852_v27, 0 }
 0x384   : > { %1541 = vmatpush3.bf16.msra.mxu1 %v857_v29 }
 0x385   : > { %1552 = vmatprep.subr.bf16.mxu1 %v1666_v2 }
 0x386   : > { %v995_v43 = vpop.permute.xlu1 %994 }
 0x387   : > { %v1000_v50 = vsel %vm674_vm1, %v995_v43, 0 }
 0x389   : > { %v1647_v30 = vpop.eup %1646 }
 0x38a   : > { %v848_v32 = vmul.f32 %v1647_v30, %v1643_v17  ;;  %v993_v52 = vpop.permute.xlu1 %992 }
 0x38c   : > { %v849_v33 = vpack.c.bf16 %v848_v32, %v848_v32 }
 0x38e   : > { %1543 = vmatmul.mubr.msk.bf16.vlgmr.msra.gmra.mrb[8].mxu1 %vm674_vm1, %v849_v33 }
 0x38f   : > { %1553 = vmatpush3.bf16.msra.mxu1 %v950_v34  ;;  %1554 = vmatprep.mubr.msk.bf16.mxu1 %vm1668_vm0, %v1666_v2 }
 0x390   : > { %1564 = vmatprep.subr.bf16.mxu1 %v1666_v2 }
 0x3ee   : > { %v777_v36 = vpop.f32.mrb[4].mxu1 }
 0x3ef   : > { %v783_v37 = vpack.c.bf16 %v777_v36, %v777_v36  ;;  %v1532_v38 = vpop.f32.mrb[5].mxu1 }
 0x3f0   : > { %v780_v39 = vpop.f32.mrb[6].mxu1  ;;  %v671_v38 = vld [vmem:[%s1990_s5 + $0xc] sm:$0xf] }
 0x3f1   : > { %v1533_v41 = vpop.f32.mrb[7].mxu1  ;;  %1555 = vmatmul.mubr.msk.bf16.vlgmr.msra.gmra.mrb[12].mxu1 %vm674_vm1, %v783_v37 }
 0x3f2   : > { %1565 = vmatpush3.bf16.msra.mxu1 %v1062_v40  ;;  %1566 = vmatprep.mubr.msk.bf16.mxu1 %vm1668_vm0, %v1666_v2 }
 0x3f3   : > { %1576 = vmatprep.subr.bf16.mxu1 %v1666_v2 }
 0x461   : > { %v893_v44 = vpop.f32.mrb[8].mxu1 }
 0x462   : > { %v899_v45 = vpack.c.bf16 %v893_v44, %v893_v44  ;;  %v1544_v47 = vpop.f32.mrb[9].mxu1 }
 0x463   : > { %v896_v49 = vpop.f32.mrb[10].mxu1 }
 0x464   : > { %v1545_v51 = vpop.f32.mrb[11].mxu1  ;;  %1549 = vmatmul.mubr.msk.bf16.vlgmr.msra.gmra.mrb[12].mxu0 %vm674_vm1, %v899_v45 }
 0x465   : > { %1559 = vmatpush3.bf16.xpose.msra.mxu0 %v1000_v50  ;;  %1560 = vmatprep.mubr.msk.bf16.mxu0 %vm1668_vm0, %v1666_v2 }
 0x466   : > { %1570 = vmatprep.subr.bf16.mxu0 %v1666_v2 }
 0x46c   : > { %1561 = vmatmul.mubr.msk.bf16.vlgmr.msra.gmra.mrb[16].mxu0 %vm674_vm1, %v993_v52 }
 0x46d   : > { %1572 = vmatprep.mubr.msk.bf16.mxu0 %vm1668_vm0, %v1666_v2 }
 0x4c4   : > { %v986_v53 = vpop.f32.mrb[12].mxu1 }
 0x4c5   : > { %v1556_v54 = vpop.f32.mrb[13].mxu1 }
 0x4c6   : > { %v989_v55 = vpop.f32.mrb[14].mxu1 }
 0x4c7   : > { %v1557_v56 = vpop.f32.mrb[15].mxu1 }
 0x537   : > { %v940_v58 = vpop.f32.mrb[12].mxu0 }
 0x538   : > { %v1927_v59 = vadd.f32 %v986_v53, %v940_v58  ;;  %v1550_v60 = vpop.f32.mrb[13].mxu0  ;;  %v1324_v58 = vand.u32 127, %v528_v28 }
 0x539   : > { %v943_v61 = vpop.f32.mrb[14].mxu0  ;;  %v1463_v60 = vld [vmem:[%s1991_s6] ss:$0 sm:$0xff] }
 0x53a   : > { %v1551_v62 = vpop.f32.mrb[15].mxu0  ;;  %vm1325_vm3 = vcmp.lt.s32.totalorder %v1324_v58, 32 }
 0x53f   : > { %v1036_v63 = vpop.f32.mrb[16].mxu0 }
 0x540   : > { %v1042_v0 = vmul.f32 0.35355338, %v1036_v63  ;;  %v1562_v1 = vpop.f32.mrb[17].mxu0 }
 0x541   : > { %v1039_v3 = vpop.f32.mrb[18].mxu0 }
 0x542   : > { %v1563_v4 = vpop.f32.mrb[19].mxu0  ;;  %v1043_v5 = vadd.f32 %v1042_v0, %v1883_v57  ;;  %v1464_v3 = vsel %vm1325_vm3, 1.0, %v1666_v2 }
 0x544   : > { %v1044_v6 = vsel %vm674_vm1, %v1043_v5, -inf }
 0x545   : > { %1045 = vmax.xlane.f32.xlu1 %v1044_v6 }
 0x5d2   : > { %v1046_v7 = vpop.xlane.xlu1 %1045 }
 0x5d3   : > { %v1047_v8 = vsub.f32 %v1043_v5, %v1046_v7 }
 0x5d5   : > { %v1048_v9 = vmul.f32 1.442695, %v1047_v8 }
 0x5d7   : > { %1648 = vpow2.f32 %v1048_v9 }
 0x5e1   : > { %v1649_v10 = vpop.eup %1648 }
 0x5e2   : > { %v1050_v11 = vsel %vm674_vm1, %v1649_v10, 0.0 }
 0x5e3   : > { %1051 = vadd.xlane.f32.xlu0 %v1050_v11 }
 0x5f9   : > { %1154 = vrot.lane.b32.xlu0 %v1851_v42, %s1671_s19 }
 0x5fd   : > { %1152 = vrot.lane.b32.xlu0 %v1857_v48, %s1671_s19  ;;  %v670_v48 = vld [vmem:[%s1990_s5 + $0x8] sm:$0xf] }
 0x5fe   : > { %v1109_v18 = vsel %vm739_vm2, %v670_v48, 0 }
 0x5ff   : > { %1571 = vmatpush3.bf16.msra.mxu0 %v1109_v18 }
 0x600   : > { %1582 = vmatprep.subr.bf16.mxu0 %v1666_v2 }
 0x670   : > { %v1052_v12 = vpop.xlane.xlu0 %1051 }
 0x671   : > { %1650 = vrcp.f32 %v1052_v12 }
 0x674   : > { %v1155_v15 = vpop.permute.xlu0 %1154 }
 0x675   : > { %v1160_v17 = vsel %vm674_vm1, %v1155_v15, 0 }
 0x678   : > { %v1153_v42 = vpop.permute.xlu0 %1152 }
 0x67b   : > { %v1651_v13 = vpop.eup %1650 }
 0x67c   : > { %v1054_v14 = vmul.f32 %v1651_v13, %v1649_v10 }
 0x67e   : > { %v1055_v16 = vpack.c.bf16 %v1054_v14, %v1054_v14 }
 0x680   : > { %1567 = vmatmul.mubr.msk.bf16.vlgmr.msra.gmra.mrb[16].mxu1 %vm674_vm1, %v1055_v16 }
 0x681   : > { %1577 = vmatpush3.bf16.xpose.msra.mxu1 %v1160_v17  ;;  %1578 = vmatprep.mubr.msk.bf16.mxu1 %vm1668_vm0, %v1666_v2 }
 0x682   : > { %1588 = vmatprep.subr.bf16.mxu1 %v1666_v2 }
 0x688   : > { %1579 = vmatmul.mubr.msk.bf16.vlgmr.msra.gmra.mrb[20].mxu1 %vm674_vm1, %v1153_v42 }
 0x689   : > { %1590 = vmatprep.mubr.msk.bf16.mxu1 %vm1668_vm0, %v1666_v2 }
 0x753   : > { %v1098_v19 = vpop.f32.mrb[16].mxu1 }
 0x754   : > { %v1104_v20 = vpack.c.bf16 %v1098_v19, %v1098_v19  ;;  %v1568_v21 = vpop.f32.mrb[17].mxu1 }
 0x755   : > { %v1101_v22 = vpop.f32.mrb[18].mxu1 }
 0x756   : > { %v1569_v23 = vpop.f32.mrb[19].mxu1  ;;  %1573 = vmatmul.mubr.msk.bf16.vlgmr.msra.gmra.mrb[20].mxu0 %vm674_vm1, %v1104_v20 }
 0x757   : > { %1584 = vmatprep.mubr.msk.bf16.mxu0 %vm1668_vm0, %v1666_v2  ;;  %v1465_v2 = vld [vmem:[%s1994_s9] ss:$0 sm:$0xff] }
 0x75b   : > { %v1196_v24 = vpop.f32.mrb[20].mxu1 }
 0x75c   : > { %v1202_v26 = vmul.f32 0.35355338, %v1196_v24  ;;  %v1580_v27 = vpop.f32.mrb[21].mxu1 }
 0x75d   : > { %v1199_v29 = vpop.f32.mrb[22].mxu1 }
 0x75e   : > { %v1581_v30 = vpop.f32.mrb[23].mxu1  ;;  %v1203_v31 = vadd.f32 %v1202_v26, %v1883_v57  ;;  %v1269_v57 = vsel %vm739_vm2, %v671_v38, 0 }
 0x75f   : > { %1589 = vmatpush3.bf16.msra.mxu1 %v1269_v57 }
 0x760   : > { %v1204_v32 = vsel %vm674_vm1, %v1203_v31, -inf }
 0x761   : > { %1205 = vmax.xlane.f32.xlu0 %v1204_v32 }
 0x7ee   : > { %v1206_v33 = vpop.xlane.xlu0 %1205 }
 0x7ef   : > { %v1207_v34 = vsub.f32 %v1203_v31, %v1206_v33 }
 0x7f1   : > { %v1208_v35 = vmul.f32 1.442695, %v1207_v34 }
 0x7f3   : > { %1652 = vpow2.f32 %v1208_v35 }
 0x7fd   : > { %v1653_v36 = vpop.eup %1652 }
 0x7fe   : > { %v1210_v37 = vsel %vm674_vm1, %v1653_v36, 0.0 }
 0x7ff   : > { %1211 = vadd.xlane.f32.xlu1 %v1210_v37 }
 0x810   : > { %1216 = vrot.lane.b32.xlu1 %v1853_v46, %s1671_s19 }
 0x829   : > { %v1145_v39 = vpop.f32.mrb[20].mxu0 }
 0x82a   : > { %v1151_v40 = vadd.f32 %v1145_v39, %v1927_v59  ;;  %v1574_v41 = vpop.f32.mrb[21].mxu0 }
 0x82b   : > { %v1148_v43 = vpop.f32.mrb[22].mxu0 }
 0x82c   : > { %v1575_v44 = vpop.f32.mrb[23].mxu0 }
 0x88c   : > { %v1212_v45 = vpop.xlane.xlu1 %1211 }
 0x88d   : > { %1654 = vrcp.f32 %v1212_v45 }
 0x890   : > { %v1217_v47 = vpop.permute.xlu1 %1216 }
 0x891   : > { %v1222_v49 = vsel %vm739_vm2, %v1217_v47, 0 }
 0x892   : > { %1583 = vmatpush3.bf16.msra.mxu0 %v1222_v49 }
 0x897   : > { %v1655_v46 = vpop.eup %1654 }
 0x898   : > { %v1214_v50 = vmul.f32 %v1655_v46, %v1653_v36 }
 0x89a   : > { %v1215_v51 = vpack.c.bf16 %v1214_v50, %v1214_v50 }
 0x89c   : > { %1585 = vmatmul.mubr.msk.bf16.vlgmr.msra.gmra.mrb[24].mxu0 %vm674_vm1, %v1215_v51 }
 0x96f   : > { %v1258_v52 = vpop.f32.mrb[24].mxu0 }
 0x970   : > { %v1264_v53 = vpack.c.bf16 %v1258_v52, %v1258_v52  ;;  %v1586_v54 = vpop.f32.mrb[25].mxu0 }
 0x971   : > { %v1261_v55 = vpop.f32.mrb[26].mxu0 }
 0x972   : > { %v1587_v56 = vpop.f32.mrb[27].mxu0  ;;  %1591 = vmatmul.mubr.msk.bf16.vlgmr.msra.gmra.mrb[24].mxu1 %vm674_vm1, %v1264_v53 }
 0xa45   : > { %v1305_v59 = vpop.f32.mrb[24].mxu1 }
 0xa46   : > { %v1311_v61 = vadd.f32 %v1305_v59, %v1151_v40  ;;  %v1592_v62 = vpop.f32.mrb[25].mxu1 }
 0xa47   : > { %v1308_v63 = vpop.f32.mrb[26].mxu1 }
 0xa48   : > { %v1319_v0 = vadd.f32 %v1463_v60, %v1311_v61  ;;  %v1593_v1 = vpop.f32.mrb[27].mxu1 }
 0xa4a   : > { %v1320_v4 = vadd.f32 %v1319_v0, %v1830_v25  ;;  %v1466_v25 = vld [vmem:[%s1995_s10] ss:$0 sm:$0xff] }
 0xa4c   : > { %v1328_v5 = vmul.f32 %v1464_v3, %v1320_v4 }
 0xa4e   : > { %1329 = vadd.xlane.f32.xlu1 %v1328_v5 }
 0xadb   : > { %v1330_v6 = vpop.xlane.xlu1 %1329 }
 0xadc   : > { %v1331_v28 = vmul.f32 0.03125, %v1330_v6 }
 0xade   : > { %v1332_v7 = vsub.f32 %v1320_v4, %v1331_v28 }
 0xae0   : > { %v1333_v8 = vmul.f32 %v1464_v3, %v1332_v7 }
 0xae2   : > { %v1334_v9 = vmul.f32 %v1333_v8, %v1333_v8 }
 0xae4   : > { %1335 = vadd.xlane.f32.xlu0 %v1334_v9 }
 0xb71   : > { %v1336_v10 = vpop.xlane.xlu0 %1335 }
 0xb72   : > { %v1337_v11 = vmul.f32 0.03125, %v1336_v10 }
 0xb74   : > { %v1338_v12 = vadd.f32 1e-05, %v1337_v11 }
 0xb76   : > { %1656 = vrsqrt.f32 %v1338_v12 }
 0xb80   : > { %v1657_v13 = vpop.eup %1656 }
 0xb81   : > { %v1340_v14 = vmul.f32 %v1657_v13, %v1332_v7 }
 0xb83   : > { %v1347_v15 = vmul.f32 %v1465_v2, %v1340_v14 }
 0xb85   : > { %v1354_v16 = vadd.f32 %v1466_v25, %v1347_v15 }
 0xb87   : > { %1355 = vst [vmem:[%s395_s14] sm:$0xff] %v1354_v16 }
 0xb88 PF: > { %s21_s17 = sadd.s32 1, %s1664_s17  }
 0xb89   : > { %p18_p4 = scmp.ge.s32.totalorder %s21_s17, 4  }
 0xb8b   :  { %20 = sbr.rel (!%p18_p4) target bundleno = 1 (0x1), region = 97 }

// kernel: seq2seq_transformer_forward.17
= control target key start
LH: loop header
LB: loop body
LE: loop exit
PB: predicated region body
PF: predicated region fallthrough
CT: control target
= control target key end

     0   :  { %s307_s12 = smov 0   ;;  %s330_s0 = inlined_call_operand.vmem [shape: f32[16,128], index: 0, kind: input, shape index: {}]   ;;  %s331_s1 = inlined_call_operand.vmem [shape: f32[1,128], index: 1, kind: input, shape index: {}]   ;;  %s332_s2 = inlined_call_operand.vmem [shape: f32[1,128], index: 2, kind: input, shape index: {}]   ;;  %s333_s3 = inlined_call_operand.vmem [shape: f32[16,128], index: 3, kind: output, shape index: {}]  }
   0x1 LB: > { %s255_s13 = sadd.s32 4294967295, %s284_s12   ;;  %p259_p0 = scmp.ge.s32.totalorder %s284_s12, 1  ;;  %s284_s12 = sphi %s307_s12, %s13_s12  }
   0x2   : > { %p136_p1 = scmp.lt.s32.totalorder %s284_s12, 3 }
   0x4   : > { %p137_p2 = pnand %p259_p0, %p136_p1 }
   0x5   : > { %p158_p3 = scmp.lt.s32.totalorder (!%p137_p2), %s255_s13, 1  ;;  %v169_v0 = vlaneseq (!%p137_p2)  ;;  %v286_v2 = vmov (!%p137_p2), 0.0   ;;  %v263_v15 = vld [vmem:[%s331_s1] ss:$0 sm:$0xff] (!%p137_p2) }
   0x6   : > { %140 = sbr.rel (%p137_p2) target bundleno = 333 (0x14d), region = 32  ;;  %v264_v17 = vld [vmem:[%s332_s2] ss:$0 sm:$0xff] (!%p137_p2) }
   0x7   : > { %v170_v1 = vand.u32 (!%p137_p2), 127, %v169_v0 }
   0x9   : > { %vm171_vm0 = vcmp.lt.s32.totalorder (!%p137_p2), %v170_v1, 32 }
   0xa   : > { %v262_v3 = vsel (!%p137_p2), %vm171_vm0, 1.0, %v286_v2 }
   0xd   : > { %s335_s13 = smov (!%p158_p3, %s255_s13), 1 }
   0xe   : > { %s260_s14 = sshll.u32 %s335_s13, 3 }
   0xf   : > { %s161_s17 = scalar_lea.vmem %s330_s0, %s260_s14  ;;  %s165_s24 = scalar_lea.vmem %s333_s3, %s260_s14 }
  0x10   : > { %v166_v4 = vld [vmem:[%s161_s17] sm:$0xff] }
  0x11   : > { %v174_v5 = vmul.f32 %v262_v3, %v166_v4 }
  0x13   : > { %175 = vadd.xlane.f32.xlu0 %v174_v5 }
  0xa0   : > { %v176_v6 = vpop.xlane.xlu0 %175 }
  0xa1   : > { %v177_v7 = vmul.f32 0.03125, %v176_v6 }
  0xa3   : > { %v178_v8 = vsub.f32 %v166_v4, %v177_v7 }
  0xa5   : > { %v179_v9 = vmul.f32 %v262_v3, %v178_v8 }
  0xa7   : > { %v180_v10 = vmul.f32 %v179_v9, %v179_v9 }
  0xa9   : > { %181 = vadd.xlane.f32.xlu0 %v180_v10 }
 0x136   : > { %v182_v11 = vpop.xlane.xlu0 %181 }
 0x137   : > { %v183_v12 = vmul.f32 0.03125, %v182_v11 }
 0x139   : > { %v184_v13 = vadd.f32 1e-05, %v183_v12 }
 0x13b   : > { %276 = vrsqrt.f32 %v184_v13 }
 0x145   : > { %v277_v14 = vpop.eup %276 }
 0x146   : > { %v186_v16 = vmul.f32 %v277_v14, %v178_v8 }
 0x148   : > { %v193_v18 = vmul.f32 %v263_v15, %v186_v16 }
 0x14a   : > { %v200_v19 = vadd.f32 %v264_v17, %v193_v18 }
 0x14c   : > { %201 = vst [vmem:[%s165_s24] sm:$0xff] %v200_v19 }
 0x14d PF: > { %s13_s12 = sadd.s32 1, %s284_s12  }
 0x14e   : > { %p10_p4 = scmp.ge.s32.totalorder %s13_s12, 4  }
 0x150   :  { %12 = sbr.rel (!%p10_p4) target bundleno = 1 (0x1), region = 62 }

// kernel: seq2seq_transformer_forward.19
= control target key start
LH: loop header
LB: loop body
LE: loop exit
PB: predicated region body
PF: predicated region fallthrough
CT: control target
= control target key end

     0   :  { %s1762_s17 = smov 0   ;;  %s2016_s0 = inlined_call_operand.vmem [shape: f32[2,8,128], index: 0, kind: input, shape index: {}]   ;;  %s2017_s1 = inlined_call_operand.vmem [shape: f32[2,8,128], index: 1, kind: input, shape index: {}]   ;;  %s2018_s2 = inlined_call_operand.vmem [shape: bf16[128,128], index: 2, kind: input, shape index: {}]   ;;  %s2019_s3 = inlined_call_operand.vmem [shape: f32[1,128], index: 3, kind: input, shape index: {}, may-alias: {3,7,10}]   ;;  %s2020_s4 = inlined_call_operand.vmem [shape: bf16[128,256], index: 4, kind: input, shape index: {}]   ;;  %s2021_s5 = inlined_call_operand.vmem [shape: f32[1,256], index: 5, kind: input, shape index: {}]   ;;  %s2022_s6 = inlined_call_operand.vmem [shape: bf16[128,128], index: 6, kind: input, shape index: {}]   ;;  %s2023_s7 = inlined_call_operand.vmem [shape: f32[1,128], index: 7, kind: input, shape index: {}, may-alias: {3,7,10}]   ;;  %s2024_s8 = inlined_call_operand.vmem [shape: f32[2,1,8], index: 8, kind: input, shape index: {}]   ;;  %s2025_s9 = inlined_call_operand.vmem [shape: f32[1,128], index: 9, kind: input, shape index: {}]   ;;  %s2026_s10 = inlined_call_operand.vmem [shape: f32[1,128], index: 10, kind: input, shape index: {}, may-alias: {3,7,10}]   ;;  %s2027_s11 = inlined_call_operand.vmem [shape: f32[2,8,128], index: 11, kind: output, shape index: {}]  }
   0x1 LB: > { %s1447_s18 = sadd.s32 4294967295, %s1694_s17   ;;  %p1451_p0 = scmp.ge.s32.totalorder %s1694_s17, 1  ;;  %s1694_s17 = sphi %s1762_s17, %s21_s17  }
   0x2   : > { %p353_p1 = scmp.lt.s32.totalorder %s1694_s17, 3 }
   0x4   : > { %p354_p2 = pnand %p1451_p0, %p353_p1 }
   0x5   : > { %v1638_v0 = vld [vmem:[%s2020_s4 + $0x4] ss:$8 sps:$4 sm:$0xff] (!%p354_p2)   ;;  %v1640_v1 = vld [vmem:[%s2020_s4] ss:$8 sps:$4 sm:$0xff] (!%p354_p2)   ;;  %v1696_v2 = vmov (!%p354_p2), 0.0   ;;  %v1697_v3 = vmov (!%p354_p2), 0   ;;  %v547_v30 = vlaneseq (!%p354_p2) }
   0x6   : > { %357 = sbr.rel (%p354_p2) target bundleno = 2952 (0xb88), region = 64  ;;  %1532 = vmatprep.subr.bf16.mxu0 (!%p354_p2), %v1696_v2  ;;  %669 = vmatprep.mubr.bf16.mxu1 (!%p354_p2), %v1697_v3  ;;  %v1641_v4 = vld [vmem:[%s2020_s4 + $0x14] ss:$8 sps:$4 sm:$0xff] (!%p354_p2)   ;;  %v1643_v5 = vld [vmem:[%s2020_s4 + $0x10] ss:$8 sps:$4 sm:$0xff] (!%p354_p2)   ;;  %vm1698_vm0 = vmmov (!%p354_p2), 0  }
   0x7   : > { %637 = vmatprep.subr.bf16.mxu1 (!%p354_p2), %v1638_v0  ;;  %1548 = vmatprep.mubr.msk.bf16.mxu0 (!%p354_p2), %vm1698_vm0, %v1696_v2  ;;  %v1644_v6 = vld [vmem:[%s2018_s2] sm:$0xff] (!%p354_p2)   ;;  %v1648_v8 = vld [vmem:[%s2018_s2 + $0x8] sm:$0xff] (!%p354_p2)   ;;  %v1649_v10 = vld [vmem:[%s2020_s4 + $0x34] ss:$8 sps:$4 sm:$0xff] (!%p354_p2)   ;;  %p398_p3 = scmp.lt.s32.totalorder (!%p354_p2), %s1447_s18, 1  ;;  %v548_v31 = vshrl.u32 (!%p354_p2), %v547_v30, 7 }
   0x8   : > { %638 = vmatpush1.bf16.msra.mxu1 (!%p354_p2), %v1640_v1  ;;  %v1645_v7 = vld [vmem:[%s2020_s4 + $0x24] ss:$8 sps:$4 sm:$0xff] (!%p354_p2)   ;;  %1533 = vmatpush3.bf16.msra.mxu0 (!%p354_p2), %v1644_v6  ;;  %v1647_v9 = vld [vmem:[%s2020_s4 + $0x20] ss:$8 sps:$4 sm:$0xff] (!%p354_p2)   ;;  %v1652_v11 = vld [vmem:[%s2018_s2 + $0x10] sm:$0xff] (!%p354_p2)   ;;  %vm685_vm1 = vcmask (!%p354_p2), 64512  }
   0x9   : > { %639 = vmatprep.subr.bf16.mxu1 (!%p354_p2), %v1641_v4  ;;  %1534 = vmatprep.subr.bf16.mxu0 (!%p354_p2), %v1696_v2  ;;  %v1651_v12 = vld [vmem:[%s2020_s4 + $0x30] ss:$8 sps:$4 sm:$0xff] (!%p354_p2)   ;;  %v1653_v13 = vld [vmem:[%s2020_s4 + $0x44] ss:$8 sps:$4 sm:$0xff] (!%p354_p2)   ;;  %v1655_v15 = vld [vmem:[%s2020_s4 + $0x40] ss:$8 sps:$4 sm:$0xff] (!%p354_p2)  }
   0xa   : > { %v1656_v14 = vld [vmem:[%s2018_s2 + $0x18] sm:$0xff] (!%p354_p2)   ;;  %v1660_v17 = vld [vmem:[%s2018_s2 + $0x20] sm:$0xff] (!%p354_p2)   ;;  %v1664_v20 = vld [vmem:[%s2018_s2 + $0x28] sm:$0xff] (!%p354_p2)   ;;  %v549_v32 = vsub.s32 (!%p354_p2), 0, %v548_v31  ;;  %v553_v34 = vsub.s32 (!%p354_p2), 1, %v548_v31  ;;  %vm756_vm2 = vcmask (!%p354_p2), 1043456  }
   0xb   : > { %v1657_v16 = vld [vmem:[%s2020_s4 + $0x54] ss:$8 sps:$4 sm:$0xff] (!%p354_p2)   ;;  %v1659_v18 = vld [vmem:[%s2020_s4 + $0x50] ss:$8 sps:$4 sm:$0xff] (!%p354_p2)   ;;  %v1661_v19 = vld [vmem:[%s2020_s4 + $0x64] ss:$8 sps:$4 sm:$0xff] (!%p354_p2)  }
   0xc   : > { %640 = vmatpush1.bf16.msra.mxu1 (!%p354_p2), %v1643_v5  ;;  %1535 = vmatpush3.bf16.msra.mxu0 (!%p354_p2), %v1648_v8  ;;  %v1663_v21 = vld [vmem:[%s2020_s4 + $0x60] ss:$8 sps:$4 sm:$0xff] (!%p354_p2)   ;;  %v1665_v22 = vld [vmem:[%s2020_s4 + $0x74] ss:$8 sps:$4 sm:$0xff] (!%p354_p2)   ;;  %v1667_v24 = vld [vmem:[%s2020_s4 + $0x70] ss:$8 sps:$4 sm:$0xff] (!%p354_p2)  }
   0xd   : > { %641 = vmatprep.subr.bf16.mxu1 %v1645_v7  ;;  %1536 = vmatprep.subr.bf16.mxu0 %v1696_v2  ;;  %s2029_s18 = smov (!%p398_p3, %s1447_s18), 1  ;;  %v1668_v23 = vld [vmem:[%s2018_s2 + $0x30] sm:$0xff]   ;;  %v1669_v26 = vld [vmem:[%s2018_s2 + $0x38] sm:$0xff]   ;;  %v545_v33 = vld [vmem:[%s2021_s5] sm:$0x3]  ;;  %s1699_s28 = smov 120  }
   0xe   : > { %s1841_s23 = sshll.u32 %s2029_s18, 3  ;;  %v550_v35 = vrot.slane %v545_v33, %v549_v32  ;;  %v554_v36 = vrot.slane %v545_v33, %v553_v34  ;;  %v1455_v38 = vld [vmem:[%s2019_s3] ss:$0 sm:$0xff]  ;;  %s408_s12 = scalar_lea.vmem %s2024_s8, %s2029_s18 }
   0xf   : > { %s405_s30 = scalar_lea.vmem %s2017_s1, %s1841_s23  ;;  %s401_s16 = scalar_lea.vmem %s2016_s0, %s1841_s23  ;;  %v1915_v58 = vld [vmem:[%s408_s12] ss:$0 sm:$0xff] }
  0x10   : > { %642 = vmatpush1.bf16.msra.mxu1 %v1647_v9  ;;  %1537 = vmatpush3.bf16.msra.mxu0 %v1652_v11  ;;  %v415_v25 = vld [vmem:[%s405_s30] sm:$0xff]  ;;  %s1700_s18 = smov 112   ;;  %s1701_s19 = smov 104  }
  0x11   : > { %643 = vmatprep.subr.bf16.mxu1 %v1649_v10  ;;  %1538 = vmatprep.subr.bf16.mxu0 %v1696_v2  ;;  %v1868_v27 = vld [vmem:[%s401_s16] sm:$0xff]  ;;  %v528_v28 = vpack.c.bf16 %v415_v25, %v415_v25  ;;  %s412_s13 = scalar_lea.vmem %s2027_s11, %s1841_s23 }
  0x12   : > { %v416_v29 = vpack.c.bf16 %v1868_v27, %v1868_v27  ;;  %v679_v31 = vld [vmem:[%s2022_s6] sm:$0xf] }
  0x13   : > { %v967_v34 = vsel %vm756_vm2, %v679_v31, 0 }
  0x14   : > { %644 = vmatpush1.bf16.msra.mxu1 %v1651_v12  ;;  %1539 = vmatpush3.bf16.msra.mxu0 %v1656_v14 }
  0x15   : > { %645 = vmatprep.subr.bf16.mxu1 %v1653_v13  ;;  %1540 = vmatprep.subr.bf16.mxu0 %v1696_v2 }
  0x18   : > { %646 = vmatpush1.bf16.msra.mxu1 %v1655_v15  ;;  %1541 = vmatpush3.bf16.msra.mxu0 %v1660_v17 }
  0x19   : > { %647 = vmatprep.subr.bf16.mxu1 %v1657_v16  ;;  %1542 = vmatprep.subr.bf16.mxu0 %v1696_v2 }
  0x1c   : > { %648 = vmatpush1.bf16.msra.mxu1 %v1659_v18  ;;  %1543 = vmatpush3.bf16.msra.mxu0 %v1664_v20 }
  0x1d   : > { %649 = vmatprep.subr.bf16.mxu1 %v1661_v19  ;;  %1544 = vmatprep.subr.bf16.mxu0 %v1696_v2 }
  0x20   : > { %650 = vmatpush1.bf16.msra.mxu1 %v1663_v21  ;;  %1545 = vmatpush3.bf16.msra.mxu0 %v1668_v23  ;;  %v680_v23 = vld [vmem:[%s2022_s6 + $0x4] sm:$0xf] }
  0x21   : > { %651 = vmatprep.subr.bf16.mxu1 %v1665_v22  ;;  %1546 = vmatprep.subr.bf16.mxu0 %v1696_v2 }
  0x24   : > { %652 = vmatpush1.bf16.msra.mxu1 %v1667_v24  ;;  %1547 = vmatpush3.bf16.msra.mxu0 %v1669_v26  ;;  %v921_v24 = vsel %vm756_vm2, %v680_v23, 0 }
  0x25   : > { %1558 = vmatprep.subr.bf16.mxu1 %v1696_v2  ;;  %1552 = vmatprep.subr.bf16.mxu0 %v1696_v2 }
  0x27   : > { %670 = vmatmul.mubr.bf16.vlgmr.msra.gmra.mrb[0].mxu1 %v528_v28  ;;  %1549 = vmatmul.mubr.bf16.vlgmr.msra.gmra.mrb[0].mxu0 %v416_v29 }
  0x28   : > { %1560 = vmatprep.mubr.msk.bf16.mxu1 %vm1698_vm0, %v1696_v2  ;;  %1554 = vmatprep.mubr.msk.bf16.mxu0 %vm1698_vm0, %v1696_v2 }
  0xfa   : > { %v671_v37 = vpop.f32.mrb[0].mxu1  ;;  %v522_v43 = vpop.f32.mrb[0].mxu0 }
  0xfb   : > { %v672_v39 = vadd.f32 %v671_v37, %v550_v35  ;;  %v673_v40 = vpop.f32.mrb[1].mxu1  ;;  %v523_v46 = vadd.f32 %v1455_v38, %v522_v43  ;;  %v1550_v47 = vpop.f32.mrb[1].mxu0 }
  0xfc   : > { %v674_v41 = vadd.f32 %v673_v40, %v554_v36  ;;  %v675_v42 = vpop.f32.mrb[2].mxu1  ;;  %v525_v49 = vpop.f32.mrb[2].mxu0 }
  0xfd   : > { %v1886_v44 = vpack.c.bf16 %v672_v39, %v672_v39  ;;  %v676_v45 = vpop.f32.mrb[3].mxu1  ;;  %v1892_v50 = vpack.c.bf16 %v523_v46, %v523_v46  ;;  %v1551_v52 = vpop.f32.mrb[3].mxu0 }
  0xfe   : > { %v1888_v48 = vpack.c.bf16 %v674_v41, %v674_v41 }
  0xff   : > { %805 = vrot.lane.b32.xlu0 %v1886_v44, %s1699_s28  ;;  %v690_v51 = vsel %vm685_vm1, %v1886_v44, 0 }
 0x100   : > { %1553 = vmatpush3.bf16.xpose.msra.mxu0 %v690_v51  ;;  %v758_v53 = vsel %vm756_vm2, %v1888_v48, 0 }
 0x101   : > { %1559 = vmatpush3.bf16.msra.mxu1 %v758_v53  ;;  %1564 = vmatprep.subr.bf16.mxu0 %v1696_v2 }
 0x102   : > { %1570 = vmatprep.subr.bf16.mxu1 %v1696_v2 }
 0x103   : > { %802 = vrot.lane.b32.xlu0 %v1892_v50, %s1699_s28 }
 0x107   : > { %1555 = vmatmul.mubr.msk.bf16.vlgmr.msra.gmra.mrb[4].mxu0 %vm685_vm1, %v1892_v50 }
 0x108   : > { %1566 = vmatprep.mubr.msk.bf16.mxu0 %vm1698_vm0, %v1696_v2 }
 0x171   : > { %v806_v54 = vpop.permute.xlu0 %805 }
 0x172   : > { %v811_v55 = vsel %vm685_vm1, %v806_v54, 0 }
 0x173   : > { %1565 = vmatpush3.bf16.xpose.msra.mxu0 %v811_v55 }
 0x174   : > { %1576 = vmatprep.subr.bf16.mxu0 %v1696_v2 }
 0x175   : > { %v803_v56 = vpop.permute.xlu0 %802 }
 0x17a   : > { %1567 = vmatmul.mubr.msk.bf16.vlgmr.msra.gmra.mrb[8].mxu0 %vm685_vm1, %v803_v56 }
 0x17b   : > { %1578 = vmatprep.mubr.msk.bf16.mxu0 %vm1698_vm0, %v1696_v2  ;;  %1577 = vmatpush3.bf16.msra.mxu0 %v921_v24 }
 0x17c   : > { %1588 = vmatprep.subr.bf16.mxu0 %v1696_v2 }
 0x1da   : > { %v726_v57 = vpop.f32.mrb[4].mxu0 }
 0x1db   : > { %v732_v59 = vmul.f32 0.35355338, %v726_v57  ;;  %v1556_v60 = vpop.f32.mrb[5].mxu0 }
 0x1dc   : > { %v729_v61 = vpop.f32.mrb[6].mxu0 }
 0x1dd   : > { %v1557_v62 = vpop.f32.mrb[7].mxu0  ;;  %v739_v63 = vadd.f32 %v1915_v58, %v732_v59 }
 0x1df   : > { %v740_v0 = vsel %vm685_vm1, %v739_v63, -inf }
 0x1e0   : > { %741 = vmax.xlane.f32.xlu1 %v740_v0 }
 0x24d   : > { %v847_v1 = vpop.f32.mrb[8].mxu0 }
 0x24e   : > { %v853_v3 = vmul.f32 0.35355338, %v847_v1  ;;  %v1568_v4 = vpop.f32.mrb[9].mxu0 }
 0x24f   : > { %v850_v5 = vpop.f32.mrb[10].mxu0 }
 0x250   : > { %v1569_v6 = vpop.f32.mrb[11].mxu0  ;;  %v854_v7 = vadd.f32 %v1915_v58, %v853_v3 }
 0x252   : > { %v855_v8 = vsel %vm685_vm1, %v854_v7, -inf }
 0x253   : > { %856 = vmax.xlane.f32.xlu1 %v855_v8 }
 0x26d   : > { %v742_v9 = vpop.xlane.xlu1 %741 }
 0x26e   : > { %v743_v10 = vsub.f32 %v739_v63, %v742_v9 }
 0x270   : > { %v744_v11 = vmul.f32 1.442695, %v743_v10 }
 0x272   : > { %1670 = vpow2.f32 %v744_v11 }
 0x27c   : > { %v1671_v12 = vpop.eup %1670 }
 0x27d   : > { %v746_v13 = vsel %vm685_vm1, %v1671_v12, 0.0 }
 0x27e   : > { %747 = vadd.xlane.f32.xlu0 %v746_v13 }
 0x294   : > { %1073 = vrot.lane.b32.xlu0 %v1888_v48, %s1700_s18 }
 0x2e0   : > { %v857_v14 = vpop.xlane.xlu1 %856 }
 0x2e1   : > { %v858_v15 = vsub.f32 %v854_v7, %v857_v14 }
 0x2e3   : > { %v859_v16 = vmul.f32 1.442695, %v858_v15 }
 0x2e5   : > { %1672 = vpow2.f32 %v859_v16 }
 0x2ef   : > { %v1673_v17 = vpop.eup %1672 }
 0x2f0   : > { %v861_v18 = vsel %vm685_vm1, %v1673_v17, 0.0 }
 0x2f1   : > { %862 = vadd.xlane.f32.xlu1 %v861_v18 }
 0x302   : > { %868 = vrot.lane.b32.xlu1 %v1888_v48, %s1699_s28 }
 0x306   : > { %1011 = vrot.lane.b32.xlu1 %v1886_v44, %s1700_s18 }
 0x30a   : > { %1009 = vrot.lane.b32.xlu1 %v1892_v50, %s1700_s18 }
 0x30b   : > { %v748_v19 = vpop.xlane.xlu0 %747 }
 0x30c   : > { %1674 = vrcp.f32 %v748_v19 }
 0x30f   : > { %v1074_v35 = vpop.permute.xlu0 %1073 }
 0x310   : > { %v1079_v40 = vsel %vm756_vm2, %v1074_v35, 0 }
 0x316   : > { %v1675_v20 = vpop.eup %1674 }
 0x317   : > { %v750_v21 = vmul.f32 %v1675_v20, %v1671_v12 }
 0x319   : > { %v751_v22 = vpack.c.bf16 %v750_v21, %v750_v21 }
 0x31b   : > { %1561 = vmatmul.mubr.msk.bf16.vlgmr.msra.gmra.mrb[4].mxu1 %vm685_vm1, %v751_v22 }
 0x31c   : > { %1572 = vmatprep.mubr.msk.bf16.mxu1 %vm1698_vm0, %v1696_v2 }
 0x37e   : > { %v863_v25 = vpop.xlane.xlu1 %862 }
 0x37f   : > { %1676 = vrcp.f32 %v863_v25 }
 0x382   : > { %v869_v26 = vpop.permute.xlu1 %868 }
 0x383   : > { %v874_v28 = vsel %vm756_vm2, %v869_v26, 0 }
 0x384   : > { %1571 = vmatpush3.bf16.msra.mxu1 %v874_v28 }
 0x385   : > { %1582 = vmatprep.subr.bf16.mxu1 %v1696_v2 }
 0x386   : > { %v1012_v42 = vpop.permute.xlu1 %1011 }
 0x387   : > { %v1017_v49 = vsel %vm685_vm1, %v1012_v42, 0 }
 0x389   : > { %v1677_v29 = vpop.eup %1676 }
 0x38a   : > { %v865_v32 = vmul.f32 %v1677_v29, %v1673_v17  ;;  %v1010_v52 = vpop.permute.xlu1 %1009 }
 0x38c   : > { %v866_v33 = vpack.c.bf16 %v865_v32, %v865_v32 }
 0x38e   : > { %1573 = vmatmul.mubr.msk.bf16.vlgmr.msra.gmra.mrb[8].mxu1 %vm685_vm1, %v866_v33 }
 0x38f   : > { %1583 = vmatpush3.bf16.msra.mxu1 %v967_v34  ;;  %1584 = vmatprep.mubr.msk.bf16.mxu1 %vm1698_vm0, %v1696_v2 }
 0x390   : > { %1594 = vmatprep.subr.bf16.mxu1 %v1696_v2 }
 0x3ee   : > { %v794_v36 = vpop.f32.mrb[4].mxu1 }
 0x3ef   : > { %v800_v37 = vpack.c.bf16 %v794_v36, %v794_v36  ;;  %v1562_v38 = vpop.f32.mrb[5].mxu1 }
 0x3f0   : > { %v797_v39 = vpop.f32.mrb[6].mxu1  ;;  %v682_v38 = vld [vmem:[%s2022_s6 + $0xc] sm:$0xf] }
 0x3f1   : > { %v1563_v41 = vpop.f32.mrb[7].mxu1  ;;  %1585 = vmatmul.mubr.msk.bf16.vlgmr.msra.gmra.mrb[12].mxu1 %vm685_vm1, %v800_v37 }
 0x3f2   : > { %1595 = vmatpush3.bf16.msra.mxu1 %v1079_v40  ;;  %1596 = vmatprep.mubr.msk.bf16.mxu1 %vm1698_vm0, %v1696_v2 }
 0x3f3   : > { %1606 = vmatprep.subr.bf16.mxu1 %v1696_v2 }
 0x461   : > { %v910_v43 = vpop.f32.mrb[8].mxu1 }
 0x462   : > { %v916_v45 = vpack.c.bf16 %v910_v43, %v910_v43  ;;  %v1574_v46 = vpop.f32.mrb[9].mxu1 }
 0x463   : > { %v913_v47 = vpop.f32.mrb[10].mxu1 }
 0x464   : > { %v1575_v51 = vpop.f32.mrb[11].mxu1  ;;  %1579 = vmatmul.mubr.msk.bf16.vlgmr.msra.gmra.mrb[12].mxu0 %vm685_vm1, %v916_v45 }
 0x465   : > { %1589 = vmatpush3.bf16.xpose.msra.mxu0 %v1017_v49  ;;  %1590 = vmatprep.mubr.msk.bf16.mxu0 %vm1698_vm0, %v1696_v2 }
 0x466   : > { %1600 = vmatprep.subr.bf16.mxu0 %v1696_v2 }
 0x46c   : > { %1591 = vmatmul.mubr.msk.bf16.vlgmr.msra.gmra.mrb[16].mxu0 %vm685_vm1, %v1010_v52 }
 0x46d   : > { %1602 = vmatprep.mubr.msk.bf16.mxu0 %vm1698_vm0, %v1696_v2 }
 0x4c4   : > { %v1003_v53 = vpop.f32.mrb[12].mxu1 }
 0x4c5   : > { %v1586_v54 = vpop.f32.mrb[13].mxu1 }
 0x4c6   : > { %v1006_v55 = vpop.f32.mrb[14].mxu1 }
 0x4c7   : > { %v1587_v56 = vpop.f32.mrb[15].mxu1 }
 0x537   : > { %v957_v57 = vpop.f32.mrb[12].mxu0 }
 0x538   : > { %v1959_v59 = vadd.f32 %v1003_v53, %v957_v57  ;;  %v1580_v60 = vpop.f32.mrb[13].mxu0  ;;  %v1341_v57 = vand.u32 127, %v547_v30 }
 0x539   : > { %v960_v61 = vpop.f32.mrb[14].mxu0  ;;  %v1493_v60 = vld [vmem:[%s2023_s7] ss:$0 sm:$0xff] }
 0x53a   : > { %v1581_v62 = vpop.f32.mrb[15].mxu0  ;;  %vm1342_vm3 = vcmp.lt.s32.totalorder %v1341_v57, 32 }
 0x53f   : > { %v1053_v63 = vpop.f32.mrb[16].mxu0 }
 0x540   : > { %v1059_v0 = vmul.f32 0.35355338, %v1053_v63  ;;  %v1592_v1 = vpop.f32.mrb[17].mxu0 }
 0x541   : > { %v1056_v3 = vpop.f32.mrb[18].mxu0 }
 0x542   : > { %v1593_v4 = vpop.f32.mrb[19].mxu0  ;;  %v1060_v5 = vadd.f32 %v1915_v58, %v1059_v0  ;;  %v1494_v3 = vsel %vm1342_vm3, 1.0, %v1696_v2 }
 0x544   : > { %v1061_v6 = vsel %vm685_vm1, %v1060_v5, -inf }
 0x545   : > { %1062 = vmax.xlane.f32.xlu1 %v1061_v6 }
 0x5d2   : > { %v1063_v7 = vpop.xlane.xlu1 %1062 }
 0x5d3   : > { %v1064_v8 = vsub.f32 %v1060_v5, %v1063_v7 }
 0x5d5   : > { %v1065_v9 = vmul.f32 1.442695, %v1064_v8 }
 0x5d7   : > { %1678 = vpow2.f32 %v1065_v9 }
 0x5e1   : > { %v1679_v10 = vpop.eup %1678 }
 0x5e2   : > { %v1067_v11 = vsel %vm685_vm1, %v1679_v10, 0.0 }
 0x5e3   : > { %1068 = vadd.xlane.f32.xlu0 %v1067_v11 }
 0x5f9   : > { %1171 = vrot.lane.b32.xlu0 %v1886_v44, %s1701_s19 }
 0x5fd   : > { %1169 = vrot.lane.b32.xlu0 %v1892_v50, %s1701_s19  ;;  %v681_v50 = vld [vmem:[%s2022_s6 + $0x8] sm:$0xf] }
 0x5fe   : > { %v1126_v18 = vsel %vm756_vm2, %v681_v50, 0 }
 0x5ff   : > { %1601 = vmatpush3.bf16.msra.mxu0 %v1126_v18 }
 0x600   : > { %1612 = vmatprep.subr.bf16.mxu0 %v1696_v2 }
 0x670   : > { %v1069_v12 = vpop.xlane.xlu0 %1068 }
 0x671   : > { %1680 = vrcp.f32 %v1069_v12 }
 0x674   : > { %v1172_v15 = vpop.permute.xlu0 %1171 }
 0x675   : > { %v1177_v17 = vsel %vm685_vm1, %v1172_v15, 0 }
 0x678   : > { %v1170_v44 = vpop.permute.xlu0 %1169 }
 0x67b   : > { %v1681_v13 = vpop.eup %1680 }
 0x67c   : > { %v1071_v14 = vmul.f32 %v1681_v13, %v1679_v10 }
 0x67e   : > { %v1072_v16 = vpack.c.bf16 %v1071_v14, %v1071_v14 }
 0x680   : > { %1597 = vmatmul.mubr.msk.bf16.vlgmr.msra.gmra.mrb[16].mxu1 %vm685_vm1, %v1072_v16 }
 0x681   : > { %1607 = vmatpush3.bf16.xpose.msra.mxu1 %v1177_v17  ;;  %1608 = vmatprep.mubr.msk.bf16.mxu1 %vm1698_vm0, %v1696_v2 }
 0x682   : > { %1618 = vmatprep.subr.bf16.mxu1 %v1696_v2 }
 0x688   : > { %1609 = vmatmul.mubr.msk.bf16.vlgmr.msra.gmra.mrb[20].mxu1 %vm685_vm1, %v1170_v44 }
 0x689   : > { %1620 = vmatprep.mubr.msk.bf16.mxu1 %vm1698_vm0, %v1696_v2 }
 0x753   : > { %v1115_v19 = vpop.f32.mrb[16].mxu1 }
 0x754   : > { %v1121_v20 = vpack.c.bf16 %v1115_v19, %v1115_v19  ;;  %v1598_v21 = vpop.f32.mrb[17].mxu1 }
 0x755   : > { %v1118_v22 = vpop.f32.mrb[18].mxu1 }
 0x756   : > { %v1599_v23 = vpop.f32.mrb[19].mxu1  ;;  %1603 = vmatmul.mubr.msk.bf16.vlgmr.msra.gmra.mrb[20].mxu0 %vm685_vm1, %v1121_v20 }
 0x757   : > { %1614 = vmatprep.mubr.msk.bf16.mxu0 %vm1698_vm0, %v1696_v2  ;;  %v1495_v2 = vld [vmem:[%s2025_s9] ss:$0 sm:$0xff] }
 0x75b   : > { %v1213_v24 = vpop.f32.mrb[20].mxu1 }
 0x75c   : > { %v1219_v25 = vmul.f32 0.35355338, %v1213_v24  ;;  %v1610_v26 = vpop.f32.mrb[21].mxu1 }
 0x75d   : > { %v1216_v28 = vpop.f32.mrb[22].mxu1 }
 0x75e   : > { %v1611_v29 = vpop.f32.mrb[23].mxu1  ;;  %v1220_v31 = vadd.f32 %v1915_v58, %v1219_v25  ;;  %v1286_v58 = vsel %vm756_vm2, %v682_v38, 0 }
 0x75f   : > { %1619 = vmatpush3.bf16.msra.mxu1 %v1286_v58 }
 0x760   : > { %v1221_v32 = vsel %vm685_vm1, %v1220_v31, -inf }
 0x761   : > { %1222 = vmax.xlane.f32.xlu0 %v1221_v32 }
 0x7ee   : > { %v1223_v33 = vpop.xlane.xlu0 %1222 }
 0x7ef   : > { %v1224_v34 = vsub.f32 %v1220_v31, %v1223_v33 }
 0x7f1   : > { %v1225_v35 = vmul.f32 1.442695, %v1224_v34 }
 0x7f3   : > { %1682 = vpow2.f32 %v1225_v35 }
 0x7fd   : > { %v1683_v36 = vpop.eup %1682 }
 0x7fe   : > { %v1227_v37 = vsel %vm685_vm1, %v1683_v36, 0.0 }
 0x7ff   : > { %1228 = vadd.xlane.f32.xlu1 %v1227_v37 }
 0x810   : > { %1233 = vrot.lane.b32.xlu1 %v1888_v48, %s1701_s19 }
 0x829   : > { %v1162_v39 = vpop.f32.mrb[20].mxu0 }
 0x82a   : > { %v1168_v40 = vadd.f32 %v1162_v39, %v1959_v59  ;;  %v1604_v41 = vpop.f32.mrb[21].mxu0 }
 0x82b   : > { %v1165_v42 = vpop.f32.mrb[22].mxu0 }
 0x82c   : > { %v1605_v43 = vpop.f32.mrb[23].mxu0 }
 0x88c   : > { %v1229_v45 = vpop.xlane.xlu1 %1228 }
 0x88d   : > { %1684 = vrcp.f32 %v1229_v45 }
 0x890   : > { %v1234_v46 = vpop.permute.xlu1 %1233 }
 0x891   : > { %v1239_v47 = vsel %vm756_vm2, %v1234_v46, 0 }
 0x892   : > { %1613 = vmatpush3.bf16.msra.mxu0 %v1239_v47 }
 0x897   : > { %v1685_v48 = vpop.eup %1684 }
 0x898   : > { %v1231_v49 = vmul.f32 %v1685_v48, %v1683_v36 }
 0x89a   : > { %v1232_v51 = vpack.c.bf16 %v1231_v49, %v1231_v49 }
 0x89c   : > { %1615 = vmatmul.mubr.msk.bf16.vlgmr.msra.gmra.mrb[24].mxu0 %vm685_vm1, %v1232_v51 }
 0x96f   : > { %v1275_v52 = vpop.f32.mrb[24].mxu0 }
 0x970   : > { %v1281_v53 = vpack.c.bf16 %v1275_v52, %v1275_v52  ;;  %v1616_v54 = vpop.f32.mrb[25].mxu0 }
 0x971   : > { %v1278_v55 = vpop.f32.mrb[26].mxu0 }
 0x972   : > { %v1617_v56 = vpop.f32.mrb[27].mxu0  ;;  %1621 = vmatmul.mubr.msk.bf16.vlgmr.msra.gmra.mrb[24].mxu1 %vm685_vm1, %v1281_v53 }
 0xa45   : > { %v1322_v59 = vpop.f32.mrb[24].mxu1 }
 0xa46   : > { %v1328_v61 = vadd.f32 %v1322_v59, %v1168_v40  ;;  %v1622_v62 = vpop.f32.mrb[25].mxu1 }
 0xa47   : > { %v1325_v63 = vpop.f32.mrb[26].mxu1 }
 0xa48   : > { %v1336_v0 = vadd.f32 %v1493_v60, %v1328_v61  ;;  %v1623_v1 = vpop.f32.mrb[27].mxu1 }
 0xa4a   : > { %v1337_v4 = vadd.f32 %v1336_v0, %v1868_v27  ;;  %v1496_v27 = vld [vmem:[%s2026_s10] ss:$0 sm:$0xff] }
 0xa4c   : > { %v1345_v5 = vmul.f32 %v1494_v3, %v1337_v4 }
 0xa4e   : > { %1346 = vadd.xlane.f32.xlu1 %v1345_v5 }
 0xadb   : > { %v1347_v6 = vpop.xlane.xlu1 %1346 }
 0xadc   : > { %v1348_v30 = vmul.f32 0.03125, %v1347_v6 }
 0xade   : > { %v1349_v7 = vsub.f32 %v1337_v4, %v1348_v30 }
 0xae0   : > { %v1350_v8 = vmul.f32 %v1494_v3, %v1349_v7 }
 0xae2   : > { %v1351_v9 = vmul.f32 %v1350_v8, %v1350_v8 }
 0xae4   : > { %1352 = vadd.xlane.f32.xlu0 %v1351_v9 }
 0xb71   : > { %v1353_v10 = vpop.xlane.xlu0 %1352 }
 0xb72   : > { %v1354_v11 = vmul.f32 0.03125, %v1353_v10 }
 0xb74   : > { %v1355_v12 = vadd.f32 1e-05, %v1354_v11 }
 0xb76   : > { %1686 = vrsqrt.f32 %v1355_v12 }
 0xb80   : > { %v1687_v13 = vpop.eup %1686 }
 0xb81   : > { %v1357_v14 = vmul.f32 %v1687_v13, %v1349_v7 }
 0xb83   : > { %v1364_v15 = vmul.f32 %v1495_v2, %v1357_v14 }
 0xb85   : > { %v1371_v16 = vadd.f32 %v1496_v27, %v1364_v15 }
 0xb87   : > { %1372 = vst [vmem:[%s412_s13] sm:$0xff] %v1371_v16 }
 0xb88 PF: > { %s21_s17 = sadd.s32 1, %s1694_s17  }
 0xb89   : > { %p18_p4 = scmp.ge.s32.totalorder %s21_s17, 4  }
 0xb8b   :  { %20 = sbr.rel (!%p18_p4) target bundleno = 1 (0x1), region = 100 }

// kernel: seq2seq_transformer_forward.25
= control target key start
LH: loop header
LB: loop body
LE: loop exit
PB: predicated region body
PF: predicated region fallthrough
CT: control target
= control target key end

     0   :  { %8 = vsyncpa [#allocation3], 0  ;;  %s794_s0 = inlined_call_operand.vmem [shape: f32[16,128], index: 0, kind: input, shape index: {}]   ;;  %s795_s1 = inlined_call_operand.vmem [shape: bf16[128,128], index: 1, kind: input, shape index: {}]   ;;  %s796_s2 = inlined_call_operand.vmem [shape: f32[1,128], index: 2, kind: input, shape index: {}]   ;;  %s797_s3 = inlined_call_operand.hbm [shape: f32[16,128], index: 3, kind: output, shape index: {}]  }
   0x1   :  { %10 = vsyncpa [#allocation3 + $0x1], 0  ;;  %s655_s12 = smov 0   ;;  %s657_s13 = smov 0  }
   0x2   :  { %s659_s14 = smov 0   ;;  %s661_s15 = smov 0  }
   0x3   :  { %s663_s16 = smov 0   ;;  %s665_s17 = smov 0  }
   0x4 LB: > { %s436_s18 = sadd.s32 4294967295, %s630_s17   ;;  %s437_s19 = sadd.s32 4294967294, %s630_s17   ;;  %s630_s17 = sphi %s665_s17, %s16_s17   ;;  %s626_s16 = sphi %s663_s16, %s804_s16   ;;  %s622_s15 = sphi %s661_s15, %s803_s15   ;;  %s618_s14 = sphi %s659_s14, %s802_s14   ;;  %s614_s13 = sphi %s657_s13, %s801_s13   ;;  %s610_s12 = sphi %s655_s12, %s800_s12  }
   0x5   : > { %s28_s20 = sadd.s32 1, %s626_s16  ;;  %s115_s21 = sadd.s32 1, %s618_s14 }
   0x6   : > { %p30_p0 = scmp.ge.s32.totalorder %s28_s20, 2  ;;  %p125_p1 = scmp.ne.s32.totalorder %s618_s14, %s614_s13 }
   0x7   : > { %p126_p2 = scmp.eq.s32.totalorder %s436_s18, 1  ;;  %p131_p3 = scmp.ne.s32.totalorder %s614_s13, %s610_s12 }
   0x8   : > { %s806_s20 = smov (%p30_p0, %s28_s20), 0  ;;  %p132_p5 = scmp.eq.s32.totalorder %s437_s19, 1 }
   0x9   : > { %p695_p4 = por %p126_p2, %p125_p1  ;;  %s110_s23 = ssub.s32 %s626_s16, %s806_s20 }
   0xa   : > { %p442_p6 = scmp.ge.s32.totalorder %s630_s17, 1  ;;  %p113_p7 = scmp.eq.s32.totalorder %s110_s23, 0 }
   0xb   : > { %p702_p8 = por %p132_p5, %p131_p3  ;;  %p170_p9 = scmp.lt.s32.totalorder %s630_s17, 3 }
   0xc   : > { %s708_s25 = scalar_select %p113_p7, %s618_s14, %s115_s21  }
   0xd   : > { %p171_p10 = pnand %p442_p6, %p170_p9 }
   0xe   : > { %v544_v0 = vld [vmem:[%s795_s1] sm:$0xff] (!%p171_p10)   ;;  %v632_v1 = vmov (!%p171_p10), 0.0   ;;  %v545_v2 = vld [vmem:[%s795_s1 + $0x8] sm:$0xff] (!%p171_p10)   ;;  %vm633_vm0 = vmmov (!%p171_p10), 0   ;;  %v546_v3 = vld [vmem:[%s795_s1 + $0x10] sm:$0xff] (!%p171_p10)   ;;  %p200_p11 = scmp.lt.s32.totalorder (!%p171_p10), %s622_s15, 1 }
   0xf   : > { %174 = sbr.rel (%p171_p10) target bundleno = 275 (0x113), region = 32  ;;  %467 = vmatprep.subr.bf16.mxu0 (!%p171_p10), %v632_v1  ;;  %483 = vmatprep.mubr.msk.bf16.mxu0 (!%p171_p10), %vm633_vm0, %v632_v1  ;;  %v547_v4 = vld [vmem:[%s795_s1 + $0x18] sm:$0xff] (!%p171_p10)   ;;  %v548_v5 = vld [vmem:[%s795_s1 + $0x20] sm:$0xff] (!%p171_p10)   ;;  %v549_v6 = vld [vmem:[%s795_s1 + $0x28] sm:$0xff] (!%p171_p10)   ;;  %s197_s30 = sand.u32 (!%p171_p10), 1, %s614_s13  }
  0x10   : > { %468 = vmatpush3.bf16.msra.mxu0 (!%p171_p10), %v544_v0  ;;  %v550_v7 = vld [vmem:[%s795_s1 + $0x30] sm:$0xff] (!%p171_p10)   ;;  %v551_v8 = vld [vmem:[%s795_s1 + $0x38] sm:$0xff] (!%p171_p10)   ;;  %s443_s4 = sshll.u32 (!%p171_p10), %s197_s30, 3  ;;  %v445_v11 = vld [vmem:[%s796_s2] ss:$0 sm:$0xff] (!%p171_p10)  ;;  %s455_s7 = sshll.u32 (!%p171_p10), %s622_s15, 7 }
  0x11   : > { %469 = vmatprep.subr.bf16.mxu0 (!%p171_p10), %v632_v1  ;;  %s199_s8 = scalar_lea.vmem (!%p171_p10), [#allocation2], %s443_s4  ;;  %s327_s19 = scalar_lea.sflag (!%p171_p10), [#allocation3], %s197_s30 }
  0x12   : > { %s634_s21 = smov (!%p171_p10), [#allocation2]  }
  0x13   : > { %s556_s23 = sshll.u32 (!%p171_p10), %s634_s21, 4  ;;  %s557_s23 = int_to_ptr.vmem [resolvable:$false] %s556_s23 }
  0x14   : > { %470 = vmatpush3.bf16.msra.mxu0 (!%p171_p10), %v545_v2  ;;  %s558_s26 = scalar_lea.vmem (!%p171_p10), %s557_s23, 256 }
  0x15   : > { %471 = vmatprep.subr.bf16.mxu0 (!%p171_p10), %v632_v1 }
  0x16   : > { %s201_s9 = scalar_select %p200_p11, %s622_s15, 1 }
  0x18   : > { %472 = vmatpush3.bf16.msra.mxu0 %v546_v3  ;;  %s444_s18 = sshll.u32 %s201_s9, 3  ;;  %s341_s9 = sshll.u32 %s199_s8, 4  ;;  %s749_s9 = int_to_ptr.vmem [resolvable:$true] %s341_s9 }
  0x19   : > { %473 = vmatprep.subr.bf16.mxu0 %v632_v1  ;;  %s203_s27 = scalar_lea.vmem %s794_s0, %s444_s18  ;;  %s747_s18 = scalar_lea.hbm %s797_s3, %s455_s7 }
  0x1a   : > { %v212_v9 = vld [vmem:[%s203_s27] sm:$0xff]  ;;  %s552_s15 = scalar_lea.vmem %s749_s9, 128  ;;  %p559_p1 = scmp.lt.s32.totalorder %s749_s9, %s557_s23 }
  0x1b   : > { %v213_v10 = vpack.c.bf16 %v212_v9, %v212_v9  ;;  %p553_p12 = scmp.ne.s32.totalorder %s749_s9, %s552_s15  ;;  %p560_p2 = scmp.lt.s32.totalorder %s558_s26, %s552_s15 }
  0x1c   : > { %474 = vmatpush3.bf16.msra.mxu0 %v547_v4 }
  0x1d   : > { %475 = vmatprep.subr.bf16.mxu0 %v632_v1  ;;  %p554_p13 = pnand %p553_p12, %p695_p4  ;;  %p561_p3 = por %p560_p2, %p559_p1 }
  0x1f   : > { %p555_p0 = pneg %p554_p13 }
  0x20   : > { %476 = vmatpush3.bf16.msra.mxu0 %v548_v5 }
  0x21   : > { %477 = vmatprep.subr.bf16.mxu0 %v632_v1  ;;  %p562_p5 = pnand %p561_p3, %p555_p0 }
  0x24   : > { %478 = vmatpush3.bf16.msra.mxu0 %v549_v6 }
  0x25   : > { %479 = vmatprep.subr.bf16.mxu0 %v632_v1 }
  0x28   : > { %480 = vmatpush3.bf16.msra.mxu0 %v550_v7 }
  0x29   : > { %481 = vmatprep.subr.bf16.mxu0 %v632_v1 }
  0x2c   : > { %482 = vmatpush3.bf16.msra.mxu0 %v551_v8 }
  0x2f   : > { %484 = vmatmul.mubr.bf16.vlgmr.msra.gmra.mrb[0].mxu0 %v213_v10 }
 0x102   : > { %v319_v12 = vpop.f32.mrb[0].mxu0 }
 0x103   : > { %v320_v13 = vadd.f32 %v445_v11, %v319_v12  ;;  %v485_v14 = vpop.f32.mrb[1].mxu0 }
 0x104   : > { %v322_v15 = vpop.f32.mrb[2].mxu0 }
 0x105   : > { %325 = vst [vmem:[%s199_s8] sm:$0xff] %v320_v13  ;;  %v486_v16 = vpop.f32.mrb[3].mxu0 }
 0x106   : > { %565 = shalt.err (!%p562_p5)
}
 0x107   : > { %s566_s27 = scalar_lea.hbm %s747_s18, 128  ;;  %s570_s30 = scalar_lea.hbm %s797_s3, 256 }
 0x108   : > { %p567_p6 = scmp.ne.s32.totalorder %s747_s18, %s566_s27  ;;  %p571_p10 = scmp.lt.u32.totalorder %s747_s18, %s797_s3 }
 0x109   : > { %p572_p11 = scmp.lt.u32.totalorder %s570_s30, %s566_s27  ;;  %p574_p13 = scmp.lt.u32.totalorder %s566_s27, %s747_s18 }
 0x10a   : > { %p568_p7 = pnand %p567_p6, %p695_p4 }
 0x10b   : > { %p573_p12 = por %p572_p11, %p571_p10 }
 0x10c   : > { %p569_p9 = pneg %p568_p7 }
 0x10d   : > { %p575_p0 = por %p574_p13, %p573_p12 }
 0x10f   : > { %p576_p1 = pnand %p575_p0, %p569_p9 }
 0x111   : > { %579 = shalt.err (!%p576_p1)
}
 0x112   : > { %487 = dma.vmem_to_hbm [thread:$0]  (%p695_p4), %s749_s9, 128, %s747_s18, %s327_s19  }
 0x113 PF: > { %p493_p2 = scmp.ge.s32.totalorder %s630_s17, 2  ;;  %s353_s6 = sand.u32 1, %s610_s12  }
 0x114   : > { %s354_s7 = scalar_lea.sflag [#allocation3], %s353_s6 }
 0x115   : > { %p490_p3 = pnand %p493_p2, %p702_p8 }
 0x117   : > { %605 = dma.done.wait (!%p490_p3), %s354_s7, 128  }
 0x118   : > { %607 = vsyncadd (!%p490_p3), %s354_s7, 4294967168  ;;  %s16_s17 = sadd.s32 1, %s630_s17   ;;  %s800_s12 = smov %s614_s13 }
 0x119   : > { %p13_p5 = scmp.ge.s32.totalorder %s16_s17, 4   ;;  %s801_s13 = smov %s618_s14 }
 0x11a   : > { %s802_s14 = smov %s708_s25  ;;  %s803_s15 = smov %s626_s16 }
 0x11b   : > { %s804_s16 = smov %s806_s20  ;;  %15 = sbr.rel (!%p13_p5) target bundleno = 4 (0x4), region = 73 }
 0x122   :  { %359 = vsyncpa [#allocation3], 1 }
 0x123   :  { %361 = vsyncpa [#allocation3 + $0x1], 1 }

</bundles_post_ra>
